<compile_context>
chip_gen: v7x
topology: tpu7x:2x2x1
jax: 0.10.0
libtpu: 0.0.40
codegen_flags: <defaults>
</compile_context>

<pallas_src>
import functools

import jax
import jax.numpy as jnp
import numpy as np
from jax import lax
from jax.experimental import pallas as pl
from jax.experimental.pallas import tpu as pltpu

BN_EPS = 1e-5

_VMEM = pl.BlockSpec(memory_space=pltpu.MemorySpace.VMEM)
_SMEM = pl.BlockSpec(memory_space=pltpu.MemorySpace.SMEM)


# ---------------------------------------------------------------------------
# Fused Pallas kernel: the whole LeNet5 forward pass.
# ---------------------------------------------------------------------------
def _lenet5_kernel(n_ref, xs_ref, w1_ref, s1_ref, st1_ref, g1_ref, be1_ref,
                   w2_ref, s2_ref, st2_ref, g2_ref, be2_ref,
                   wf0_ref, bf0_ref, wf1_ref, bf1_ref, wf2_ref, bf2_ref,
                   out_ref):
    f32 = jnp.float32
    bf16 = jnp.bfloat16
    npad = out_ref.shape[0]
    n_real = n_ref[0]                       # dynamic batch size (SMEM scalar)

    # -------- layer 1: conv(1->6, k=5) as one deep-K matmul per row class ---
    # xs rows : (a*7 + m)*npad + n   (output image row i = 4m + a)
    # xs lanes: kh*32 + w            (5 kernel rows pre-concatenated -> K=160)
    # W1 cols : 128*g + u*6 + c      (output col j = 2u+g; lanes 84..127 of
    #                                 each half are zero padding)
    w1 = w1_ref[...]                                        # (160, 256) bf16
    ones1 = jnp.ones((1, 7 * npad), f32)
    c1 = []
    s256 = jnp.zeros((1, 256), f32)
    q256 = jnp.zeros((1, 256), f32)
    for a in range(4):
        lhs = xs_ref[a * 7 * npad:(a + 1) * 7 * npad, :].astype(bf16)
        v = jnp.dot(lhs, w1, preferred_element_type=f32)    # (7*npad, 256)
        c1.append(v)
        # BN batch statistics: row reductions on the MXU (ones-row matmuls).
        s256 = s256 + jnp.dot(ones1, v, preferred_element_type=f32)
        q256 = q256 + jnp.dot(ones1, v * v, preferred_element_type=f32)

    cnt1 = (n_real * (28 * 28)).astype(f32)
    sum1 = jnp.dot(s256, s1_ref[...], preferred_element_type=f32)   # (1, 6)
    sq1 = jnp.dot(q256, s1_ref[...], preferred_element_type=f32)
    mean1 = sum1 / cnt1
    var1 = jnp.maximum(sq1 / cnt1 - mean1 * mean1, 0.0)     # clamp: no NaN
    scale1 = lax.rsqrt(var1 + BN_EPS) * g1_ref[...]
    shift1 = be1_ref[...] - mean1 * scale1
    scale1l = jnp.dot(scale1, st1_ref[...], preferred_element_type=f32)  # (1,256)
    shift1l = jnp.dot(shift1, st1_ref[...], preferred_element_type=f32)

    def bn_relu_poolw1(v):
        z = jnp.maximum(v * scale1l + shift1l, 0.0)
        return jnp.maximum(z[:, :128], z[:, 128:])          # width 2x2-pool

    # height pool: rows {4m, 4m+1} -> even pooled rows, {4m+2, 4m+3} -> odd.
    p1 = [jnp.maximum(bn_relu_poolw1(c1[0]), bn_relu_poolw1(c1[1])),
          jnp.maximum(bn_relu_poolw1(c1[2]), bn_relu_poolw1(c1[3]))]

    # Re-zero padded batch rows so they cannot pollute layer-2 BN statistics.
    row_n = lax.broadcasted_iota(jnp.int32, (7 * npad, 1), 0) % npad
    bmask = (row_n < n_real).astype(f32)
    p1 = [p1[0] * bmask, p1[1] * bmask]                     # (7*npad, 128) each

    # -------- layer 2: conv(6->16, k=5) as one deep-K matmul per parity ----
    # LHS lanes: kh*128 + (pooled col)*6 + ci  (128-lane aligned concat).
    w2 = w2_ref[...]                                        # (640, 256) bf16
    ones2 = jnp.ones((1, 5 * npad), f32)
    c2 = []
    t256 = jnp.zeros((1, 256), f32)
    r256 = jnp.zeros((1, 256), f32)
    for a in range(2):
        parts = []
        for kh in range(5):
            par = (a + kh) % 2
            s0 = (a + kh) // 2
            parts.append(p1[par][s0 * npad:(s0 + 5) * npad, :])
        lhs = jnp.concatenate(parts, axis=1).astype(bf16)   # (5*npad, 640)
        v = jnp.dot(lhs, w2, preferred_element_type=f32)    # (5*npad, 256)
        c2.append(v)
        t256 = t256 + jnp.dot(ones2, v, preferred_element_type=f32)
        r256 = r256 + jnp.dot(ones2, v * v, preferred_element_type=f32)

    cnt2 = (n_real * (10 * 10)).astype(f32)
    sum2 = jnp.dot(t256, s2_ref[...], preferred_element_type=f32)   # (1, 16)
    sq2 = jnp.dot(r256, s2_ref[...], preferred_element_type=f32)
    mean2 = sum2 / cnt2
    var2 = jnp.maximum(sq2 / cnt2 - mean2 * mean2, 0.0)
    scale2 = lax.rsqrt(var2 + BN_EPS) * g2_ref[...]
    shift2 = be2_ref[...] - mean2 * scale2
    scale2l = jnp.dot(scale2, st2_ref[...], preferred_element_type=f32)  # (1,256)
    shift2l = jnp.dot(shift2, st2_ref[...], preferred_element_type=f32)

    def bn_relu_poolw2(v):
        z = jnp.maximum(v * scale2l + shift2l, 0.0)
        return jnp.maximum(z[:, :128], z[:, 128:])

    # Padded batch rows become nonzero here (shift leak) -- harmless because
    # the wrapper slices out[:n]; keep that invariant.
    p2 = jnp.maximum(bn_relu_poolw2(c2[0]), bn_relu_poolw2(c2[1]))  # (5*npad, 128)

    # -------- fc head: 400 -> 120 -> 84 -> num_classes (128-lane padded) ----
    # NCHW flatten order is folded into wf0's row permutation at init time.
    p2flat = jnp.concatenate(
        [p2[i2 * npad:(i2 + 1) * npad, :] for i2 in range(5)],
        axis=1).astype(bf16)                                # (npad, 640)
    h = jnp.dot(p2flat, wf0_ref[...], preferred_element_type=f32) + bf0_ref[...]
    h = jnp.maximum(h, 0.0)                                 # (npad, 128)
    h = jnp.dot(h.astype(bf16), wf1_ref[...],
                preferred_element_type=f32) + bf1_ref[...]
    h = jnp.maximum(h, 0.0)
    out_ref[...] = (jnp.dot(h.astype(bf16), wf2_ref[...],
                            preferred_element_type=f32) + bf2_ref[...])


# ---------------------------------------------------------------------------
# Parameter construction (PyTorch-equivalent layout) and one-time re-layout.
# ---------------------------------------------------------------------------
def init_params(key, num_classes=10):
    """Deterministic synthetic parameters in PyTorch-equivalent layouts."""
    ks = jax.random.split(key, 8)
    scale = 0.1
    return {
        # layer1: Conv2d(1, 6, k=5) + BatchNorm2d(6)
        "w1": scale * jax.random.normal(ks[0], (6, 1, 5, 5), jnp.float32),
        "b1": scale * jax.random.normal(ks[1], (6,), jnp.float32),   # cancels in BN
        "g1": jnp.ones((6,), jnp.float32),
        "be1": jnp.zeros((6,), jnp.float32),
        # layer2: Conv2d(6, 16, k=5) + BatchNorm2d(16)
        "w2": scale * jax.random.normal(ks[2], (16, 6, 5, 5), jnp.float32),
        "b2": scale * jax.random.normal(ks[3], (16,), jnp.float32),  # cancels in BN
        "g2": jnp.ones((16,), jnp.float32),
        "be2": jnp.zeros((16,), jnp.float32),
        # fc: 400->120, fc1: 120->84, fc2: 84->num_classes
        "wf0": scale * jax.random.normal(ks[4], (400, 120), jnp.float32),
        "bf0": jnp.zeros((120,), jnp.float32),
        "wf1": scale * jax.random.normal(ks[5], (120, 84), jnp.float32),
        "bf1": jnp.zeros((84,), jnp.float32),
        "wf2": scale * jax.random.normal(ks[6], (84, num_classes), jnp.float32),
        "bf2": jnp.zeros((num_classes,), jnp.float32),
    }


def prepare_kernel_params(p, num_classes=10):
    """One-time (hoisted) re-layout into the deep-K banded / lane-padded /
    bf16 form consumed by the fused kernel."""
    w1 = np.asarray(p["w1"], np.float32)          # (6, 1, 5, 5)
    w2 = np.asarray(p["w2"], np.float32)          # (16, 6, 5, 5)

    # conv1: rows kh*32 + input_col, cols 128*g + u*6 + c  (output col j=2u+g).
    w1b = np.zeros((160, 256), np.float32)
    for kh in range(5):
        for g in range(2):
            for u in range(14):
                for kw in range(5):
                    for c in range(6):
                        w1b[kh * 32 + 2 * u + g + kw,
                            128 * g + u * 6 + c] = w1[c, 0, kh, kw]

    # conv2: rows kh*128 + (pooled col)*6 + ci, cols 128*g + u*16 + co.
    w2b = np.zeros((640, 256), np.float32)
    for kh in range(5):
        for g in range(2):
            for u in range(5):
                for kw in range(5):
                    for ci in range(6):
                        for co in range(16):
                            w2b[kh * 128 + (2 * u + g + kw) * 6 + ci,
                                128 * g + u * 16 + co] = w2[co, ci, kh, kw]

    # channel fold (256 -> C) / broadcast (C -> 256) matrices for BN stats.
    s1 = np.zeros((256, 6), np.float32)
    for g in range(2):
        for u in range(14):
            for c in range(6):
                s1[128 * g + u * 6 + c, c] = 1.0
    s2 = np.zeros((256, 16), np.float32)
    for g in range(2):
        for u in range(5):
            for co in range(16):
                s2[128 * g + u * 16 + co, co] = 1.0

    # fc weights: fold PyTorch NCHW flatten order into wf0, pad to 128 lanes.
    wf0 = np.asarray(p["wf0"], np.float32)        # (400, 120)
    wf0b = np.zeros((640, 128), np.float32)
    for i2 in range(5):
        for j2 in range(5):
            for co in range(16):
                wf0b[i2 * 128 + j2 * 16 + co, :120] = wf0[co * 25 + i2 * 5 + j2, :]
    wf1p = np.zeros((128, 128), np.float32)
    wf1p[:120, :84] = np.asarray(p["wf1"], np.float32)
    wf2p = np.zeros((128, 128), np.float32)
    wf2p[:84, :num_classes] = np.asarray(p["wf2"], np.float32)
    bf0p = np.zeros((1, 128), np.float32); bf0p[0, :120] = np.asarray(p["bf0"], np.float32)
    bf1p = np.zeros((1, 128), np.float32); bf1p[0, :84] = np.asarray(p["bf1"], np.float32)
    bf2p = np.zeros((1, 128), np.float32); bf2p[0, :num_classes] = np.asarray(p["bf2"], np.float32)

    # NOTE: conv biases b1/b2 are intentionally unused: train-mode BatchNorm
    # subtracts the batch mean right after the conv, so a per-channel bias
    # cancels exactly and never affects the forward output.
    return {
        "w1": jnp.asarray(w1b, jnp.bfloat16),
        "w2": jnp.asarray(w2b, jnp.bfloat16),
        "s1": jnp.asarray(s1), "st1": jnp.asarray(s1.T.copy()),
        "s2": jnp.asarray(s2), "st2": jnp.asarray(s2.T.copy()),
        "g1": jnp.asarray(np.asarray(p["g1"], np.float32).reshape(1, 6)),
        "be1": jnp.asarray(np.asarray(p["be1"], np.float32).reshape(1, 6)),
        "g2": jnp.asarray(np.asarray(p["g2"], np.float32).reshape(1, 16)),
        "be2": jnp.asarray(np.asarray(p["be2"], np.float32).reshape(1, 16)),
        "wf0": jnp.asarray(wf0b, jnp.bfloat16),
        "wf1": jnp.asarray(wf1p, jnp.bfloat16),
        "wf2": jnp.asarray(wf2p, jnp.bfloat16),
        "bf0": jnp.asarray(bf0p), "bf1": jnp.asarray(bf1p), "bf2": jnp.asarray(bf2p),
    }


# ---------------------------------------------------------------------------
# Forward pass wrapper.
# ---------------------------------------------------------------------------
def _prep_input(x_nchw, npad):
    """(N,1,32,32) -> (28*npad, 160): row (a*7 + m)*npad + n holds, at lane
    kh*32 + w, the pixel x[n, 4m + a + kh, w] (deep-K conv1 LHS, row class a).
    TODO(synk): at large batch, fold this re-layout into a batch-tiled
    pipeline instead of a whole-batch XLA transpose in HBM."""
    n = x_nchw.shape[0]
    x = x_nchw.reshape(n, 32, 32)
    if npad != n:
        x = jnp.concatenate([x, jnp.zeros((npad - n, 32, 32), x.dtype)], axis=0)
    xt = jnp.transpose(x, (1, 0, 2))                 # (32, npad, 32)  [h, n, w]
    pieces = []
    for a in range(4):
        blocks = [xt[a + kh:a + kh + 25:4] for kh in range(5)]  # 5 x (7,npad,32)
        pieces.append(jnp.stack(blocks, axis=2).reshape(7 * npad, 160))
    return jnp.concatenate(pieces, axis=0)           # (28*npad, 160)


@functools.partial(jax.jit, static_argnames=("num_classes",))
def lenet5_forward(x_nchw, kp, num_classes=10):
    n, cin, h, w = x_nchw.shape
    assert (cin, h, w) == (1, 32, 32), "LeNet5 expects (N, 1, 32, 32) inputs"
    npad = ((n + 7) // 8) * 8                        # sublane-aligned batch
    xs = _prep_input(x_nchw, npad)
    n_arr = jnp.full((1,), n, jnp.int32)             # SMEM scalar operand

    flops = 2 * npad * (4 * 7 * 160 * 256 + 2 * 5 * 640 * 256
                        + 640 * 128 + 2 * 128 * 128)
    bytes_acc = int(xs.size) * 4 + npad * 128 * 4 \
        + sum(int(v.size) * v.dtype.itemsize for v in kp.values())
    cost = pl.CostEstimate(flops=int(flops), transcendentals=32,
                           bytes_accessed=int(bytes_acc))

    # TODO(synk): batch-tile grid + two-pass BN (per-tile sum/sumsq reduce,
    # then an apply pass) would unlock v7x megacore and pipelined DMA; the
    # single whole-batch call keeps train-mode BN stats exact in one pass and
    # fits easily in VMEM at these sizes.  48 MiB stays under v7x's 64 MiB.
    out = pl.pallas_call(
        _lenet5_kernel,
        out_shape=jax.ShapeDtypeStruct((npad, 128), jnp.float32),
        in_specs=[_SMEM] + [_VMEM] * 17,
        out_specs=_VMEM,
        compiler_params=pltpu.CompilerParams(
            vmem_limit_bytes=48 * 1024 * 1024),
        cost_estimate=cost,
    )(n_arr, xs,
      kp["w1"], kp["s1"], kp["st1"], kp["g1"], kp["be1"],
      kp["w2"], kp["s2"], kp["st2"], kp["g2"], kp["be2"],
      kp["wf0"], kp["bf0"], kp["wf1"], kp["bf1"], kp["wf2"], kp["bf2"])

    return out[:n, :num_classes]


if __name__ == "__main__":
    key = jax.random.PRNGKey(0)
    k_x, k_p = jax.random.split(key)
    # LeNet5's fc layer expects 400 features => input must be (N, 1, 32, 32).
    x = jax.random.normal(k_x, (2, 1, 32, 32), jnp.float32)

    params = init_params(k_p, num_classes=10)            # PyTorch-style params
    kparams = prepare_kernel_params(params, num_classes=10)  # hoisted re-layout

    out = lenet5_forward(x, kparams, num_classes=10)
    out = jax.block_until_ready(out)
    assert out.shape == (2, 10), out.shape
    assert bool(jnp.isfinite(out).all()), "non-finite logits"
    print("KERNEL_OK")
</pallas_src>

<mosaic_0001>
module attributes {stable_mosaic.version = 11 : i64} {
  func.func @_lenet5_kernel(%arg0: memref<1xi32, #tpu.memory_space<smem>>, %arg1: memref<224x160xf32, #tpu.memory_space<vmem>>, %arg2: memref<160x256xbf16, #tpu.memory_space<vmem>>, %arg3: memref<256x6xf32, #tpu.memory_space<vmem>>, %arg4: memref<6x256xf32, #tpu.memory_space<vmem>>, %arg5: memref<1x6xf32, #tpu.memory_space<vmem>>, %arg6: memref<1x6xf32, #tpu.memory_space<vmem>>, %arg7: memref<640x256xbf16, #tpu.memory_space<vmem>>, %arg8: memref<256x16xf32, #tpu.memory_space<vmem>>, %arg9: memref<16x256xf32, #tpu.memory_space<vmem>>, %arg10: memref<1x16xf32, #tpu.memory_space<vmem>>, %arg11: memref<1x16xf32, #tpu.memory_space<vmem>>, %arg12: memref<640x128xbf16, #tpu.memory_space<vmem>>, %arg13: memref<1x128xf32, #tpu.memory_space<vmem>>, %arg14: memref<128x128xbf16, #tpu.memory_space<vmem>>, %arg15: memref<1x128xf32, #tpu.memory_space<vmem>>, %arg16: memref<128x128xbf16, #tpu.memory_space<vmem>>, %arg17: memref<1x128xf32, #tpu.memory_space<vmem>>, %arg18: memref<8x128xf32, #tpu.memory_space<vmem>>) attributes {dimension_semantics = [], scalar_prefetch = 0 : i64, scratch_operands = 0 : i64, tpu.core_type = #tpu.core_type<tc>} {
    %c0 = arith.constant 0 : index
    %0 = memref.load %arg0[%c0] : memref<1xi32, #tpu.memory_space<smem>>
    %c0_0 = arith.constant 0 : index
    %c0_1 = arith.constant 0 : index
    %1 = vector.load %arg2[%c0_0, %c0_1] : memref<160x256xbf16, #tpu.memory_space<vmem>>, vector<160x256xbf16>
    %cst = arith.constant 1.000000e+00 : f32
    %2 = vector.broadcast %cst : f32 to vector<1x56xf32>
    %cst_2 = arith.constant 0.000000e+00 : f32
    %3 = vector.broadcast %cst_2 : f32 to vector<1x256xf32>
    %cst_3 = arith.constant 0.000000e+00 : f32
    %4 = vector.broadcast %cst_3 : f32 to vector<1x256xf32>
    %c0_4 = arith.constant 0 : index
    %c0_5 = arith.constant 0 : index
    %5 = vector.load %arg1[%c0_4, %c0_5] : memref<224x160xf32, #tpu.memory_space<vmem>>, vector<56x160xf32>
    %6 = arith.truncf %5 : vector<56x160xf32> to vector<56x160xbf16>
    %cst_6 = arith.constant dense<0.000000e+00> : vector<56x256xf32>
    %7 = tpu.matmul %6, %1, %cst_6 {dimension_numbers = #tpu.dot_dimension_numbers<[1], [0], [0], [1], [0, 0, 1, 1], [], []>} : vector<56x160xbf16>, vector<160x256xbf16>, vector<56x256xf32> -> vector<56x256xf32>
    %cst_7 = arith.constant dense<0.000000e+00> : vector<1x256xf32>
    %8 = tpu.matmul %2, %7, %cst_7 {dimension_numbers = #tpu.dot_dimension_numbers<[1], [0], [0], [1], [0, 0, 1, 1], [], []>} : vector<1x56xf32>, vector<56x256xf32>, vector<1x256xf32> -> vector<1x256xf32>
    %9 = arith.addf %3, %8 : vector<1x256xf32>
    %10 = arith.mulf %7, %7 : vector<56x256xf32>
    %cst_8 = arith.constant dense<0.000000e+00> : vector<1x256xf32>
    %11 = tpu.matmul %2, %10, %cst_8 {dimension_numbers = #tpu.dot_dimension_numbers<[1], [0], [0], [1], [0, 0, 1, 1], [], []>} : vector<1x56xf32>, vector<56x256xf32>, vector<1x256xf32> -> vector<1x256xf32>
    %12 = arith.addf %4, %11 : vector<1x256xf32>
    %c56 = arith.constant 56 : index
    %c0_9 = arith.constant 0 : index
    %13 = vector.load %arg1[%c56, %c0_9] : memref<224x160xf32, #tpu.memory_space<vmem>>, vector<56x160xf32>
    %14 = arith.truncf %13 : vector<56x160xf32> to vector<56x160xbf16>
    %cst_10 = arith.constant dense<0.000000e+00> : vector<56x256xf32>
    %15 = tpu.matmul %14, %1, %cst_10 {dimension_numbers = #tpu.dot_dimension_numbers<[1], [0], [0], [1], [0, 0, 1, 1], [], []>} : vector<56x160xbf16>, vector<160x256xbf16>, vector<56x256xf32> -> vector<56x256xf32>
    %cst_11 = arith.constant dense<0.000000e+00> : vector<1x256xf32>
    %16 = tpu.matmul %2, %15, %cst_11 {dimension_numbers = #tpu.dot_dimension_numbers<[1], [0], [0], [1], [0, 0, 1, 1], [], []>} : vector<1x56xf32>, vector<56x256xf32>, vector<1x256xf32> -> vector<1x256xf32>
    %17 = arith.addf %9, %16 : vector<1x256xf32>
    %18 = arith.mulf %15, %15 : vector<56x256xf32>
    %cst_12 = arith.constant dense<0.000000e+00> : vector<1x256xf32>
    %19 = tpu.matmul %2, %18, %cst_12 {dimension_numbers = #tpu.dot_dimension_numbers<[1], [0], [0], [1], [0, 0, 1, 1], [], []>} : vector<1x56xf32>, vector<56x256xf32>, vector<1x256xf32> -> vector<1x256xf32>
    %20 = arith.addf %12, %19 : vector<1x256xf32>
    %c112 = arith.constant 112 : index
    %c0_13 = arith.constant 0 : index
    %21 = vector.load %arg1[%c112, %c0_13] : memref<224x160xf32, #tpu.memory_space<vmem>>, vector<56x160xf32>
    %22 = arith.truncf %21 : vector<56x160xf32> to vector<56x160xbf16>
    %cst_14 = arith.constant dense<0.000000e+00> : vector<56x256xf32>
    %23 = tpu.matmul %22, %1, %cst_14 {dimension_numbers = #tpu.dot_dimension_numbers<[1], [0], [0], [1], [0, 0, 1, 1], [], []>} : vector<56x160xbf16>, vector<160x256xbf16>, vector<56x256xf32> -> vector<56x256xf32>
    %cst_15 = arith.constant dense<0.000000e+00> : vector<1x256xf32>
    %24 = tpu.matmul %2, %23, %cst_15 {dimension_numbers = #tpu.dot_dimension_numbers<[1], [0], [0], [1], [0, 0, 1, 1], [], []>} : vector<1x56xf32>, vector<56x256xf32>, vector<1x256xf32> -> vector<1x256xf32>
    %25 = arith.addf %17, %24 : vector<1x256xf32>
    %26 = arith.mulf %23, %23 : vector<56x256xf32>
    %cst_16 = arith.constant dense<0.000000e+00> : vector<1x256xf32>
    %27 = tpu.matmul %2, %26, %cst_16 {dimension_numbers = #tpu.dot_dimension_numbers<[1], [0], [0], [1], [0, 0, 1, 1], [], []>} : vector<1x56xf32>, vector<56x256xf32>, vector<1x256xf32> -> vector<1x256xf32>
    %28 = arith.addf %20, %27 : vector<1x256xf32>
    %c168 = arith.constant 168 : index
    %c0_17 = arith.constant 0 : index
    %29 = vector.load %arg1[%c168, %c0_17] : memref<224x160xf32, #tpu.memory_space<vmem>>, vector<56x160xf32>
    %30 = arith.truncf %29 : vector<56x160xf32> to vector<56x160xbf16>
    %cst_18 = arith.constant dense<0.000000e+00> : vector<56x256xf32>
    %31 = tpu.matmul %30, %1, %cst_18 {dimension_numbers = #tpu.dot_dimension_numbers<[1], [0], [0], [1], [0, 0, 1, 1], [], []>} : vector<56x160xbf16>, vector<160x256xbf16>, vector<56x256xf32> -> vector<56x256xf32>
    %cst_19 = arith.constant dense<0.000000e+00> : vector<1x256xf32>
    %32 = tpu.matmul %2, %31, %cst_19 {dimension_numbers = #tpu.dot_dimension_numbers<[1], [0], [0], [1], [0, 0, 1, 1], [], []>} : vector<1x56xf32>, vector<56x256xf32>, vector<1x256xf32> -> vector<1x256xf32>
    %33 = arith.addf %25, %32 : vector<1x256xf32>
    %34 = arith.mulf %31, %31 : vector<56x256xf32>
    %cst_20 = arith.constant dense<0.000000e+00> : vector<1x256xf32>
    %35 = tpu.matmul %2, %34, %cst_20 {dimension_numbers = #tpu.dot_dimension_numbers<[1], [0], [0], [1], [0, 0, 1, 1], [], []>} : vector<1x56xf32>, vector<56x256xf32>, vector<1x256xf32> -> vector<1x256xf32>
    %36 = arith.addf %28, %35 : vector<1x256xf32>
    %c784_i32 = arith.constant 784 : i32
    %37 = arith.muli %0, %c784_i32 : i32
    %38 = arith.sitofp %37 : i32 to f32
    %c0_21 = arith.constant 0 : index
    %c0_22 = arith.constant 0 : index
    %39 = vector.load %arg3[%c0_21, %c0_22] : memref<256x6xf32, #tpu.memory_space<vmem>>, vector<256x6xf32>
    %cst_23 = arith.constant dense<0.000000e+00> : vector<1x6xf32>
    %40 = tpu.matmul %33, %39, %cst_23 {dimension_numbers = #tpu.dot_dimension_numbers<[1], [0], [0], [1], [0, 0, 1, 1], [], []>} : vector<1x256xf32>, vector<256x6xf32>, vector<1x6xf32> -> vector<1x6xf32>
    %c0_24 = arith.constant 0 : index
    %c0_25 = arith.constant 0 : index
    %41 = vector.load %arg3[%c0_24, %c0_25] : memref<256x6xf32, #tpu.memory_space<vmem>>, vector<256x6xf32>
    %cst_26 = arith.constant dense<0.000000e+00> : vector<1x6xf32>
    %42 = tpu.matmul %36, %41, %cst_26 {dimension_numbers = #tpu.dot_dimension_numbers<[1], [0], [0], [1], [0, 0, 1, 1], [], []>} : vector<1x256xf32>, vector<256x6xf32>, vector<1x6xf32> -> vector<1x6xf32>
    %43 = vector.broadcast %38 : f32 to vector<1x6xf32>
    %44 = arith.divf %40, %43 : vector<1x6xf32>
    %45 = vector.broadcast %38 : f32 to vector<1x6xf32>
    %46 = arith.divf %42, %45 : vector<1x6xf32>
    %47 = arith.mulf %44, %44 : vector<1x6xf32>
    %48 = arith.subf %46, %47 : vector<1x6xf32>
    %cst_27 = arith.constant 0.000000e+00 : f32
    %49 = vector.broadcast %cst_27 : f32 to vector<1x6xf32>
    %50 = arith.maximumf %48, %49 : vector<1x6xf32>
    %cst_28 = arith.constant 9.99999974E-6 : f32
    %51 = vector.broadcast %cst_28 : f32 to vector<1x6xf32>
    %52 = arith.addf %50, %51 : vector<1x6xf32>
    %53 = math.rsqrt %52 : vector<1x6xf32>
    %c0_29 = arith.constant 0 : index
    %c0_30 = arith.constant 0 : index
    %54 = vector.load %arg5[%c0_29, %c0_30] : memref<1x6xf32, #tpu.memory_space<vmem>>, vector<1x6xf32>
    %55 = arith.mulf %53, %54 : vector<1x6xf32>
    %c0_31 = arith.constant 0 : index
    %c0_32 = arith.constant 0 : index
    %56 = vector.load %arg6[%c0_31, %c0_32] : memref<1x6xf32, #tpu.memory_space<vmem>>, vector<1x6xf32>
    %57 = arith.mulf %44, %55 : vector<1x6xf32>
    %58 = arith.subf %56, %57 : vector<1x6xf32>
    %c0_33 = arith.constant 0 : index
    %c0_34 = arith.constant 0 : index
    %59 = vector.load %arg4[%c0_33, %c0_34] : memref<6x256xf32, #tpu.memory_space<vmem>>, vector<6x256xf32>
    %cst_35 = arith.constant dense<0.000000e+00> : vector<1x256xf32>
    %60 = tpu.matmul %55, %59, %cst_35 {dimension_numbers = #tpu.dot_dimension_numbers<[1], [0], [0], [1], [0, 0, 1, 1], [], []>} : vector<1x6xf32>, vector<6x256xf32>, vector<1x256xf32> -> vector<1x256xf32>
    %c0_36 = arith.constant 0 : index
    %c0_37 = arith.constant 0 : index
    %61 = vector.load %arg4[%c0_36, %c0_37] : memref<6x256xf32, #tpu.memory_space<vmem>>, vector<6x256xf32>
    %cst_38 = arith.constant dense<0.000000e+00> : vector<1x256xf32>
    %62 = tpu.matmul %58, %61, %cst_38 {dimension_numbers = #tpu.dot_dimension_numbers<[1], [0], [0], [1], [0, 0, 1, 1], [], []>} : vector<1x6xf32>, vector<6x256xf32>, vector<1x256xf32> -> vector<1x256xf32>
    %63 = vector.broadcast %60 : vector<1x256xf32> to vector<56x256xf32>
    %64 = arith.mulf %7, %63 : vector<56x256xf32>
    %65 = vector.broadcast %62 : vector<1x256xf32> to vector<56x256xf32>
    %66 = arith.addf %64, %65 : vector<56x256xf32>
    %cst_39 = arith.constant 0.000000e+00 : f32
    %67 = vector.broadcast %cst_39 : f32 to vector<56x256xf32>
    %68 = arith.maximumf %66, %67 : vector<56x256xf32>
    %69 = vector.extract_strided_slice %68 {offsets = [0, 0], sizes = [56, 128], strides = [1, 1]} : vector<56x256xf32> to vector<56x128xf32>
    %70 = vector.extract_strided_slice %68 {offsets = [0, 128], sizes = [56, 128], strides = [1, 1]} : vector<56x256xf32> to vector<56x128xf32>
    %71 = arith.maximumf %69, %70 : vector<56x128xf32>
    %72 = vector.broadcast %60 : vector<1x256xf32> to vector<56x256xf32>
    %73 = arith.mulf %15, %72 : vector<56x256xf32>
    %74 = vector.broadcast %62 : vector<1x256xf32> to vector<56x256xf32>
    %75 = arith.addf %73, %74 : vector<56x256xf32>
    %cst_40 = arith.constant 0.000000e+00 : f32
    %76 = vector.broadcast %cst_40 : f32 to vector<56x256xf32>
    %77 = arith.maximumf %75, %76 : vector<56x256xf32>
    %78 = vector.extract_strided_slice %77 {offsets = [0, 0], sizes = [56, 128], strides = [1, 1]} : vector<56x256xf32> to vector<56x128xf32>
    %79 = vector.extract_strided_slice %77 {offsets = [0, 128], sizes = [56, 128], strides = [1, 1]} : vector<56x256xf32> to vector<56x128xf32>
    %80 = arith.maximumf %78, %79 : vector<56x128xf32>
    %81 = arith.maximumf %71, %80 : vector<56x128xf32>
    %82 = vector.broadcast %60 : vector<1x256xf32> to vector<56x256xf32>
    %83 = arith.mulf %23, %82 : vector<56x256xf32>
    %84 = vector.broadcast %62 : vector<1x256xf32> to vector<56x256xf32>
    %85 = arith.addf %83, %84 : vector<56x256xf32>
    %cst_41 = arith.constant 0.000000e+00 : f32
    %86 = vector.broadcast %cst_41 : f32 to vector<56x256xf32>
    %87 = arith.maximumf %85, %86 : vector<56x256xf32>
    %88 = vector.extract_strided_slice %87 {offsets = [0, 0], sizes = [56, 128], strides = [1, 1]} : vector<56x256xf32> to vector<56x128xf32>
    %89 = vector.extract_strided_slice %87 {offsets = [0, 128], sizes = [56, 128], strides = [1, 1]} : vector<56x256xf32> to vector<56x128xf32>
    %90 = arith.maximumf %88, %89 : vector<56x128xf32>
    %91 = vector.broadcast %60 : vector<1x256xf32> to vector<56x256xf32>
    %92 = arith.mulf %31, %91 : vector<56x256xf32>
    %93 = vector.broadcast %62 : vector<1x256xf32> to vector<56x256xf32>
    %94 = arith.addf %92, %93 : vector<56x256xf32>
    %cst_42 = arith.constant 0.000000e+00 : f32
    %95 = vector.broadcast %cst_42 : f32 to vector<56x256xf32>
    %96 = arith.maximumf %94, %95 : vector<56x256xf32>
    %97 = vector.extract_strided_slice %96 {offsets = [0, 0], sizes = [56, 128], strides = [1, 1]} : vector<56x256xf32> to vector<56x128xf32>
    %98 = vector.extract_strided_slice %96 {offsets = [0, 128], sizes = [56, 128], strides = [1, 1]} : vector<56x256xf32> to vector<56x128xf32>
    %99 = arith.maximumf %97, %98 : vector<56x128xf32>
    %100 = arith.maximumf %90, %99 : vector<56x128xf32>
    %101 = tpu.iota {dimensions = array<i32: 0>} : vector<56x1xi32>
    %c8_i32 = arith.constant 8 : i32
    %c0_i32 = arith.constant 0 : i32
    %102 = arith.cmpi eq, %c8_i32, %c0_i32 : i32
    %c1_i32 = arith.constant 1 : i32
    %103 = arith.select %102, %c1_i32, %c8_i32 : i32
    %104 = vector.broadcast %103 : i32 to vector<56x1xi32>
    %105 = arith.remsi %101, %104 : vector<56x1xi32>
    %c0_i32_43 = arith.constant 0 : i32
    %106 = vector.broadcast %c0_i32_43 : i32 to vector<56x1xi32>
    %107 = arith.cmpi ne, %105, %106 : vector<56x1xi32>
    %c0_i32_44 = arith.constant 0 : i32
    %108 = vector.broadcast %c0_i32_44 : i32 to vector<56x1xi32>
    %109 = arith.cmpi slt, %105, %108 : vector<56x1xi32>
    %c0_i32_45 = arith.constant 0 : i32
    %110 = arith.cmpi slt, %103, %c0_i32_45 : i32
    %111 = vector.broadcast %110 : i1 to vector<56x1xi1>
    %112 = vector.broadcast %111 : vector<56x1xi1> to vector<56x1xi1>
    %113 = arith.xori %109, %112 : vector<56x1xi1>
    %114 = arith.andi %113, %107 : vector<56x1xi1>
    %115 = vector.broadcast %103 : i32 to vector<56x1xi32>
    %116 = arith.addi %105, %115 : vector<56x1xi32>
    %117 = arith.select %114, %116, %105 : vector<56x1xi1>, vector<56x1xi32>
    %118 = vector.broadcast %0 : i32 to vector<56x1xi32>
    %119 = arith.cmpi slt, %117, %118 : vector<56x1xi32>
    %120 = arith.extui %119 : vector<56x1xi1> to vector<56x1xi32>
    %121 = arith.sitofp %120 : vector<56x1xi32> to vector<56x1xf32>
    %122 = vector.broadcast %121 : vector<56x1xf32> to vector<56x128xf32>
    %123 = arith.mulf %81, %122 : vector<56x128xf32>
    %124 = vector.broadcast %121 : vector<56x1xf32> to vector<56x128xf32>
    %125 = arith.mulf %100, %124 : vector<56x128xf32>
    %c0_46 = arith.constant 0 : index
    %c0_47 = arith.constant 0 : index
    %126 = vector.load %arg7[%c0_46, %c0_47] : memref<640x256xbf16, #tpu.memory_space<vmem>>, vector<640x256xbf16>
    %cst_48 = arith.constant 1.000000e+00 : f32
    %127 = vector.broadcast %cst_48 : f32 to vector<1x40xf32>
    %cst_49 = arith.constant 0.000000e+00 : f32
    %128 = vector.broadcast %cst_49 : f32 to vector<1x256xf32>
    %cst_50 = arith.constant 0.000000e+00 : f32
    %129 = vector.broadcast %cst_50 : f32 to vector<1x256xf32>
    %130 = vector.extract_strided_slice %123 {offsets = [0, 0], sizes = [40, 128], strides = [1, 1]} : vector<56x128xf32> to vector<40x128xf32>
    %131 = vector.extract_strided_slice %125 {offsets = [0, 0], sizes = [40, 128], strides = [1, 1]} : vector<56x128xf32> to vector<40x128xf32>
    %132 = vector.extract_strided_slice %123 {offsets = [8, 0], sizes = [40, 128], strides = [1, 1]} : vector<56x128xf32> to vector<40x128xf32>
    %133 = vector.extract_strided_slice %125 {offsets = [8, 0], sizes = [40, 128], strides = [1, 1]} : vector<56x128xf32> to vector<40x128xf32>
    %134 = vector.extract_strided_slice %123 {offsets = [16, 0], sizes = [40, 128], strides = [1, 1]} : vector<56x128xf32> to vector<40x128xf32>
    %135 = tpu.concatenate %130, %131, %132, %133, %134 in 1 : vector<40x128xf32>, vector<40x128xf32>, vector<40x128xf32>, vector<40x128xf32>, vector<40x128xf32> -> vector<40x640xf32>
    %136 = arith.truncf %135 : vector<40x640xf32> to vector<40x640xbf16>
    %cst_51 = arith.constant dense<0.000000e+00> : vector<40x256xf32>
    %137 = tpu.matmul %136, %126, %cst_51 {dimension_numbers = #tpu.dot_dimension_numbers<[1], [0], [0], [1], [0, 0, 1, 1], [], []>} : vector<40x640xbf16>, vector<640x256xbf16>, vector<40x256xf32> -> vector<40x256xf32>
    %cst_52 = arith.constant dense<0.000000e+00> : vector<1x256xf32>
    %138 = tpu.matmul %127, %137, %cst_52 {dimension_numbers = #tpu.dot_dimension_numbers<[1], [0], [0], [1], [0, 0, 1, 1], [], []>} : vector<1x40xf32>, vector<40x256xf32>, vector<1x256xf32> -> vector<1x256xf32>
    %139 = arith.addf %128, %138 : vector<1x256xf32>
    %140 = arith.mulf %137, %137 : vector<40x256xf32>
    %cst_53 = arith.constant dense<0.000000e+00> : vector<1x256xf32>
    %141 = tpu.matmul %127, %140, %cst_53 {dimension_numbers = #tpu.dot_dimension_numbers<[1], [0], [0], [1], [0, 0, 1, 1], [], []>} : vector<1x40xf32>, vector<40x256xf32>, vector<1x256xf32> -> vector<1x256xf32>
    %142 = arith.addf %129, %141 : vector<1x256xf32>
    %143 = vector.extract_strided_slice %125 {offsets = [0, 0], sizes = [40, 128], strides = [1, 1]} : vector<56x128xf32> to vector<40x128xf32>
    %144 = vector.extract_strided_slice %123 {offsets = [8, 0], sizes = [40, 128], strides = [1, 1]} : vector<56x128xf32> to vector<40x128xf32>
    %145 = vector.extract_strided_slice %125 {offsets = [8, 0], sizes = [40, 128], strides = [1, 1]} : vector<56x128xf32> to vector<40x128xf32>
    %146 = vector.extract_strided_slice %123 {offsets = [16, 0], sizes = [40, 128], strides = [1, 1]} : vector<56x128xf32> to vector<40x128xf32>
    %147 = vector.extract_strided_slice %125 {offsets = [16, 0], sizes = [40, 128], strides = [1, 1]} : vector<56x128xf32> to vector<40x128xf32>
    %148 = tpu.concatenate %143, %144, %145, %146, %147 in 1 : vector<40x128xf32>, vector<40x128xf32>, vector<40x128xf32>, vector<40x128xf32>, vector<40x128xf32> -> vector<40x640xf32>
    %149 = arith.truncf %148 : vector<40x640xf32> to vector<40x640xbf16>
    %cst_54 = arith.constant dense<0.000000e+00> : vector<40x256xf32>
    %150 = tpu.matmul %149, %126, %cst_54 {dimension_numbers = #tpu.dot_dimension_numbers<[1], [0], [0], [1], [0, 0, 1, 1], [], []>} : vector<40x640xbf16>, vector<640x256xbf16>, vector<40x256xf32> -> vector<40x256xf32>
    %cst_55 = arith.constant dense<0.000000e+00> : vector<1x256xf32>
    %151 = tpu.matmul %127, %150, %cst_55 {dimension_numbers = #tpu.dot_dimension_numbers<[1], [0], [0], [1], [0, 0, 1, 1], [], []>} : vector<1x40xf32>, vector<40x256xf32>, vector<1x256xf32> -> vector<1x256xf32>
    %152 = arith.addf %139, %151 : vector<1x256xf32>
    %153 = arith.mulf %150, %150 : vector<40x256xf32>
    %cst_56 = arith.constant dense<0.000000e+00> : vector<1x256xf32>
    %154 = tpu.matmul %127, %153, %cst_56 {dimension_numbers = #tpu.dot_dimension_numbers<[1], [0], [0], [1], [0, 0, 1, 1], [], []>} : vector<1x40xf32>, vector<40x256xf32>, vector<1x256xf32> -> vector<1x256xf32>
    %155 = arith.addf %142, %154 : vector<1x256xf32>
    %c100_i32 = arith.constant 100 : i32
    %156 = arith.muli %0, %c100_i32 : i32
    %157 = arith.sitofp %156 : i32 to f32
    %c0_57 = arith.constant 0 : index
    %c0_58 = arith.constant 0 : index
    %158 = vector.load %arg8[%c0_57, %c0_58] : memref<256x16xf32, #tpu.memory_space<vmem>>, vector<256x16xf32>
    %cst_59 = arith.constant dense<0.000000e+00> : vector<1x16xf32>
    %159 = tpu.matmul %152, %158, %cst_59 {dimension_numbers = #tpu.dot_dimension_numbers<[1], [0], [0], [1], [0, 0, 1, 1], [], []>} : vector<1x256xf32>, vector<256x16xf32>, vector<1x16xf32> -> vector<1x16xf32>
    %c0_60 = arith.constant 0 : index
    %c0_61 = arith.constant 0 : index
    %160 = vector.load %arg8[%c0_60, %c0_61] : memref<256x16xf32, #tpu.memory_space<vmem>>, vector<256x16xf32>
    %cst_62 = arith.constant dense<0.000000e+00> : vector<1x16xf32>
    %161 = tpu.matmul %155, %160, %cst_62 {dimension_numbers = #tpu.dot_dimension_numbers<[1], [0], [0], [1], [0, 0, 1, 1], [], []>} : vector<1x256xf32>, vector<256x16xf32>, vector<1x16xf32> -> vector<1x16xf32>
    %162 = vector.broadcast %157 : f32 to vector<1x16xf32>
    %163 = arith.divf %159, %162 : vector<1x16xf32>
    %164 = vector.broadcast %157 : f32 to vector<1x16xf32>
    %165 = arith.divf %161, %164 : vector<1x16xf32>
    %166 = arith.mulf %163, %163 : vector<1x16xf32>
    %167 = arith.subf %165, %166 : vector<1x16xf32>
    %cst_63 = arith.constant 0.000000e+00 : f32
    %168 = vector.broadcast %cst_63 : f32 to vector<1x16xf32>
    %169 = arith.maximumf %167, %168 : vector<1x16xf32>
    %cst_64 = arith.constant 9.99999974E-6 : f32
    %170 = vector.broadcast %cst_64 : f32 to vector<1x16xf32>
    %171 = arith.addf %169, %170 : vector<1x16xf32>
    %172 = math.rsqrt %171 : vector<1x16xf32>
    %c0_65 = arith.constant 0 : index
    %c0_66 = arith.constant 0 : index
    %173 = vector.load %arg10[%c0_65, %c0_66] : memref<1x16xf32, #tpu.memory_space<vmem>>, vector<1x16xf32>
    %174 = arith.mulf %172, %173 : vector<1x16xf32>
    %c0_67 = arith.constant 0 : index
    %c0_68 = arith.constant 0 : index
    %175 = vector.load %arg11[%c0_67, %c0_68] : memref<1x16xf32, #tpu.memory_space<vmem>>, vector<1x16xf32>
    %176 = arith.mulf %163, %174 : vector<1x16xf32>
    %177 = arith.subf %175, %176 : vector<1x16xf32>
    %c0_69 = arith.constant 0 : index
    %c0_70 = arith.constant 0 : index
    %178 = vector.load %arg9[%c0_69, %c0_70] : memref<16x256xf32, #tpu.memory_space<vmem>>, vector<16x256xf32>
    %cst_71 = arith.constant dense<0.000000e+00> : vector<1x256xf32>
    %179 = tpu.matmul %174, %178, %cst_71 {dimension_numbers = #tpu.dot_dimension_numbers<[1], [0], [0], [1], [0, 0, 1, 1], [], []>} : vector<1x16xf32>, vector<16x256xf32>, vector<1x256xf32> -> vector<1x256xf32>
    %c0_72 = arith.constant 0 : index
    %c0_73 = arith.constant 0 : index
    %180 = vector.load %arg9[%c0_72, %c0_73] : memref<16x256xf32, #tpu.memory_space<vmem>>, vector<16x256xf32>
    %cst_74 = arith.constant dense<0.000000e+00> : vector<1x256xf32>
    %181 = tpu.matmul %177, %180, %cst_74 {dimension_numbers = #tpu.dot_dimension_numbers<[1], [0], [0], [1], [0, 0, 1, 1], [], []>} : vector<1x16xf32>, vector<16x256xf32>, vector<1x256xf32> -> vector<1x256xf32>
    %182 = vector.broadcast %179 : vector<1x256xf32> to vector<40x256xf32>
    %183 = arith.mulf %137, %182 : vector<40x256xf32>
    %184 = vector.broadcast %181 : vector<1x256xf32> to vector<40x256xf32>
    %185 = arith.addf %183, %184 : vector<40x256xf32>
    %cst_75 = arith.constant 0.000000e+00 : f32
    %186 = vector.broadcast %cst_75 : f32 to vector<40x256xf32>
    %187 = arith.maximumf %185, %186 : vector<40x256xf32>
    %188 = vector.extract_strided_slice %187 {offsets = [0, 0], sizes = [40, 128], strides = [1, 1]} : vector<40x256xf32> to vector<40x128xf32>
    %189 = vector.extract_strided_slice %187 {offsets = [0, 128], sizes = [40, 128], strides = [1, 1]} : vector<40x256xf32> to vector<40x128xf32>
    %190 = arith.maximumf %188, %189 : vector<40x128xf32>
    %191 = vector.broadcast %179 : vector<1x256xf32> to vector<40x256xf32>
    %192 = arith.mulf %150, %191 : vector<40x256xf32>
    %193 = vector.broadcast %181 : vector<1x256xf32> to vector<40x256xf32>
    %194 = arith.addf %192, %193 : vector<40x256xf32>
    %cst_76 = arith.constant 0.000000e+00 : f32
    %195 = vector.broadcast %cst_76 : f32 to vector<40x256xf32>
    %196 = arith.maximumf %194, %195 : vector<40x256xf32>
    %197 = vector.extract_strided_slice %196 {offsets = [0, 0], sizes = [40, 128], strides = [1, 1]} : vector<40x256xf32> to vector<40x128xf32>
    %198 = vector.extract_strided_slice %196 {offsets = [0, 128], sizes = [40, 128], strides = [1, 1]} : vector<40x256xf32> to vector<40x128xf32>
    %199 = arith.maximumf %197, %198 : vector<40x128xf32>
    %200 = arith.maximumf %190, %199 : vector<40x128xf32>
    %201 = vector.extract_strided_slice %200 {offsets = [0, 0], sizes = [8, 128], strides = [1, 1]} : vector<40x128xf32> to vector<8x128xf32>
    %202 = vector.extract_strided_slice %200 {offsets = [8, 0], sizes = [8, 128], strides = [1, 1]} : vector<40x128xf32> to vector<8x128xf32>
    %203 = vector.extract_strided_slice %200 {offsets = [16, 0], sizes = [8, 128], strides = [1, 1]} : vector<40x128xf32> to vector<8x128xf32>
    %204 = vector.extract_strided_slice %200 {offsets = [24, 0], sizes = [8, 128], strides = [1, 1]} : vector<40x128xf32> to vector<8x128xf32>
    %205 = vector.extract_strided_slice %200 {offsets = [32, 0], sizes = [8, 128], strides = [1, 1]} : vector<40x128xf32> to vector<8x128xf32>
    %206 = tpu.concatenate %201, %202, %203, %204, %205 in 1 : vector<8x128xf32>, vector<8x128xf32>, vector<8x128xf32>, vector<8x128xf32>, vector<8x128xf32> -> vector<8x640xf32>
    %207 = arith.truncf %206 : vector<8x640xf32> to vector<8x640xbf16>
    %c0_77 = arith.constant 0 : index
    %c0_78 = arith.constant 0 : index
    %208 = vector.load %arg12[%c0_77, %c0_78] : memref<640x128xbf16, #tpu.memory_space<vmem>>, vector<640x128xbf16>
    %cst_79 = arith.constant dense<0.000000e+00> : vector<8x128xf32>
    %209 = tpu.matmul %207, %208, %cst_79 {dimension_numbers = #tpu.dot_dimension_numbers<[1], [0], [0], [1], [0, 0, 1, 1], [], []>} : vector<8x640xbf16>, vector<640x128xbf16>, vector<8x128xf32> -> vector<8x128xf32>
    %c0_80 = arith.constant 0 : index
    %c0_81 = arith.constant 0 : index
    %210 = vector.load %arg13[%c0_80, %c0_81] : memref<1x128xf32, #tpu.memory_space<vmem>>, vector<1x128xf32>
    %211 = vector.broadcast %210 : vector<1x128xf32> to vector<8x128xf32>
    %212 = arith.addf %209, %211 : vector<8x128xf32>
    %cst_82 = arith.constant 0.000000e+00 : f32
    %213 = vector.broadcast %cst_82 : f32 to vector<8x128xf32>
    %214 = arith.maximumf %212, %213 : vector<8x128xf32>
    %215 = arith.truncf %214 : vector<8x128xf32> to vector<8x128xbf16>
    %c0_83 = arith.constant 0 : index
    %c0_84 = arith.constant 0 : index
    %216 = vector.load %arg14[%c0_83, %c0_84] : memref<128x128xbf16, #tpu.memory_space<vmem>>, vector<128x128xbf16>
    %cst_85 = arith.constant dense<0.000000e+00> : vector<8x128xf32>
    %217 = tpu.matmul %215, %216, %cst_85 {dimension_numbers = #tpu.dot_dimension_numbers<[1], [0], [0], [1], [0, 0, 1, 1], [], []>} : vector<8x128xbf16>, vector<128x128xbf16>, vector<8x128xf32> -> vector<8x128xf32>
    %c0_86 = arith.constant 0 : index
    %c0_87 = arith.constant 0 : index
    %218 = vector.load %arg15[%c0_86, %c0_87] : memref<1x128xf32, #tpu.memory_space<vmem>>, vector<1x128xf32>
    %219 = vector.broadcast %218 : vector<1x128xf32> to vector<8x128xf32>
    %220 = arith.addf %217, %219 : vector<8x128xf32>
    %cst_88 = arith.constant 0.000000e+00 : f32
    %221 = vector.broadcast %cst_88 : f32 to vector<8x128xf32>
    %222 = arith.maximumf %220, %221 : vector<8x128xf32>
    %223 = arith.truncf %222 : vector<8x128xf32> to vector<8x128xbf16>
    %c0_89 = arith.constant 0 : index
    %c0_90 = arith.constant 0 : index
    %224 = vector.load %arg16[%c0_89, %c0_90] : memref<128x128xbf16, #tpu.memory_space<vmem>>, vector<128x128xbf16>
    %cst_91 = arith.constant dense<0.000000e+00> : vector<8x128xf32>
    %225 = tpu.matmul %223, %224, %cst_91 {dimension_numbers = #tpu.dot_dimension_numbers<[1], [0], [0], [1], [0, 0, 1, 1], [], []>} : vector<8x128xbf16>, vector<128x128xbf16>, vector<8x128xf32> -> vector<8x128xf32>
    %c0_92 = arith.constant 0 : index
    %c0_93 = arith.constant 0 : index
    %226 = vector.load %arg17[%c0_92, %c0_93] : memref<1x128xf32, #tpu.memory_space<vmem>>, vector<1x128xf32>
    %227 = vector.broadcast %226 : vector<1x128xf32> to vector<8x128xf32>
    %228 = arith.addf %225, %227 : vector<8x128xf32>
    %c0_94 = arith.constant 0 : index
    %c0_95 = arith.constant 0 : index
    %229 = vector.load %arg18[%c0_94, %c0_95] : memref<8x128xf32, #tpu.memory_space<vmem>>, vector<8x128xf32>
    tpu.vector_store %arg18[%c0_94, %c0_95], %228 {strides = array<i32>} : memref<8x128xf32, #tpu.memory_space<vmem>>, vector<8x128xf32>,
    return
  }
}

</mosaic_0001>

<bundles_post_ra>
// kernel: lenet5_forward.1
= control target key start
LH: loop header
LB: loop body
LE: loop exit
PB: predicated region body
PF: predicated region fallthrough
CT: control target
= control target key end

     0   :  { %vm204_vm0 = vcmask 261120   ;;  %vm407_vm1 = vcmask 457728   ;;  %vm1433_vm2 = vcmask 1045504   ;;  %vm1429_vm3 = vcmask 48128   ;;  %s7299_s2 = inlined_call_operand.vmem [shape: bf16[160,256], index: 2, kind: input, shape index: {}]   ;;  %s7300_s1 = inlined_call_operand.vmem [shape: f32[224,160], index: 1, kind: input, shape index: {}]   ;;  %s7301_s3 = inlined_call_operand.vmem [shape: f32[256,6], index: 3, kind: input, shape index: {}]   ;;  %s7302_s4 = inlined_call_operand.vmem [shape: f32[6,256], index: 4, kind: input, shape index: {}]   ;;  %s7303_s7 = inlined_call_operand.vmem [shape: bf16[640,256], index: 7, kind: input, shape index: {}]   ;;  %s7304_s0 = inlined_call_operand.<no memory space> [shape: s32[1], index: 0, kind: input, shape index: {}]   ;;  %s7305_s5 = inlined_call_operand.vmem [shape: f32[1,6], index: 5, kind: input, shape index: {}]   ;;  %s7306_s6 = inlined_call_operand.vmem [shape: f32[1,6], index: 6, kind: input, shape index: {}]   ;;  %s7307_s8 = inlined_call_operand.vmem [shape: f32[256,16], index: 8, kind: input, shape index: {}]   ;;  %s7308_s9 = inlined_call_operand.vmem [shape: f32[16,256], index: 9, kind: input, shape index: {}]   ;;  %s7309_s12 = inlined_call_operand.vmem [shape: bf16[640,128], index: 12, kind: input, shape index: {}]   ;;  %s7310_s10 = inlined_call_operand.vmem [shape: f32[1,16], index: 10, kind: input, shape index: {}]   ;;  %s7311_s11 = inlined_call_operand.vmem [shape: f32[1,16], index: 11, kind: input, shape index: {}]   ;;  %s7312_s14 = inlined_call_operand.vmem [shape: bf16[128,128], index: 14, kind: input, shape index: {}]   ;;  %s7313_s16 = inlined_call_operand.vmem [shape: bf16[128,128], index: 16, kind: input, shape index: {}]   ;;  %s7314_s13 = inlined_call_operand.vmem [shape: f32[1,128], index: 13, kind: input, shape index: {}]   ;;  %s7315_s15 = inlined_call_operand.vmem [shape: f32[1,128], index: 15, kind: input, shape index: {}]   ;;  %s7316_s17 = inlined_call_operand.vmem [shape: f32[1,128], index: 17, kind: input, shape index: {}]   ;;  %s7317_s18 = inlined_call_operand.vmem [shape: f32[8,128], index: 18, kind: output, shape index: {}]  }
   0x1   :  { %7348 = sst [smem:[#allocation25_spill]] %s7299_s2  ;;  %s1239_s28 = smul.u32 784, %s7304_s0  ;;  %vm2811_vm11 = vcmask 326656   ;;  %vm3300_vm12 = vcmask 130048   ;;  %vm5245_vm13 = vmmov 0  }
   0x2   :  { %7349 = sst [smem:[#allocation26_spill]] %s7300_s1  ;;  %s7351_s29 = sld [smem:[#allocation25_spill]] }
   0x3   :  { %7350 = sst [smem:[#allocation27_spill]] %s7301_s3  ;;  %s7352_s20 = sld [smem:[#allocation26_spill]] }
   0x4   :  { %s7378_s30 = sld [smem:[#allocation27_spill]]  ;;  %s3108_s19 = smul.u32 100, %s7304_s0 }
   0x8   :  { %v5344_v0 = vld [vmem:[%s7351_s29 + $0x4] ss:$8 sps:$4 sm:$0xff]   ;;  %v5349_v1 = vld [vmem:[%s7351_s29] ss:$8 sps:$4 sm:$0xff]   ;;  %v5356_v2 = vld [vmem:[%s7351_s29 + $0x14] ss:$8 sps:$4 sm:$0xff]  }
   0x9   :  { %217 = vmatprep.subr.bf16.mxu0 %v5344_v0  ;;  %336 = vmatprep.subr.bf16.mxu1 %v5344_v0  ;;  %v5363_v3 = vld [vmem:[%s7351_s29 + $0x10] ss:$8 sps:$4 sm:$0xff]   ;;  %v5370_v4 = vld [vmem:[%s7351_s29 + $0x24] ss:$8 sps:$4 sm:$0xff]   ;;  %v5377_v5 = vld [vmem:[%s7351_s29 + $0x20] ss:$8 sps:$4 sm:$0xff]  }
   0xa   :  { %218 = vmatpush1.bf16.msra.mxu0 %v5349_v1  ;;  %337 = vmatpush1.bf16.msra.mxu1 %v5349_v1  ;;  %v5384_v6 = vld [vmem:[%s7351_s29 + $0x34] ss:$8 sps:$4 sm:$0xff]   ;;  %v5391_v7 = vld [vmem:[%s7351_s29 + $0x30] ss:$8 sps:$4 sm:$0xff]   ;;  %v5398_v8 = vld [vmem:[%s7351_s29 + $0x44] ss:$8 sps:$4 sm:$0xff]  }
   0xb   :  { %219 = vmatprep.subr.bf16.mxu0 %v5356_v2  ;;  %338 = vmatprep.subr.bf16.mxu1 %v5356_v2  ;;  %v83_v9 = vld [vmem:[%s7352_s20 + $0x8] sm:$0xff]  ;;  %v85_v10 = vld [vmem:[%s7352_s20 + $0x18] sm:$0xff]  ;;  %v82_v26 = vld [vmem:[%s7352_s20] sm:$0xff] }
   0xc   :  { %v97_v11 = vpack.c.bf16 %v85_v10, %v83_v9  ;;  %v303_v12 = vld [vmem:[%s7352_s20 + $0x78] sm:$0xff]  ;;  %v305_v13 = vld [vmem:[%s7352_s20 + $0x88] sm:$0xff]  ;;  %v84_v27 = vld [vmem:[%s7352_s20 + $0x10] sm:$0xff]  ;;  %v7321_v9 = vmov 0.0  }
   0xd   :  { %v5417_v14 = vld [vmem:[%s7351_s29 + $0x40] ss:$8 sps:$4 sm:$0xff]   ;;  %v317_v15 = vpack.c.bf16 %v305_v13, %v303_v12  ;;  %v5424_v16 = vld [vmem:[%s7351_s29 + $0x54] ss:$8 sps:$4 sm:$0xff]   ;;  %v5433_v17 = vld [vmem:[%s7351_s29 + $0x50] ss:$8 sps:$4 sm:$0xff]   ;;  %v96_v34 = vpack.c.bf16 %v84_v27, %v82_v26 }
   0xe   :  { %220 = vmatpush1.bf16.msra.mxu0 %v5363_v3  ;;  %339 = vmatpush1.bf16.msra.mxu1 %v5363_v3  ;;  %v5440_v18 = vld [vmem:[%s7351_s29 + $0x64] ss:$8 sps:$4 sm:$0xff]   ;;  %v5447_v19 = vld [vmem:[%s7351_s29 + $0x60] ss:$8 sps:$4 sm:$0xff]   ;;  %v5454_v20 = vld [vmem:[%s7351_s29 + $0x74] ss:$8 sps:$4 sm:$0xff]  }
   0xf   :  { %221 = vmatprep.subr.bf16.mxu0 %v5370_v4  ;;  %340 = vmatprep.subr.bf16.mxu1 %v5370_v4  ;;  %v5461_v21 = vld [vmem:[%s7351_s29 + $0x70] ss:$8 sps:$4 sm:$0xff]   ;;  %v5468_v22 = vld [vmem:[%s7351_s29 + $0x84] ss:$8 sps:$4 sm:$0xff]   ;;  %v5475_v23 = vld [vmem:[%s7351_s29 + $0x80] ss:$8 sps:$4 sm:$0xff]  }
  0x10   :  { %4243 = vmatprep.mubr.msk.bf16.mxu0 %vm204_vm0, %v97_v11  ;;  %4247 = vmatprep.mubr.msk.bf16.mxu1 %vm204_vm0, %v317_v15  ;;  %v5482_v24 = vld [vmem:[%s7351_s29 + $0x94] ss:$8 sps:$4 sm:$0xff]   ;;  %v5487_v25 = vld [vmem:[%s7351_s29 + $0x90] ss:$8 sps:$4 sm:$0xff]   ;;  %v304_v29 = vld [vmem:[%s7352_s20 + $0x80] sm:$0xff]  ;;  %s1240_s29 = scvt.s32.f32 %s1239_s28 }
  0x11   :  { %v302_v28 = vld [vmem:[%s7352_s20 + $0x70] sm:$0xff]  ;;  %v87_v30 = vld [vmem:[%s7352_s20 + $0x28] sm:$0xff]  ;;  %v89_v31 = vld [vmem:[%s7352_s20 + $0x38] sm:$0xff] }
  0x12   :  { %222 = vmatpush1.bf16.msra.mxu0 %v5377_v5  ;;  %341 = vmatpush1.bf16.msra.mxu1 %v5377_v5  ;;  %v307_v32 = vld [vmem:[%s7352_s20 + $0x98] sm:$0xff]  ;;  %v309_v33 = vld [vmem:[%s7352_s20 + $0xa8] sm:$0xff]  ;;  %v316_v35 = vpack.c.bf16 %v304_v29, %v302_v28  ;;  %v99_v36 = vpack.c.bf16 %v89_v31, %v87_v30  ;;  %v86_v38 = vld [vmem:[%s7352_s20 + $0x20] sm:$0xff] }
  0x13   :  { %223 = vmatprep.subr.bf16.mxu0 %v5384_v6  ;;  %342 = vmatprep.subr.bf16.mxu1 %v5384_v6  ;;  %v319_v37 = vpack.c.bf16 %v309_v33, %v307_v32  ;;  %v88_v39 = vld [vmem:[%s7352_s20 + $0x30] sm:$0xff]  ;;  %v308_v41 = vld [vmem:[%s7352_s20 + $0xa0] sm:$0xff]  ;;  %v91_v42 = vld [vmem:[%s7352_s20 + $0x48] sm:$0xff] }
  0x14   :  { %v306_v40 = vld [vmem:[%s7352_s20 + $0x90] sm:$0xff]  ;;  %v93_v43 = vld [vmem:[%s7352_s20 + $0x58] sm:$0xff]  ;;  %v313_v45 = vld [vmem:[%s7352_s20 + $0xc8] sm:$0xff]  ;;  %v98_v46 = vpack.c.bf16 %v88_v39, %v86_v38 }
  0x15   :  { %v311_v44 = vld [vmem:[%s7352_s20 + $0xb8] sm:$0xff]  ;;  %v318_v47 = vpack.c.bf16 %v308_v41, %v306_v40  ;;  %v101_v48 = vpack.c.bf16 %v93_v43, %v91_v42  ;;  %v90_v50 = vld [vmem:[%s7352_s20 + $0x40] sm:$0xff]  ;;  %v92_v51 = vld [vmem:[%s7352_s20 + $0x50] sm:$0xff] }
  0x16   :  { %224 = vmatpush1.bf16.msra.mxu0 %v5391_v7  ;;  %343 = vmatpush1.bf16.msra.mxu1 %v5391_v7  ;;  %v321_v49 = vpack.c.bf16 %v313_v45, %v311_v44  ;;  %v310_v52 = vld [vmem:[%s7352_s20 + $0xb0] sm:$0xff]  ;;  %v312_v53 = vld [vmem:[%s7352_s20 + $0xc0] sm:$0xff]  ;;  %v95_v54 = vld [vmem:[%s7352_s20 + $0x68] sm:$0xff]  ;;  %v100_v56 = vpack.c.bf16 %v92_v51, %v90_v50 }
  0x17   :  { %225 = vmatprep.subr.bf16.mxu0 %v5398_v8  ;;  %344 = vmatprep.subr.bf16.mxu1 %v5398_v8  ;;  %v315_v55 = vld [vmem:[%s7352_s20 + $0xd8] sm:$0xff]  ;;  %v320_v57 = vpack.c.bf16 %v312_v53, %v310_v52  ;;  %v103_v58 = vpack.c.bf16 %v95_v54, %v95_v54  ;;  %v94_v60 = vld [vmem:[%s7352_s20 + $0x60] sm:$0xff]  ;;  %v314_v61 = vld [vmem:[%s7352_s20 + $0xd0] sm:$0xff] }
  0x18   :  { %v323_v59 = vpack.c.bf16 %v315_v55, %v315_v55  ;;  %v102_v62 = vpack.c.bf16 %v94_v60, %v94_v60  ;;  %v322_v63 = vpack.c.bf16 %v314_v61, %v314_v61 }
  0x1a   :  { %226 = vmatpush1.bf16.msra.mxu0 %v5417_v14  ;;  %345 = vmatpush1.bf16.msra.mxu1 %v5417_v14 }
  0x1b   :  { %227 = vmatprep.subr.bf16.mxu0 %v5424_v16  ;;  %346 = vmatprep.subr.bf16.mxu1 %v5424_v16 }
  0x1e   :  { %228 = vmatpush1.bf16.msra.mxu0 %v5433_v17  ;;  %347 = vmatpush1.bf16.msra.mxu1 %v5433_v17 }
  0x1f   :  { %229 = vmatprep.subr.bf16.mxu0 %v5440_v18  ;;  %348 = vmatprep.subr.bf16.mxu1 %v5440_v18 }
  0x22   :  { %230 = vmatpush1.bf16.msra.mxu0 %v5447_v19  ;;  %349 = vmatpush1.bf16.msra.mxu1 %v5447_v19 }
  0x23   :  { %231 = vmatprep.subr.bf16.mxu0 %v5454_v20  ;;  %350 = vmatprep.subr.bf16.mxu1 %v5454_v20 }
  0x26   :  { %232 = vmatpush1.bf16.msra.mxu0 %v5461_v21  ;;  %351 = vmatpush1.bf16.msra.mxu1 %v5461_v21 }
  0x27   :  { %233 = vmatprep.subr.bf16.mxu0 %v5468_v22  ;;  %352 = vmatprep.subr.bf16.mxu1 %v5468_v22 }
  0x2a   :  { %234 = vmatpush1.bf16.msra.mxu0 %v5475_v23  ;;  %353 = vmatpush1.bf16.msra.mxu1 %v5475_v23 }
  0x2b   :  { %235 = vmatprep.subr.bf16.mxu0 %v5482_v24  ;;  %354 = vmatprep.subr.bf16.mxu1 %v5482_v24 }
  0x2e   :  { %236 = vmatpush1.bf16.msra.mxu0 %v5487_v25  ;;  %355 = vmatpush1.bf16.msra.mxu1 %v5487_v25 }
  0x31   :  { %250 = vmatmul.mubr.bf16.vlgmr.msra.gmra.mrb[0].mxu0 %v96_v34  ;;  %369 = vmatmul.mubr.bf16.vlgmr.msra.gmra.mrb[0].mxu1 %v316_v35 }
  0x32   :  { %4244 = vmatprep.mubr.msk.bf16.mxu0 %vm204_vm0, %v99_v36  ;;  %4248 = vmatprep.mubr.msk.bf16.mxu1 %vm204_vm0, %v319_v37 }
  0x39   :  { %260 = vmatmul.mubr.bf16.gmra.mrb[4].mxu0 %v98_v46  ;;  %379 = vmatmul.mubr.bf16.gmra.mrb[4].mxu1 %v318_v47 }
  0x3a   :  { %4245 = vmatprep.mubr.msk.bf16.mxu0 %vm204_vm0, %v101_v48  ;;  %4249 = vmatprep.mubr.msk.bf16.mxu1 %vm204_vm0, %v321_v49 }
  0x41   :  { %270 = vmatmul.mubr.bf16.gmra.mrb[8].mxu0 %v100_v56  ;;  %389 = vmatmul.mubr.bf16.gmra.mrb[8].mxu1 %v320_v57 }
  0x42   :  { %4246 = vmatprep.mubr.msk.bf16.mxu0 %vm204_vm0, %v103_v58  ;;  %4250 = vmatprep.mubr.msk.bf16.mxu1 %vm204_vm0, %v323_v59 }
  0x49   :  { %280 = vmatmul.mubr.bf16.gmra.mrb[12].mxu0 %v102_v62  ;;  %399 = vmatmul.mubr.bf16.gmra.mrb[12].mxu1 %v322_v63 }
  0x4a   :  { %475 = vmatprep.mubr.f32.mxu1 %v7321_v9  ;;  %546 = vmatprep.mubr.f32.mxu0 %v7321_v9 }
 0x104   :  { %v5575_v10 = vpop.f32.mrb[0].mxu0  ;;  %v5577_v11 = vpop.f32.mrb[0].mxu1 }
 0x105   :  { %v5579_v12 = vpop.f32.mrb[1].mxu0  ;;  %v5583_v13 = vmul.f32 %v5577_v11, %v5577_v11  ;;  %v5585_v15 = vpop.f32.mrb[1].mxu1  ;;  %v5589_v26 = vmul.f32 %v5575_v10, %v5575_v10 }
 0x106   :  { %v5593_v27 = vmul.f32 %v5579_v12, %v5579_v12  ;;  %v5595_v28 = vpop.f32.mrb[2].mxu0  ;;  %v5599_v29 = vmul.f32 %v5585_v15, %v5585_v15  ;;  %v5601_v30 = vpop.f32.mrb[2].mxu1 }
 0x107   :  { %v5605_v31 = vmul.f32 %v5595_v28, %v5595_v28  ;;  %v4710_v32 = vpack.c.bf16 %v5595_v28, %v5575_v10  ;;  %v5609_v33 = vpop.f32.mrb[3].mxu0  ;;  %v4698_v34 = vpack.c.bf16 %v5601_v30, %v5577_v11  ;;  %v5615_v35 = vmul.f32 %v5601_v30, %v5601_v30  ;;  %v5617_v36 = vpop.f32.mrb[3].mxu1 }
 0x108   :  { %7353 = vst [vmem:[#allocation3_spill] sm:$0xff] %v5617_v36  ;;  %v5621_v37 = vmul.f32 %v5609_v33, %v5609_v33  ;;  %v4708_v38 = vpack.c.bf16 %v5609_v33, %v5579_v12  ;;  %v4696_v39 = vpack.c.bf16 %v5617_v36, %v5585_v15  ;;  %v5629_v40 = vmul.f32 %v5617_v36, %v5617_v36 }
 0x10a   :  { %4709 = vmatprep.subr.bf16.mxu0 %v4708_v38  ;;  %4697 = vmatprep.subr.bf16.mxu1 %v4696_v39 }
 0x10b   :  { %4711 = vmatpush1.bf16.msra.mxu0 %v4710_v32  ;;  %4699 = vmatpush1.bf16.msra.mxu1 %v4698_v34 }
 0x10c   :  { %v5639_v45 = vpop.f32.mrb[4].mxu0  ;;  %v5641_v46 = vpop.f32.mrb[4].mxu1 }
 0x10d   :  { %7354 = vst [vmem:[#allocation4_spill] sm:$0xff] %v5641_v46  ;;  %v5643_v47 = vpop.f32.mrb[5].mxu0  ;;  %v5647_v48 = vmul.f32 %v5641_v46, %v5641_v46  ;;  %v5649_v49 = vpop.f32.mrb[5].mxu1  ;;  %v5653_v50 = vmul.f32 %v5639_v45, %v5639_v45 }
 0x10e   :  { %7355 = vst [vmem:[#allocation5_spill] sm:$0xff] %v5649_v49  ;;  %v5657_v51 = vmul.f32 %v5643_v47, %v5643_v47  ;;  %v5659_v52 = vpop.f32.mrb[6].mxu0  ;;  %v5663_v53 = vmul.f32 %v5649_v49, %v5649_v49  ;;  %v5665_v54 = vpop.f32.mrb[6].mxu1 }
 0x10f   :  { %7356 = vst [vmem:[#allocation6_spill] sm:$0xff] %v5659_v52  ;;  %7357 = vst [vmem:[#allocation7_spill] sm:$0xff] %v5665_v54  ;;  %v5669_v55 = vmul.f32 %v5659_v52, %v5659_v52  ;;  %v4714_v56 = vpack.c.bf16 %v5659_v52, %v5639_v45  ;;  %v5673_v57 = vpop.f32.mrb[7].mxu0  ;;  %v4702_v58 = vpack.c.bf16 %v5665_v54, %v5641_v46  ;;  %v5681_v60 = vpop.f32.mrb[7].mxu1 }
 0x110   :  { %7358 = vst [vmem:[#allocation8_spill] sm:$0xff] %v5673_v57  ;;  %v5679_v59 = vmul.f32 %v5665_v54, %v5665_v54  ;;  %7359 = vst [vmem:[#allocation9_spill] sm:$0xff] %v5681_v60  ;;  %v5685_v61 = vmul.f32 %v5673_v57, %v5673_v57  ;;  %v4712_v62 = vpack.c.bf16 %v5673_v57, %v5643_v47 }
 0x111   :  { %v4700_v63 = vpack.c.bf16 %v5681_v60, %v5649_v49  ;;  %v560_v32 = vmul.f32 %v5681_v60, %v5681_v60 }
 0x112   :  { %v4726_v38 = vpack.c.bf16 %v5679_v59, %v5647_v48  ;;  %4713 = vmatprep.subr.bf16.mxu0 %v4712_v62 }
 0x113   :  { %4701 = vmatprep.subr.bf16.mxu1 %v4700_v63  ;;  %v4724_v39 = vpack.c.bf16 %v560_v32, %v5663_v53  ;;  %4715 = vmatpush1.bf16.msra.mxu0 %v4714_v56 }
 0x114   :  { %4703 = vmatpush1.bf16.msra.mxu1 %v4702_v58  ;;  %v5700_v44 = vpop.f32.mrb[8].mxu0  ;;  %v5702_v9 = vpop.f32.mrb[8].mxu1 }
 0x115   :  { %7360 = vst [vmem:[#allocation10_spill] sm:$0xff] %v5700_v44  ;;  %7361 = vst [vmem:[#allocation11_spill] sm:$0xff] %v5702_v9  ;;  %v561_v42 = vmul.f32 %v5702_v9, %v5702_v9  ;;  %v5706_v34 = vpop.f32.mrb[9].mxu0  ;;  %v5708_v43 = vpop.f32.mrb[9].mxu1  ;;  %v5712_v48 = vmul.f32 %v5700_v44, %v5700_v44 }
 0x116   :  { %7362 = vst [vmem:[#allocation12_spill] sm:$0xff] %v5706_v34  ;;  %7363 = vst [vmem:[#allocation13_spill] sm:$0xff] %v5708_v43  ;;  %v5716_v53 = vmul.f32 %v5706_v34, %v5706_v34  ;;  %v562_v56 = vmul.f32 %v5708_v43, %v5708_v43  ;;  %v5720_v58 = vpop.f32.mrb[10].mxu0  ;;  %v5722_v59 = vpop.f32.mrb[10].mxu1 }
 0x117   :  { %7364 = vst [vmem:[#allocation14_spill] sm:$0xff] %v5720_v58  ;;  %7365 = vst [vmem:[#allocation15_spill] sm:$0xff] %v5722_v59  ;;  %v5726_v62 = vmul.f32 %v5720_v58, %v5720_v58  ;;  %v4718_v63 = vpack.c.bf16 %v5720_v58, %v5700_v44  ;;  %v4706_v32 = vpack.c.bf16 %v5722_v59, %v5702_v9  ;;  %v5734_v60 = vpop.f32.mrb[11].mxu0  ;;  %v5736_v54 = vpop.f32.mrb[11].mxu1 }
 0x118   :  { %v563_v41 = vmul.f32 %v5722_v59, %v5722_v59  ;;  %7366 = vst [vmem:[#allocation16_spill] sm:$0xff] %v5734_v60  ;;  %v299_v57 = vmul.f32 %v5734_v60, %v5734_v60  ;;  %v4716_v52 = vpack.c.bf16 %v5734_v60, %v5706_v34  ;;  %v4704_v49 = vpack.c.bf16 %v5736_v54, %v5708_v43 }
 0x119   :  { %v564_v58 = vmul.f32 %v5736_v54, %v5736_v54  ;;  %v4742_v9 = vpack.c.bf16 %v5726_v62, %v5712_v48  ;;  %v710_v48 = vld [vmem:[%s7352_s20 + $0xe8] sm:$0xff]  ;;  %v7370_v62 = vpack.c.bf16 %v5615_v35, %v5583_v13  ;;  %v7372_v35 = vpack.c.bf16 %v5621_v37, %v5593_v27  ;;  %v711_v37 = vld [vmem:[%s7352_s20 + $0xf0] sm:$0xff] }
 0x11a   :  { %v4730_v59 = vpack.c.bf16 %v563_v41, %v561_v42  ;;  %4705 = vmatprep.subr.bf16.mxu1 %v4704_v49  ;;  %4717 = vmatprep.subr.bf16.mxu0 %v4716_v52  ;;  %v4740_v46 = vpack.c.bf16 %v299_v57, %v5716_v53  ;;  %v712_v41 = vld [vmem:[%s7352_s20 + $0xf8] sm:$0xff]  ;;  %v7369_v53 = vpack.c.bf16 %v5629_v40, %v5599_v29  ;;  %v7371_v29 = vmov 0.0  }
 0x11b   :  { %v4728_v44 = vpack.c.bf16 %v564_v58, %v562_v56  ;;  %4707 = vmatpush1.bf16.msra.mxu1 %v4706_v32  ;;  %4719 = vmatpush1.bf16.msra.mxu0 %v4718_v63  ;;  %v724_v56 = vpack.c.bf16 %v712_v41, %v710_v48  ;;  %v7337_v58 = vmov 1.0   ;;  %v7375_v27 = vpack.c.bf16 %v5669_v55, %v5653_v50  ;;  %v716_v50 = vld [vmem:[%s7352_s20 + $0x118] sm:$0xff]  ;;  %v717_v41 = vld [vmem:[%s7352_s20 + $0x120] sm:$0xff] }
 0x11c   :  { %v5749_v36 = vpop.f32.mrb[12].mxu0  ;;  %v5751_v60 = vpop.f32.mrb[12].mxu1  ;;  %v720_v63 = vld [vmem:[%s7352_s20 + $0x138] sm:$0xff] }
 0x11d   :  { %7367 = vst [vmem:[#allocation17_spill] sm:$0xff] %v5751_v60  ;;  %v5753_v34 = vpop.f32.mrb[13].mxu0  ;;  %v5755_v43 = vpop.f32.mrb[13].mxu1  ;;  %v565_v13 = vmul.f32 %v5751_v60, %v5751_v60 }
 0x11e   :  { %7368 = vst [vmem:[#allocation18_spill] sm:$0xff] %v5755_v43  ;;  %v285_v42 = vpop.f32.mrb[14].mxu0  ;;  %423 = vmatprep.subr.mxu1 %v5755_v43  ;;  %494 = vmatprep.subr.mxu0 %v5753_v34  ;;  %v404_v49 = vpop.f32.mrb[14].mxu1  ;;  %v566_v40 = vmul.f32 %v5755_v43, %v5755_v43 }
 0x11f   :  { %v286_v52 = vpop.f32.mrb[15].mxu0  ;;  %424 = vmatpush1.msra.mxu1 %v5751_v60  ;;  %495 = vmatpush1.msra.mxu0 %v5749_v36  ;;  %v405_v57 = vpop.f32.mrb[15].mxu1  ;;  %v719_v42 = vld [vmem:[%s7352_s20 + $0x130] sm:$0xff]  ;;  %v722_v49 = vld [vmem:[%s7352_s20 + $0x148] sm:$0xff] }
 0x120   :  { %4721 = vmatprep.subr.bf16.mxu1 %v7369_v53  ;;  %743 = vmatprep.subr.bf16.mxu0 %v5344_v0  ;;  %v727_v52 = vpack.c.bf16 %v719_v42, %v717_v41  ;;  %v730_v57 = vpack.c.bf16 %v722_v49, %v722_v49  ;;  %v721_v53 = vld [vmem:[%s7352_s20 + $0x140] sm:$0xff] }
 0x121   :  { %4251 = vmatmul.mubr.msk.f32.vlgmr.msra.gmra.mrb[16].mxu1 %vm407_vm1, %v7337_v58  ;;  %4252 = vmatmul.mubr.msk.f32.vlgmr.msra.gmra.mrb[16].mxu0 %vm407_vm1, %v7337_v58 }
 0x122   :  { %4723 = vmatpush1.bf16.msra.mxu1 %v7370_v62  ;;  %744 = vmatpush1.bf16.msra.mxu0 %v5349_v1 }
 0x123   :  { %4725 = vmatprep.subr.bf16.mxu1 %v4724_v39  ;;  %745 = vmatprep.subr.bf16.mxu0 %v5356_v2  ;;  %v715_v39 = vld [vmem:[%s7352_s20 + $0x110] sm:$0xff] }
 0x124   :  { %631 = vmatprep.mubr.f32.mxu1 %v7371_v29  ;;  %4255 = vmatprep.mubr.msk.bf16.mxu0 %vm204_vm0, %v724_v56  ;;  %v729_v56 = vpack.c.bf16 %v721_v53, %v721_v53 }
 0x126   :  { %4727 = vmatpush1.bf16.msra.mxu1 %v4726_v38  ;;  %746 = vmatpush1.bf16.msra.mxu0 %v5363_v3  ;;  %v7374_v38 = vpack.c.bf16 %v5685_v61, %v5657_v51  ;;  %v713_v61 = vld [vmem:[%s7352_s20 + $0x100] sm:$0xff] }
 0x127   :  { %4729 = vmatprep.subr.bf16.mxu1 %v4728_v44  ;;  %747 = vmatprep.subr.bf16.mxu0 %v5370_v4  ;;  %v7373_v44 = vpack.c.bf16 %v5605_v31, %v5589_v26  ;;  %v301_v26 = vmul.f32 %v5753_v34, %v5753_v34  ;;  %v300_v31 = vmul.f32 %v5749_v36, %v5749_v36 }
 0x128   :  { %v725_v32 = vpack.c.bf16 %v715_v39, %v713_v61 }
 0x12a   :  { %4731 = vmatpush1.bf16.msra.mxu1 %v4730_v59  ;;  %748 = vmatpush1.bf16.msra.mxu0 %v5377_v5  ;;  %v718_v59 = vld [vmem:[%s7352_s20 + $0x128] sm:$0xff] }
 0x12b   :  { %579 = vmatprep.subr.mxu1 %v566_v40  ;;  %749 = vmatprep.subr.bf16.mxu0 %v5384_v6  ;;  %v728_v48 = vpack.c.bf16 %v720_v63, %v718_v59 }
 0x12e   :  { %580 = vmatpush1.msra.mxu1 %v565_v13  ;;  %750 = vmatpush1.bf16.msra.mxu0 %v5391_v7 }
 0x12f   :  { %4733 = vmatprep.subr.bf16.mxu1 %v7372_v35  ;;  %4253 = vmatmul.mubr.msk.f32.vlgmr.msra.gmra.mrb[18].mxu1 %vm407_vm1, %v7337_v58 }
 0x130   :  { %4735 = vmatpush1.bf16.msra.mxu1 %v7373_v44  ;;  %751 = vmatprep.subr.bf16.mxu0 %v5398_v8 }
 0x131   :  { %4737 = vmatprep.subr.bf16.mxu1 %v7374_v38  ;;  %702 = vmatprep.mubr.f32.mxu1 %v7371_v29 }
 0x132   :  { %752 = vmatpush1.bf16.msra.mxu0 %v5417_v14 }
 0x133   :  { %753 = vmatprep.subr.bf16.mxu0 %v5424_v16 }
 0x134   :  { %4739 = vmatpush1.bf16.msra.mxu1 %v7375_v27 }
 0x135   :  { %4741 = vmatprep.subr.bf16.mxu1 %v4740_v46  ;;  %v714_v46 = vld [vmem:[%s7352_s20 + $0x108] sm:$0xff] }
 0x136   :  { %754 = vmatpush1.bf16.msra.mxu0 %v5433_v17  ;;  %v726_v55 = vpack.c.bf16 %v716_v50, %v714_v46 }
 0x137   :  { %755 = vmatprep.subr.bf16.mxu0 %v5440_v18 }
 0x138   :  { %4743 = vmatpush1.bf16.msra.mxu1 %v4742_v9  ;;  %v709_v9 = vld [vmem:[%s7352_s20 + $0xe0] sm:$0xff] }
 0x139   :  { %650 = vmatprep.subr.mxu1 %v301_v26  ;;  %v723_v51 = vpack.c.bf16 %v711_v37, %v709_v9 }
 0x13a   :  { %756 = vmatpush1.bf16.msra.mxu0 %v5447_v19 }
 0x13b   :  { %757 = vmatprep.subr.bf16.mxu0 %v5454_v20 }
 0x13c   :  { %651 = vmatpush1.msra.mxu1 %v300_v31 }
 0x13d   :  { %4254 = vmatmul.mubr.msk.f32.vlgmr.msra.gmra.mrb[18].mxu1 %vm407_vm1, %v7337_v58 }
 0x13e   :  { %758 = vmatpush1.bf16.msra.mxu0 %v5461_v21  ;;  %965 = vmatprep.mubr.f32.mxu1 %v7371_v29 }
 0x13f   :  { %759 = vmatprep.subr.bf16.mxu0 %v5468_v22 }
 0x142   :  { %760 = vmatpush1.bf16.msra.mxu0 %v5475_v23 }
 0x143   :  { %761 = vmatprep.subr.bf16.mxu0 %v5482_v24 }
 0x146   :  { %762 = vmatpush1.bf16.msra.mxu0 %v5487_v25 }
 0x149   :  { %776 = vmatmul.mubr.bf16.vlgmr.msra.gmra.mrb[20].mxu0 %v723_v51 }
 0x14a   :  { %4256 = vmatprep.mubr.msk.bf16.mxu0 %vm204_vm0, %v726_v55 }
 0x151   :  { %786 = vmatmul.mubr.bf16.gmra.mrb[24].mxu0 %v725_v32 }
 0x152   :  { %4257 = vmatprep.mubr.msk.bf16.mxu0 %vm204_vm0, %v728_v48 }
 0x159   :  { %796 = vmatmul.mubr.bf16.gmra.mrb[28].mxu0 %v727_v52 }
 0x15a   :  { %4258 = vmatprep.mubr.msk.bf16.mxu0 %vm204_vm0, %v730_v57 }
 0x161   :  { %806 = vmatmul.mubr.bf16.gmra.mrb[32].mxu0 %v729_v56 }
 0x162   :  { %878 = vmatprep.mubr.f32.mxu0 %v7371_v29 }
 0x1f4   :  { %v5865_v62 = vpop.f32.mrb[16].mxu1 }
 0x1f5   :  { %v5867_v40 = vpop.f32.mrb[17].mxu1 }
 0x21c   :  { %v5869_v13 = vpop.f32.mrb[20].mxu0 }
 0x21d   :  { %v5871_v35 = vpop.f32.mrb[21].mxu0  ;;  %v887_v38 = vmul.f32 %v5869_v13, %v5869_v13 }
 0x21e   :  { %v5873_v44 = vpop.f32.mrb[22].mxu0  ;;  %v888_v9 = vmul.f32 %v5871_v35, %v5871_v35 }
 0x21f   :  { %v4746_v27 = vpack.c.bf16 %v5873_v44, %v5869_v13  ;;  %v889_v26 = vmul.f32 %v5873_v44, %v5873_v44  ;;  %v5881_v31 = vpop.f32.mrb[23].mxu0 }
 0x220   :  { %v4744_v37 = vpack.c.bf16 %v5881_v31, %v5871_v35  ;;  %v890_v46 = vmul.f32 %v5881_v31, %v5881_v31 }
 0x221   :  { %v4758_v50 = vpack.c.bf16 %v889_v26, %v887_v38 }
 0x222   :  { %4745 = vmatprep.subr.bf16.mxu0 %v4744_v37  ;;  %v4756_v51 = vpack.c.bf16 %v890_v46, %v888_v9 }
 0x223   :  { %4747 = vmatpush1.bf16.msra.mxu0 %v4746_v27 }
 0x224   :  { %v5889_v55 = vpop.f32.mrb[24].mxu0  ;;  %4757 = vmatprep.subr.bf16.mxu1 %v4756_v51 }
 0x225   :  { %v5891_v61 = vpop.f32.mrb[25].mxu0  ;;  %4759 = vmatpush1.bf16.msra.mxu1 %v4758_v50  ;;  %v891_v59 = vmul.f32 %v5889_v55, %v5889_v55 }
 0x226   :  { %v5893_v39 = vpop.f32.mrb[26].mxu0  ;;  %v892_v41 = vmul.f32 %v5891_v61, %v5891_v61 }
 0x227   :  { %v4750_v63 = vpack.c.bf16 %v5893_v39, %v5889_v55  ;;  %v893_v32 = vmul.f32 %v5893_v39, %v5893_v39  ;;  %v5901_v48 = vpop.f32.mrb[27].mxu0 }
 0x228   :  { %v4748_v42 = vpack.c.bf16 %v5901_v48, %v5891_v61  ;;  %v894_v49 = vmul.f32 %v5901_v48, %v5901_v48 }
 0x229   :  { %v4762_v52 = vpack.c.bf16 %v893_v32, %v891_v59 }
 0x22a   :  { %4749 = vmatprep.subr.bf16.mxu0 %v4748_v42  ;;  %v4760_v57 = vpack.c.bf16 %v894_v49, %v892_v41  ;;  %v975_v41 = vld [vmem:[%s7352_s20 + $0x158] sm:$0xff]  ;;  %v977_v42 = vld [vmem:[%s7352_s20 + $0x168] sm:$0xff] }
 0x22b   :  { %4751 = vmatpush1.bf16.msra.mxu0 %v4750_v63 }
 0x22c   :  { %v5909_v53 = vpop.f32.mrb[28].mxu0  ;;  %4761 = vmatprep.subr.bf16.mxu1 %v4760_v57 }
 0x22d   :  { %v5911_v56 = vpop.f32.mrb[29].mxu0  ;;  %4763 = vmatpush1.bf16.msra.mxu1 %v4762_v52  ;;  %v895_v27 = vmul.f32 %v5909_v53, %v5909_v53 }
 0x22e   :  { %v5913_v38 = vpop.f32.mrb[30].mxu0  ;;  %v896_v46 = vmul.f32 %v5911_v56, %v5911_v56 }
 0x22f   :  { %v4754_v26 = vpack.c.bf16 %v5913_v38, %v5909_v53  ;;  %v897_v9 = vmul.f32 %v5913_v38, %v5913_v38  ;;  %v5921_v37 = vpop.f32.mrb[31].mxu0 }
 0x230   :  { %v4752_v50 = vpack.c.bf16 %v5921_v37, %v5911_v56  ;;  %v898_v51 = vmul.f32 %v5921_v37, %v5921_v37 }
 0x231   :  { %v4766_v59 = vpack.c.bf16 %v897_v9, %v895_v27  ;;  %v989_v9 = vpack.c.bf16 %v977_v42, %v975_v41 }
 0x232   :  { %4753 = vmatprep.subr.bf16.mxu0 %v4752_v50  ;;  %v4764_v63 = vpack.c.bf16 %v898_v51, %v896_v46 }
 0x233   :  { %4755 = vmatpush1.bf16.msra.mxu0 %v4754_v26 }
 0x234   :  { %v5929_v32 = vpop.f32.mrb[32].mxu0  ;;  %4765 = vmatprep.subr.bf16.mxu1 %v4764_v63 }
 0x235   :  { %7376 = vst [vmem:[#allocation19_spill] sm:$0xff] %v5929_v32  ;;  %v5937_v49 = vpop.f32.mrb[33].mxu0  ;;  %4767 = vmatpush1.bf16.msra.mxu1 %v4766_v59  ;;  %v899_v27 = vmul.f32 %v5929_v32, %v5929_v32 }
 0x236   :  { %7377 = vst [vmem:[#allocation20_spill] sm:$0xff] %v5937_v49  ;;  %v900_v52 = vmul.f32 %v5937_v49, %v5937_v49  ;;  %v811_v57 = vpop.f32.mrb[34].mxu0  ;;  %826 = vmatprep.subr.mxu0 %v5937_v49 }
 0x237   :  { %v812_v26 = vpop.f32.mrb[35].mxu0  ;;  %827 = vmatpush1.msra.mxu0 %v5929_v32 }
 0x238   :  { %913 = vmatprep.subr.mxu1 %v900_v52  ;;  %4259 = vmatmul.mubr.msk.f32.vlgmr.msra.gmra.mrb[16].mxu0 %vm407_vm1, %v7337_v58 }
 0x239   :  { %914 = vmatpush1.msra.mxu1 %v899_v27  ;;  %1143 = vmatprep.mubr.f32.mxu0 %v7371_v29 }
 0x23a   :  { %1008 = vmatprep.subr.bf16.mxu1 %v5344_v0  ;;  %4260 = vmatmul.mubr.msk.f32.vlgmr.msra.gmra.mrb[18].mxu1 %vm407_vm1, %v7337_v58  ;;  %v974_v0 = vld [vmem:[%s7352_s20 + $0x150] sm:$0xff] }
 0x23b   :  { %1009 = vmatpush1.bf16.msra.mxu1 %v5349_v1  ;;  %4261 = vmatprep.mubr.msk.bf16.mxu1 %vm204_vm0, %v989_v9  ;;  %v976_v1 = vld [vmem:[%s7352_s20 + $0x160] sm:$0xff] }
 0x23c   :  { %1010 = vmatprep.subr.bf16.mxu1 %v5356_v2  ;;  %v979_v2 = vld [vmem:[%s7352_s20 + $0x178] sm:$0xff] }
 0x23f   :  { %1011 = vmatpush1.bf16.msra.mxu1 %v5363_v3  ;;  %v981_v3 = vld [vmem:[%s7352_s20 + $0x188] sm:$0xff] }
 0x240   :  { %1012 = vmatprep.subr.bf16.mxu1 %v5370_v4  ;;  %v988_v4 = vpack.c.bf16 %v976_v1, %v974_v0 }
 0x243   :  { %1013 = vmatpush1.bf16.msra.mxu1 %v5377_v5  ;;  %v991_v5 = vpack.c.bf16 %v981_v3, %v979_v2 }
 0x244   :  { %1014 = vmatprep.subr.bf16.mxu1 %v5384_v6  ;;  %v978_v6 = vld [vmem:[%s7352_s20 + $0x170] sm:$0xff] }
 0x247   :  { %1015 = vmatpush1.bf16.msra.mxu1 %v5391_v7  ;;  %v980_v7 = vld [vmem:[%s7352_s20 + $0x180] sm:$0xff] }
 0x248   :  { %1016 = vmatprep.subr.bf16.mxu1 %v5398_v8  ;;  %v983_v8 = vld [vmem:[%s7352_s20 + $0x198] sm:$0xff] }
 0x24b   :  { %1017 = vmatpush1.bf16.msra.mxu1 %v5417_v14  ;;  %v985_v14 = vld [vmem:[%s7352_s20 + $0x1a8] sm:$0xff] }
 0x24c   :  { %1018 = vmatprep.subr.bf16.mxu1 %v5424_v16  ;;  %v990_v16 = vpack.c.bf16 %v980_v7, %v978_v6 }
 0x24f   :  { %1019 = vmatpush1.bf16.msra.mxu1 %v5433_v17  ;;  %v993_v17 = vpack.c.bf16 %v985_v14, %v983_v8 }
 0x250   :  { %1020 = vmatprep.subr.bf16.mxu1 %v5440_v18  ;;  %v982_v18 = vld [vmem:[%s7352_s20 + $0x190] sm:$0xff] }
 0x253   :  { %1021 = vmatpush1.bf16.msra.mxu1 %v5447_v19  ;;  %v984_v19 = vld [vmem:[%s7352_s20 + $0x1a0] sm:$0xff] }
 0x254   :  { %1022 = vmatprep.subr.bf16.mxu1 %v5454_v20  ;;  %v987_v20 = vld [vmem:[%s7352_s20 + $0x1b8] sm:$0xff] }
 0x257   :  { %1023 = vmatpush1.bf16.msra.mxu1 %v5461_v21  ;;  %v992_v21 = vpack.c.bf16 %v984_v19, %v982_v18 }
 0x258   :  { %1024 = vmatprep.subr.bf16.mxu1 %v5468_v22  ;;  %v995_v22 = vpack.c.bf16 %v987_v20, %v987_v20 }
 0x25b   :  { %1025 = vmatpush1.bf16.msra.mxu1 %v5475_v23  ;;  %v986_v23 = vld [vmem:[%s7352_s20 + $0x1b0] sm:$0xff] }
 0x25c   :  { %1026 = vmatprep.subr.bf16.mxu1 %v5482_v24  ;;  %v994_v24 = vpack.c.bf16 %v986_v23, %v986_v23 }
 0x25f   :  { %1027 = vmatpush1.bf16.msra.mxu1 %v5487_v25 }
 0x262   :  { %1041 = vmatmul.mubr.bf16.vlgmr.msra.gmra.mrb[20].mxu1 %v988_v4 }
 0x263   :  { %4262 = vmatprep.mubr.msk.bf16.mxu1 %vm204_vm0, %v991_v5 }
 0x26a   :  { %1051 = vmatmul.mubr.bf16.gmra.mrb[24].mxu1 %v990_v16 }
 0x26b   :  { %4263 = vmatprep.mubr.msk.bf16.mxu1 %vm204_vm0, %v993_v17 }
 0x272   :  { %1061 = vmatmul.mubr.bf16.gmra.mrb[28].mxu1 %v992_v21 }
 0x273   :  { %4264 = vmatprep.mubr.msk.bf16.mxu1 %vm204_vm0, %v995_v22 }
 0x27a   :  { %1071 = vmatmul.mubr.bf16.gmra.mrb[32].mxu1 %v994_v24 }
 0x27b   :  { %1230 = vmatprep.mubr.f32.mxu1 %v7371_v29 }
 0x335   :  { %v6011_v25 = vpop.f32.mrb[20].mxu1 }
 0x336   :  { %v6013_v46 = vpop.f32.mrb[21].mxu1  ;;  %v1152_v51 = vmul.f32 %v6011_v25, %v6011_v25 }
 0x337   :  { %v6015_v50 = vpop.f32.mrb[22].mxu1  ;;  %v1153_v42 = vmul.f32 %v6013_v46, %v6013_v46 }
 0x338   :  { %v4770_v59 = vpack.c.bf16 %v6015_v50, %v6011_v25  ;;  %v1154_v63 = vmul.f32 %v6015_v50, %v6015_v50  ;;  %v6023_v41 = vpop.f32.mrb[23].mxu1 }
 0x339   :  { %v4768_v52 = vpack.c.bf16 %v6023_v41, %v6013_v46  ;;  %v1155_v57 = vmul.f32 %v6023_v41, %v6023_v41 }
 0x33a   :  { %v4782_v27 = vpack.c.bf16 %v1154_v63, %v1152_v51 }
 0x33b   :  { %4769 = vmatprep.subr.bf16.mxu0 %v4768_v52  ;;  %v4780_v26 = vpack.c.bf16 %v1155_v57, %v1153_v42  ;;  %v1257_v52 = vld [vmem:[%s7378_s30 + $0x80] sm:$0xff]  ;;  %v1258_v57 = vld [vmem:[%s7378_s30 + $0x88] sm:$0xff] }
 0x33c   :  { %4771 = vmatpush1.bf16.msra.mxu0 %v4770_v59 }
 0x33d   :  { %v6031_v9 = vpop.f32.mrb[24].mxu1  ;;  %4781 = vmatprep.subr.bf16.mxu1 %v4780_v26  ;;  %v1241_v26 = vld [vmem:[%s7378_s30] sm:$0xff] }
 0x33e   :  { %v6033_v0 = vpop.f32.mrb[25].mxu1  ;;  %4783 = vmatpush1.bf16.msra.mxu1 %v4782_v27  ;;  %v1156_v2 = vmul.f32 %v6031_v9, %v6031_v9 }
 0x33f   :  { %v6035_v1 = vpop.f32.mrb[26].mxu1  ;;  %v1157_v6 = vmul.f32 %v6033_v0, %v6033_v0 }
 0x340   :  { %v4774_v3 = vpack.c.bf16 %v6035_v1, %v6031_v9  ;;  %v1158_v4 = vmul.f32 %v6035_v1, %v6035_v1  ;;  %v6043_v5 = vpop.f32.mrb[27].mxu1 }
 0x341   :  { %v4772_v7 = vpack.c.bf16 %v6043_v5, %v6033_v0  ;;  %v1159_v8 = vmul.f32 %v6043_v5, %v6043_v5 }
 0x342   :  { %v4786_v14 = vpack.c.bf16 %v1158_v4, %v1156_v2  ;;  %v1242_v2 = vld [vmem:[%s7378_s30 + $0x8] sm:$0xff]  ;;  %v4792_v4 = vpack.c.bf16 %v1258_v57, %v1257_v52  ;;  %v1245_v57 = vld [vmem:[%s7378_s30 + $0x20] sm:$0xff] }
 0x343   :  { %4773 = vmatprep.subr.bf16.mxu0 %v4772_v7  ;;  %v4784_v16 = vpack.c.bf16 %v1159_v8, %v1157_v6  ;;  %v1259_v6 = vld [vmem:[%s7378_s30 + $0x90] sm:$0xff]  ;;  %v1260_v7 = vld [vmem:[%s7378_s30 + $0x98] sm:$0xff] }
 0x344   :  { %4775 = vmatpush1.bf16.msra.mxu0 %v4774_v3 }
 0x345   :  { %v6051_v17 = vpop.f32.mrb[28].mxu1  ;;  %4785 = vmatprep.subr.bf16.mxu1 %v4784_v16 }
 0x346   :  { %v6053_v18 = vpop.f32.mrb[29].mxu1  ;;  %4787 = vmatpush1.bf16.msra.mxu1 %v4786_v14  ;;  %v1160_v20 = vmul.f32 %v6051_v17, %v6051_v17 }
 0x347   :  { %v6055_v19 = vpop.f32.mrb[30].mxu1  ;;  %v1161_v24 = vmul.f32 %v6053_v18, %v6053_v18 }
 0x348   :  { %v4778_v21 = vpack.c.bf16 %v6055_v19, %v6051_v17  ;;  %v1162_v22 = vmul.f32 %v6055_v19, %v6055_v19  ;;  %v6063_v23 = vpop.f32.mrb[31].mxu1 }
 0x349   :  { %v4776_v51 = vpack.c.bf16 %v6063_v23, %v6053_v18  ;;  %v1163_v59 = vmul.f32 %v6063_v23, %v6063_v23 }
 0x34a   :  { %v4790_v63 = vpack.c.bf16 %v1162_v22, %v1160_v20  ;;  %v4796_v22 = vpack.c.bf16 %v1260_v7, %v1259_v6 }
 0x34b   :  { %4777 = vmatprep.subr.bf16.mxu0 %v4776_v51  ;;  %v4788_v42 = vpack.c.bf16 %v1163_v59, %v1161_v24  ;;  %v1243_v24 = vld [vmem:[%s7378_s30 + $0x10] sm:$0xff]  ;;  %v1244_v51 = vld [vmem:[%s7378_s30 + $0x18] sm:$0xff]  ;;  %v1261_v59 = vld [vmem:[%s7378_s30 + $0xa0] sm:$0xff] }
 0x34c   :  { %4779 = vmatpush1.bf16.msra.mxu0 %v4778_v21  ;;  %v4794_v21 = vpack.c.bf16 %v1242_v2, %v1241_v26  ;;  %v1246_v26 = vld [vmem:[%s7378_s30 + $0x28] sm:$0xff]  ;;  %v1263_v2 = vld [vmem:[%s7378_s30 + $0xb0] sm:$0xff] }
 0x34d   :  { %v6077_v27 = vpop.f32.mrb[32].mxu1  ;;  %4789 = vmatprep.subr.bf16.mxu1 %v4788_v42  ;;  %v4798_v42 = vpack.c.bf16 %v1244_v51, %v1243_v24  ;;  %v4802_v6 = vpack.c.bf16 %v1246_v26, %v1245_v57  ;;  %v1249_v24 = vld [vmem:[%s7378_s30 + $0x40] sm:$0xff]  ;;  %v1250_v51 = vld [vmem:[%s7378_s30 + $0x48] sm:$0xff]  ;;  %v1251_v57 = vld [vmem:[%s7378_s30 + $0x50] sm:$0xff] }
 0x34e   :  { %7379 = vst [vmem:[#allocation21_spill] sm:$0xff] %v6077_v27  ;;  %v6085_v3 = vpop.f32.mrb[33].mxu1  ;;  %4791 = vmatpush1.bf16.msra.mxu1 %v4790_v63  ;;  %v1164_v16 = vmul.f32 %v6077_v27, %v6077_v27  ;;  %v1262_v63 = vld [vmem:[%s7378_s30 + $0xa8] sm:$0xff]  ;;  %v1252_v26 = vld [vmem:[%s7378_s30 + $0x58] sm:$0xff] }
 0x34f   :  { %7380 = vst [vmem:[#allocation22_spill] sm:$0xff] %v6085_v3  ;;  %v1165_v8 = vmul.f32 %v6085_v3, %v6085_v3  ;;  %v1076_v14 = vpop.f32.mrb[34].mxu1  ;;  %1091 = vmatprep.subr.mxu0 %v6085_v3  ;;  %v4800_v52 = vpack.c.bf16 %v1262_v63, %v1261_v59  ;;  %v1267_v59 = vld [vmem:[%s7378_s30 + $0xd0] sm:$0xff]  ;;  %v1268_v63 = vld [vmem:[%s7378_s30 + $0xd8] sm:$0xff] }
 0x350   :  { %v1077_v20 = vpop.f32.mrb[35].mxu1  ;;  %1092 = vmatpush1.msra.mxu0 %v6077_v27  ;;  %v1248_v14 = vld [vmem:[%s7378_s30 + $0x38] sm:$0xff] }
 0x351   :  { %4265 = vmatmul.mubr.msk.f32.vlgmr.msra.gmra.mrb[16].mxu0 %vm407_vm1, %v7337_v58  ;;  %1178 = vmatprep.subr.mxu1 %v1165_v8  ;;  %v1247_v8 = vld [vmem:[%s7378_s30 + $0x30] sm:$0xff]  ;;  %v1266_v20 = vld [vmem:[%s7378_s30 + $0xc8] sm:$0xff] }
 0x352   :  { %1179 = vmatpush1.msra.mxu1 %v1164_v16  ;;  %4793 = vmatprep.subr.bf16.mxu0 %v4792_v4  ;;  %v1265_v16 = vld [vmem:[%s7378_s30 + $0xc0] sm:$0xff] }
 0x353   :  { %4266 = vmatmul.mubr.msk.f32.vlgmr.msra.gmra.mrb[18].mxu1 %vm407_vm1, %v7337_v58  ;;  %4825 = vmatprep.subr.bf16.mxu1 %v4792_v4  ;;  %v1264_v4 = vld [vmem:[%s7378_s30 + $0xb8] sm:$0xff] }
 0x354   :  { %4795 = vmatpush3.bf16.msra.mxu0 %v4794_v21  ;;  %4827 = vmatpush3.bf16.msra.mxu1 %v4794_v21  ;;  %v4804_v7 = vpack.c.bf16 %v1264_v4, %v1263_v2  ;;  %v4806_v21 = vpack.c.bf16 %v1248_v14, %v1247_v8  ;;  %v1269_v2 = vld [vmem:[%s7378_s30 + $0xe0] sm:$0xff]  ;;  %v1270_v4 = vld [vmem:[%s7378_s30 + $0xe8] sm:$0xff] }
 0x355   :  { %4797 = vmatprep.subr.bf16.mxu0 %v4796_v22  ;;  %4829 = vmatprep.subr.bf16.mxu1 %v4796_v22  ;;  %v4808_v22 = vpack.c.bf16 %v1266_v20, %v1265_v16  ;;  %v1253_v8 = vld [vmem:[%s7378_s30 + $0x60] sm:$0xff]  ;;  %v1254_v14 = vld [vmem:[%s7378_s30 + $0x68] sm:$0xff]  ;;  %v1271_v20 = vld [vmem:[%s7378_s30 + $0xf0] sm:$0xff] }
 0x356   :  { %v4818_v16 = vpack.c.bf16 %v1254_v14, %v1253_v8 }
 0x358   :  { %4799 = vmatpush3.bf16.msra.mxu0 %v4798_v42  ;;  %4831 = vmatpush3.bf16.msra.mxu1 %v4798_v42  ;;  %v4810_v42 = vpack.c.bf16 %v1250_v51, %v1249_v24  ;;  %v1255_v24 = vld [vmem:[%s7378_s30 + $0x70] sm:$0xff]  ;;  %v1256_v51 = vld [vmem:[%s7378_s30 + $0x78] sm:$0xff] }
 0x359   :  { %4801 = vmatprep.subr.bf16.mxu0 %v4800_v52  ;;  %4833 = vmatprep.subr.bf16.mxu1 %v4800_v52  ;;  %v4812_v52 = vpack.c.bf16 %v1268_v63, %v1267_v59  ;;  %v4822_v59 = vpack.c.bf16 %v1256_v51, %v1255_v24 }
 0x35c   :  { %4803 = vmatpush3.bf16.msra.mxu0 %v4802_v6  ;;  %4835 = vmatpush3.bf16.msra.mxu1 %v4802_v6  ;;  %v4814_v6 = vpack.c.bf16 %v1252_v26, %v1251_v57 }
 0x35d   :  { %4805 = vmatprep.subr.bf16.mxu0 %v4804_v7  ;;  %4837 = vmatprep.subr.bf16.mxu1 %v4804_v7  ;;  %v4816_v7 = vpack.c.bf16 %v1270_v4, %v1269_v2  ;;  %v1427_v4 = vld [vmem:[%s7302_s4] sm:$0x3f] }
 0x360   :  { %4807 = vmatpush3.bf16.msra.mxu0 %v4806_v21  ;;  %4839 = vmatpush3.bf16.msra.mxu1 %v4806_v21  ;;  %v1272_v21 = vld [vmem:[%s7378_s30 + $0xf8] sm:$0xff] }
 0x361   :  { %4809 = vmatprep.subr.bf16.mxu0 %v4808_v22  ;;  %4841 = vmatprep.subr.bf16.mxu1 %v4808_v22  ;;  %v4820_v22 = vpack.c.bf16 %v1272_v21, %v1271_v20 }
 0x364   :  { %4811 = vmatpush3.bf16.msra.mxu0 %v4810_v42  ;;  %4843 = vmatpush3.bf16.msra.mxu1 %v4810_v42 }
 0x365   :  { %4813 = vmatprep.subr.bf16.mxu0 %v4812_v52  ;;  %4845 = vmatprep.subr.bf16.mxu1 %v4812_v52 }
 0x368   :  { %4815 = vmatpush3.bf16.msra.mxu0 %v4814_v6  ;;  %4847 = vmatpush3.bf16.msra.mxu1 %v4814_v6  ;;  %v1413_v6 = vstv %s1240_s29 }
 0x369   :  { %4817 = vmatprep.subr.bf16.mxu0 %v4816_v7  ;;  %4849 = vmatprep.subr.bf16.mxu1 %v4816_v7  ;;  %5234 = vrcp.f32 %v1413_v6 }
 0x36c   :  { %4819 = vmatpush3.bf16.msra.mxu0 %v4818_v16  ;;  %4851 = vmatpush3.bf16.msra.mxu1 %v4818_v16 }
 0x36d   :  { %4821 = vmatprep.subr.bf16.mxu0 %v4820_v22  ;;  %4853 = vmatprep.subr.bf16.mxu1 %v4820_v22 }
 0x370   :  { %4823 = vmatpush3.bf16.msra.mxu0 %v4822_v59  ;;  %4855 = vmatpush3.bf16.msra.mxu1 %v4822_v59 }
 0x373   :  { %v5235_v14 = vpop.eup %5234 }
 0x424   :  { %v1145_v63 = vpop.f32.mrb[16].mxu0 }
 0x425   :  { %v4960_v42 = vadd.f32 %v1145_v63, %v5865_v62  ;;  %v1147_v52 = vpop.f32.mrb[17].mxu0  ;;  %v1428_v62 = vld [vmem:[%s7302_s4 + $0x8] sm:$0x3f] }
 0x426   :  { %v4961_v57 = vadd.f32 %v1147_v52, %v5867_v40  ;;  %v1232_v26 = vpop.f32.mrb[18].mxu1  ;;  %4267 = vmatprep.subr.msk.mxu0 %vm1433_vm2, %v1428_v62  ;;  %4270 = vmatprep.subr.msk.mxu1 %vm1433_vm2, %v1428_v62  ;;  %v5060_v40 = vld [vmem:[%s7303_s7 + $0x4] ss:$8 sps:$4 sm:$0xff]   ;;  %v5063_v62 = vld [vmem:[%s7303_s7 + $0x14] ss:$8 sps:$4 sm:$0xff]  }
 0x427   :  { %v1234_v2 = vpop.f32.mrb[19].mxu1 }
 0x428   :  { %1337 = vmatprep.mubr.f32.mxu0 %v4961_v57  ;;  %1407 = vmatprep.mubr.f32.mxu1 %v1234_v2  ;;  %v1422_v57 = vld [vmem:[%s7305_s5] sm:$0x1] }
 0x429   :  { %1338 = vmatmul.mubr.f32.vlgmr.msra.gmra.mrb[18].mxu0 %v4960_v42  ;;  %1408 = vmatmul.mubr.f32.vlgmr.msra.gmra.mrb[36].mxu1 %v1232_v26  ;;  %v5058_v2 = vld [vmem:[%s7303_s7] ss:$8 sps:$4 sm:$0xff]  }
 0x42a   :  { %1504 = vmatprep.mubr.f32.mxu0 %v7371_v29  ;;  %1578 = vmatprep.mubr.f32.mxu1 %v7371_v29 }
 0x42b   :  { %4268 = vmatpush1.msk.msra.mxu0 %vm1433_vm2, %v1427_v4  ;;  %4271 = vmatpush1.msk.msra.mxu1 %vm1433_vm2, %v1427_v4 }
 0x42c   :  { %2433 = vmatprep.subr.bf16.mxu0 %v5060_v40  ;;  %2628 = vmatprep.subr.bf16.mxu1 %v5060_v40  ;;  %v1424_v40 = vld [vmem:[%s7306_s6] sm:$0x1] }
 0x4fc   :  { %v4457_v7 = vpop.f32.mrb[18].mxu0  ;;  %v4492_v8 = vpop.f32.mrb[36].mxu1 }
 0x4fd   :  { %v4458_v16 = vpop.f32.mrb[19].mxu0  ;;  %v4493_v20 = vpop.f32.mrb[37].mxu1 }
 0x4fe   :  { %v4459_v21 = vadd.f32 %v4458_v16, %v4457_v7  ;;  %v4494_v22 = vadd.f32 %v4493_v20, %v4492_v8  ;;  %v5061_v7 = vld [vmem:[%s7303_s7 + $0x10] ss:$8 sps:$4 sm:$0xff]   ;;  %v5064_v16 = vld [vmem:[%s7303_s7 + $0x20] ss:$8 sps:$4 sm:$0xff]   ;;  %v5069_v20 = vld [vmem:[%s7303_s7 + $0x34] ss:$8 sps:$4 sm:$0xff]  }
 0x500   :  { %v1415_v24 = vmul.f32 %v5235_v14, %v4459_v21  ;;  %v1416_v59 = vmul.f32 %v5235_v14, %v4494_v22  ;;  %v5066_v14 = vld [vmem:[%s7303_s7 + $0x24] ss:$8 sps:$4 sm:$0xff]   ;;  %v5067_v21 = vld [vmem:[%s7303_s7 + $0x30] ss:$8 sps:$4 sm:$0xff]  }
 0x501   :  { %v5072_v22 = vld [vmem:[%s7303_s7 + $0x44] ss:$8 sps:$4 sm:$0xff]  }
 0x502   :  { %v1417_v51 = vmul.f32 %v1415_v24, %v1415_v24 }
 0x504   :  { %v1418_v63 = vsub.f32 %v1416_v59, %v1417_v51  ;;  %v5075_v51 = vld [vmem:[%s7303_s7 + $0x54] ss:$8 sps:$4 sm:$0xff]   ;;  %v5073_v59 = vld [vmem:[%s7303_s7 + $0x50] ss:$8 sps:$4 sm:$0xff]  }
 0x506   :  { %v1419_v42 = vmax.f32 %v1418_v63, 0.0  ;;  %v5078_v63 = vld [vmem:[%s7303_s7 + $0x64] ss:$8 sps:$4 sm:$0xff]  }
 0x508   :  { %v1420_v52 = vadd.f32 1e-05, %v1419_v42  ;;  %v5076_v42 = vld [vmem:[%s7303_s7 + $0x60] ss:$8 sps:$4 sm:$0xff]  }
 0x50a   :  { %5236 = vrsqrt.f32 %v1420_v52  ;;  %v5081_v52 = vld [vmem:[%s7303_s7 + $0x74] ss:$8 sps:$4 sm:$0xff]  }
 0x514   :  { %v5237_v26 = vpop.eup %5236 }
 0x515   :  { %v1423_v4 = vmul.f32 %v5237_v26, %v1422_v57  ;;  %v5079_v57 = vld [vmem:[%s7303_s7 + $0x70] ss:$8 sps:$4 sm:$0xff]   ;;  %v5084_v26 = vld [vmem:[%s7303_s7 + $0x84] ss:$8 sps:$4 sm:$0xff]  }
 0x517   :  { %4269 = vmatmul.mubr.msk.f32.vlgmr.msra.gmra.mrb[36].mxu0 %vm1429_vm3, %v1423_v4  ;;  %v1425_v6 = vmul.f32 %v1423_v4, %v1415_v24  ;;  %v5070_v24 = vld [vmem:[%s7303_s7 + $0x40] ss:$8 sps:$4 sm:$0xff]   ;;  %v5087_v4 = vld [vmem:[%s7303_s7 + $0x94] ss:$8 sps:$4 sm:$0xff]  }
 0x518   :  { %2434 = vmatpush1.bf16.msra.mxu0 %v5058_v2 }
 0x519   :  { %v1426_v8 = vsub.f32 %v1424_v40, %v1425_v6  ;;  %2435 = vmatprep.subr.bf16.mxu0 %v5063_v62  ;;  %v5090_v40 = vld [vmem:[%s7303_s7 + $0xa4] ss:$8 sps:$4 sm:$0xff]   ;;  %v5088_v6 = vld [vmem:[%s7303_s7 + $0xa0] ss:$8 sps:$4 sm:$0xff]  }
 0x51b   :  { %4272 = vmatmul.mubr.msk.f32.vlgmr.msra.gmra.mrb[38].mxu1 %vm1429_vm3, %v1426_v8  ;;  %v5091_v8 = vld [vmem:[%s7303_s7 + $0xb0] ss:$8 sps:$4 sm:$0xff]  }
 0x51c   :  { %2629 = vmatpush1.bf16.msra.mxu1 %v5058_v2  ;;  %2436 = vmatpush1.bf16.msra.mxu0 %v5061_v7  ;;  %v5082_v2 = vld [vmem:[%s7303_s7 + $0x80] ss:$8 sps:$4 sm:$0xff]  }
 0x51d   :  { %2630 = vmatprep.subr.bf16.mxu1 %v5063_v62  ;;  %2437 = vmatprep.subr.bf16.mxu0 %v5066_v14  ;;  %v5085_v62 = vld [vmem:[%s7303_s7 + $0x90] ss:$8 sps:$4 sm:$0xff]  }
 0x520   :  { %2631 = vmatpush1.bf16.msra.mxu1 %v5061_v7  ;;  %2438 = vmatpush1.bf16.msra.mxu0 %v5064_v16  ;;  %v5093_v7 = vld [vmem:[%s7303_s7 + $0xb4] ss:$8 sps:$4 sm:$0xff]  }
 0x521   :  { %2632 = vmatprep.subr.bf16.mxu1 %v5066_v14  ;;  %2439 = vmatprep.subr.bf16.mxu0 %v5069_v20  ;;  %v5096_v14 = vld [vmem:[%s7303_s7 + $0xc4] ss:$8 sps:$4 sm:$0xff]  }
 0x524   :  { %2633 = vmatpush1.bf16.msra.mxu1 %v5064_v16  ;;  %2440 = vmatpush1.bf16.msra.mxu0 %v5067_v21  ;;  %v5094_v16 = vld [vmem:[%s7303_s7 + $0xc0] ss:$8 sps:$4 sm:$0xff]  }
 0x525   :  { %2634 = vmatprep.subr.bf16.mxu1 %v5069_v20  ;;  %2441 = vmatprep.subr.bf16.mxu0 %v5072_v22  ;;  %v5097_v20 = vld [vmem:[%s7303_s7 + $0xd0] ss:$8 sps:$4 sm:$0xff]  }
 0x528   :  { %2635 = vmatpush1.bf16.msra.mxu1 %v5067_v21  ;;  %2442 = vmatpush1.bf16.msra.mxu0 %v5070_v24  ;;  %v5099_v21 = vld [vmem:[%s7303_s7 + $0xd4] ss:$8 sps:$4 sm:$0xff]  }
 0x529   :  { %2636 = vmatprep.subr.bf16.mxu1 %v5072_v22  ;;  %2443 = vmatprep.subr.bf16.mxu0 %v5075_v51  ;;  %v5102_v22 = vld [vmem:[%s7303_s7 + $0xe4] ss:$8 sps:$4 sm:$0xff]  }
 0x52c   :  { %2637 = vmatpush1.bf16.msra.mxu1 %v5070_v24  ;;  %2444 = vmatpush1.bf16.msra.mxu0 %v5073_v59  ;;  %v5100_v24 = vld [vmem:[%s7303_s7 + $0xe0] ss:$8 sps:$4 sm:$0xff]  }
 0x52d   :  { %2638 = vmatprep.subr.bf16.mxu1 %v5075_v51  ;;  %2445 = vmatprep.subr.bf16.mxu0 %v5078_v63  ;;  %v5105_v51 = vld [vmem:[%s7303_s7 + $0xf4] ss:$8 sps:$4 sm:$0xff]  }
 0x530   :  { %2639 = vmatpush1.bf16.msra.mxu1 %v5073_v59  ;;  %2446 = vmatpush1.bf16.msra.mxu0 %v5076_v42  ;;  %v5103_v59 = vld [vmem:[%s7303_s7 + $0xf0] ss:$8 sps:$4 sm:$0xff]  }
 0x531   :  { %2640 = vmatprep.subr.bf16.mxu1 %v5078_v63  ;;  %2447 = vmatprep.subr.bf16.mxu0 %v5081_v52  ;;  %v5108_v63 = vld [vmem:[%s7303_s7 + $0x104] ss:$8 sps:$4 sm:$0xff]  }
 0x534   :  { %2641 = vmatpush1.bf16.msra.mxu1 %v5076_v42  ;;  %2448 = vmatpush1.bf16.msra.mxu0 %v5079_v57  ;;  %v1585_v42 = vlaneseq }
 0x535   :  { %2642 = vmatprep.subr.bf16.mxu1 %v5081_v52  ;;  %2449 = vmatprep.subr.bf16.mxu0 %v5084_v26 }
 0x536   :  { %v1586_v52 = vshrl.u32 %v1585_v42, 7 }
 0x538   :  { %2643 = vmatpush1.bf16.msra.mxu1 %v5079_v57  ;;  %2450 = vmatpush1.bf16.msra.mxu0 %v5082_v2  ;;  %v1818_v57 = vadd.s32 48, %v1586_v52 }
 0x539   :  { %2644 = vmatprep.subr.bf16.mxu1 %v5084_v26  ;;  %2451 = vmatprep.subr.bf16.mxu0 %v5087_v4  ;;  %v6302_v26 = vstv %s7304_s0 }
 0x53c   :  { %2645 = vmatpush1.bf16.msra.mxu1 %v5082_v2  ;;  %2452 = vmatpush1.bf16.msra.mxu0 %v5085_v62  ;;  %v1865_v2 = vand.u32 7, %v1818_v57 }
 0x53d   :  { %2646 = vmatprep.subr.bf16.mxu1 %v5087_v4  ;;  %2453 = vmatprep.subr.bf16.mxu0 %v5090_v40  ;;  %v7381_v4 = vmov 0 }
 0x53e   :  { %vm6305_vm4 = vcmp.lt.s32.totalorder %v1865_v2, %v6302_v26 }
 0x53f   :  { %v7382_v4 = vsel %vm6305_vm4, 4294967295, %v7381_v4 }
 0x540   :  { %2647 = vmatpush1.bf16.msra.mxu1 %v5085_v62  ;;  %2454 = vmatpush1.bf16.msra.mxu0 %v5088_v6  ;;  %7383 = vst [vmem:[#allocation23_spill] sm:$0xff] %v7382_v4  ;;  %v1813_v62 = vadd.s32 8, %v1586_v52 }
 0x541   :  { %2648 = vmatprep.subr.bf16.mxu1 %v5090_v40  ;;  %2455 = vmatprep.subr.bf16.mxu0 %v5093_v7  ;;  %v1814_v40 = vadd.s32 16, %v1586_v52 }
 0x544   :  { %2649 = vmatpush1.bf16.msra.mxu1 %v5088_v6  ;;  %2456 = vmatpush1.bf16.msra.mxu0 %v5091_v8  ;;  %v1815_v6 = vadd.s32 24, %v1586_v52 }
 0x545   :  { %2650 = vmatprep.subr.bf16.mxu1 %v5093_v7  ;;  %2457 = vmatprep.subr.bf16.mxu0 %v5096_v14  ;;  %v1823_v7 = vand.u32 7, %v1586_v52 }
 0x547   :  { %vm1904_vm5 = vcmp.lt.s32.totalorder %v1823_v7, %v6302_v26 }
 0x548   :  { %2651 = vmatpush1.bf16.msra.mxu1 %v5091_v8  ;;  %2458 = vmatpush1.bf16.msra.mxu0 %v5094_v16  ;;  %v1830_v8 = vand.u32 7, %v1813_v62 }
 0x549   :  { %2652 = vmatprep.subr.bf16.mxu1 %v5096_v14  ;;  %2459 = vmatprep.subr.bf16.mxu0 %v5099_v21  ;;  %v1837_v14 = vand.u32 7, %v1814_v40  ;;  %v6336_v40 = vadd.s32 40, %v1586_v52 }
 0x54a   :  { %vm1905_vm6 = vcmp.lt.s32.totalorder %v1830_v8, %v6302_v26 }
 0x54b   :  { %vm1906_vm7 = vcmp.lt.s32.totalorder %v1837_v14, %v6302_v26 }
 0x54c   :  { %2653 = vmatpush1.bf16.msra.mxu1 %v5094_v16  ;;  %2460 = vmatpush1.bf16.msra.mxu0 %v5097_v20  ;;  %v1844_v16 = vand.u32 7, %v1815_v6  ;;  %v6327_v42 = vsel %vm1906_vm7, 1.0, %v7371_v29 }
 0x54d   :  { %2654 = vmatprep.subr.bf16.mxu1 %v5099_v21  ;;  %2461 = vmatprep.subr.bf16.mxu0 %v5102_v22  ;;  %v6314_v21 = vadd.s32 32, %v1586_v52 }
 0x54e   :  { %vm1907_vm8 = vcmp.lt.s32.totalorder %v1844_v16, %v6302_v26 }
 0x54f   :  { %v6333_v2 = vsel %vm1907_vm8, 1.0, %v7371_v29 }
 0x550   :  { %2655 = vmatpush1.bf16.msra.mxu1 %v5097_v20  ;;  %2462 = vmatpush1.bf16.msra.mxu0 %v5100_v24  ;;  %v6309_v20 = vsub.s32 0, %v1586_v52 }
 0x551   :  { %2656 = vmatprep.subr.bf16.mxu1 %v5102_v22  ;;  %2463 = vmatprep.subr.bf16.mxu0 %v5105_v51 }
 0x552   :  { %7384 = vst [vmem:[#allocation24_spill] sm:$0xff] %v6309_v20 }
 0x554   :  { %2657 = vmatpush1.bf16.msra.mxu1 %v5100_v24  ;;  %2464 = vmatpush1.bf16.msra.mxu0 %v5103_v59 }
 0x555   :  { %2658 = vmatprep.subr.bf16.mxu1 %v5105_v51  ;;  %2494 = vmatprep.subr.bf16.mxu0 %v5108_v63 }
 0x558   :  { %2659 = vmatpush1.bf16.msra.mxu1 %v5103_v59  ;;  %v6321_v59 = vsel %vm1904_vm5, 1.0, %v7371_v29 }
 0x559   :  { %2689 = vmatprep.subr.bf16.mxu1 %v5108_v63  ;;  %v6324_v63 = vsel %vm1905_vm6, 1.0, %v7371_v29 }
 0x5ea   :  { %v1506_v22 = vpop.f32.mrb[36].mxu0 }
 0x5eb   :  { %v6318_v24 = vrot.slane %v1506_v22, %v6309_v20  ;;  %v1508_v51 = vpop.f32.mrb[37].mxu0 }
 0x5ec   :  { %v6330_v57 = vrot.slane %v1508_v51, %v6309_v20 }
 0x5ed   :  { %v1593_v6 = vmul.f32 %v6318_v24, %v5575_v10  ;;  %v1650_v7 = vmul.f32 %v6318_v24, %v5577_v11  ;;  %v1706_v8 = vmul.f32 %v6318_v24, %v5869_v13  ;;  %v1708_v14 = vmul.f32 %v6318_v24, %v5873_v44 }
 0x5ee   :  { %v1580_v16 = vpop.f32.mrb[38].mxu1  ;;  %v1594_v22 = vmul.f32 %v6330_v57, %v5579_v12  ;;  %v1651_v52 = vmul.f32 %v6330_v57, %v5585_v15  ;;  %v1707_v51 = vmul.f32 %v6330_v57, %v5871_v35  ;;  %v1709_v10 = vmul.f32 %v6330_v57, %v5881_v31 }
 0x5ef   :  { %v6355_v11 = vrot.slane %v1580_v16, %v6309_v20  ;;  %v1582_v13 = vpop.f32.mrb[39].mxu1  ;;  %v1755_v44 = vmul.f32 %v6318_v24, %v6011_v25  ;;  %v1756_v58 = vmul.f32 %v6330_v57, %v6013_v46  ;;  %v1757_v12 = vmul.f32 %v6318_v24, %v6015_v50 }
 0x5f0   :  { %v6364_v15 = vrot.slane %v1582_v13, %v6309_v20  ;;  %v1758_v35 = vmul.f32 %v6330_v57, %v6023_v41  ;;  %v1595_v31 = vmul.f32 %v6318_v24, %v5595_v28  ;;  %v1596_v16 = vmul.f32 %v6330_v57, %v5609_v33 }
 0x5f1   :  { %v1615_v25 = vadd.f32 %v6355_v11, %v1593_v6  ;;  %v1664_v62 = vadd.f32 %v1650_v7, %v6355_v11  ;;  %v1720_v46 = vadd.f32 %v1706_v8, %v6355_v11  ;;  %v1722_v50 = vadd.f32 %v1708_v14, %v6355_v11 }
 0x5f2   :  { %v1616_v13 = vadd.f32 %v6364_v15, %v1594_v22  ;;  %v1665_v20 = vadd.f32 %v1651_v52, %v6364_v15  ;;  %v1721_v41 = vadd.f32 %v1707_v51, %v6364_v15  ;;  %v1723_v4 = vadd.f32 %v1709_v10, %v6364_v15 }
 0x5f3   :  { %v1629_v28 = vmax.f32 %v1615_v25, 0.0  ;;  %v1678_v3 = vmax.f32 %v1664_v62, 0.0  ;;  %v1734_v27 = vmax.f32 %v1720_v46, 0.0  ;;  %v1736_v33 = vmax.f32 %v1722_v50, 0.0 }
 0x5f4   :  { %v1630_v49 = vmax.f32 %v1616_v13, 0.0  ;;  %v1679_v6 = vmax.f32 %v1665_v20, 0.0  ;;  %v1735_v32 = vmax.f32 %v1721_v41, 0.0  ;;  %v1737_v7 = vmax.f32 %v1723_v4, 0.0 }
 0x5f5   :  { %v1769_v8 = vadd.f32 %v1755_v44, %v6355_v11  ;;  %v1770_v14 = vadd.f32 %v1756_v58, %v6364_v15  ;;  %v1771_v22 = vadd.f32 %v1757_v12, %v6355_v11  ;;  %v1772_v52 = vadd.f32 %v1758_v35, %v6364_v15 }
 0x5f6   :  { %v1643_v43 = vmax.f32 %v1629_v28, %v1630_v49  ;;  %v1692_v51 = vmax.f32 %v1678_v3, %v1679_v6  ;;  %v1748_v60 = vmax.f32 %v1734_v27, %v1735_v32  ;;  %v1749_v10 = vmax.f32 %v1736_v33, %v1737_v7  ;;  %v7385_v28 = vld [vmem:[#allocation3_spill] sm:$0xff] }
 0x5f7   :  { %v1783_v25 = vmax.f32 %v1769_v8, 0.0  ;;  %v1784_v62 = vmax.f32 %v1770_v14, 0.0  ;;  %v1785_v46 = vmax.f32 %v1771_v22, 0.0  ;;  %v1786_v50 = vmax.f32 %v1772_v52, 0.0 }
 0x5f8   :  { %v1699_v13 = vmax.f32 %v1643_v43, %v1692_v51  ;;  %v1597_v4 = vmul.f32 %v6318_v24, %v5639_v45  ;;  %v1598_v20 = vmul.f32 %v6330_v57, %v5643_v47  ;;  %v1617_v58 = vadd.f32 %v6355_v11, %v1595_v31 }
 0x5f9   :  { %v1797_v44 = vmax.f32 %v1783_v25, %v1784_v62  ;;  %v1798_v12 = vmax.f32 %v1785_v46, %v1786_v50  ;;  %v1618_v49 = vadd.f32 %v6364_v15, %v1596_v16  ;;  %v1652_v32 = vmul.f32 %v6318_v24, %v5601_v30  ;;  %v7386_v16 = vld [vmem:[#allocation4_spill] sm:$0xff]  ;;  %v7387_v30 = vld [vmem:[#allocation5_spill] sm:$0xff] }
 0x5fa   :  { %v6393_v27 = vmul.f32 %v6321_v59, %v1699_v13  ;;  %v1619_v43 = vadd.f32 %v6355_v11, %v1597_v4  ;;  %v1620_v3 = vadd.f32 %v6364_v15, %v1598_v20  ;;  %v1631_v45 = vmax.f32 %v1617_v58, 0.0 }
 0x5fb   :  { %v1804_v35 = vmax.f32 %v1748_v60, %v1797_v44  ;;  %v1805_v41 = vmax.f32 %v1749_v10, %v1798_v12  ;;  %v1632_v47 = vmax.f32 %v1618_v49, 0.0  ;;  %v1653_v31 = vmul.f32 %v6330_v57, %v7385_v28 }
 0x5fc   :  { %v1633_v33 = vmax.f32 %v1619_v43, 0.0  ;;  %v1634_v6 = vmax.f32 %v1620_v3, 0.0  ;;  %v1654_v7 = vmul.f32 %v6318_v24, %v7386_v16  ;;  %v1655_v8 = vmul.f32 %v6330_v57, %v7387_v30 }
 0x5fd   :  { %v1932_v14 = vmul.f32 %v6321_v59, %v1804_v35  ;;  %v6405_v22 = vmul.f32 %v6324_v63, %v1805_v41  ;;  %v1644_v52 = vmax.f32 %v1631_v45, %v1632_v47  ;;  %v1666_v60 = vadd.f32 %v1652_v32, %v6355_v11 }
 0x5fe   :  { %v1645_v51 = vmax.f32 %v1633_v33, %v1634_v6  ;;  %v1667_v10 = vadd.f32 %v1653_v31, %v6364_v15  ;;  %v1668_v25 = vadd.f32 %v1654_v7, %v6355_v11  ;;  %v1669_v62 = vadd.f32 %v1655_v8, %v6364_v15 }
 0x5ff   :  { %v2020_v46 = vpack.c.bf16 %v6405_v22, %v1932_v14  ;;  %v1680_v50 = vmax.f32 %v1666_v60, 0.0  ;;  %v1710_v13 = vmul.f32 %v6318_v24, %v5889_v55  ;;  %v1711_v59 = vmul.f32 %v6330_v57, %v5891_v61 }
 0x600   :  { %v7388_v4 = vand.u32 7, %v6314_v21  ;;  %v1681_v58 = vmax.f32 %v1667_v10, 0.0  ;;  %v1682_v44 = vmax.f32 %v1668_v25, 0.0  ;;  %v1683_v12 = vmax.f32 %v1669_v62, 0.0  ;;  %v7391_v10 = vld [vmem:[#allocation6_spill] sm:$0xff] }
 0x601   :  { %v1712_v49 = vmul.f32 %v6318_v24, %v5893_v39  ;;  %2465 = vmatprep.mubr.bf16.mxu0 %v2020_v46  ;;  %v1713_v55 = vmul.f32 %v6330_v57, %v5901_v48  ;;  %v1724_v32 = vadd.f32 %v1710_v13, %v6355_v11  ;;  %v1725_v61 = vadd.f32 %v1711_v59, %v6364_v15  ;;  %v5111_v59 = vld [vmem:[%s7303_s7 + $0x114] ss:$8 sps:$4 sm:$0xff]  }
 0x602   :  { %vm6419_vm9 = vcmp.lt.s32.totalorder %v7388_v4, %v6302_v26  ;;  %v1759_v21 = vmul.f32 %v6318_v24, %v6031_v9  ;;  %v1693_v43 = vmax.f32 %v1680_v50, %v1681_v58  ;;  %v1694_v3 = vmax.f32 %v1682_v44, %v1683_v12  ;;  %v7392_v58 = vld [vmem:[#allocation8_spill] sm:$0xff]  ;;  %v7393_v12 = vld [vmem:[#allocation10_spill] sm:$0xff] }
 0x603   :  { %v1726_v45 = vadd.f32 %v1712_v49, %v6355_v11  ;;  %v1760_v35 = vmul.f32 %v6330_v57, %v6033_v0  ;;  %v1727_v39 = vadd.f32 %v1713_v55, %v6364_v15  ;;  %v1738_v41 = vmax.f32 %v1724_v32, 0.0  ;;  %v7394_v55 = vld [vmem:[#allocation12_spill] sm:$0xff] }
 0x604   :  { %v1739_v47 = vmax.f32 %v1725_v61, 0.0  ;;  %v1761_v48 = vmul.f32 %v6318_v24, %v6035_v1  ;;  %v1700_v28 = vmax.f32 %v1644_v52, %v1693_v43  ;;  %v1701_v31 = vmax.f32 %v1645_v51, %v1694_v3  ;;  %v5106_v52 = vld [vmem:[%s7303_s7 + $0x100] ss:$8 sps:$4 sm:$0xff]  }
 0x605   :  { %v1740_v33 = vmax.f32 %v1726_v45, 0.0  ;;  %v1762_v9 = vmul.f32 %v6330_v57, %v6043_v5  ;;  %v1741_v6 = vmax.f32 %v1727_v39, 0.0  ;;  %v1773_v7 = vadd.f32 %v1759_v21, %v6355_v11  ;;  %v7395_v21 = vld [vmem:[#allocation7_spill] sm:$0xff] }
 0x606   :  { %v1750_v16 = vmax.f32 %v1738_v41, %v1739_v47  ;;  %v1774_v30 = vadd.f32 %v1760_v35, %v6364_v15  ;;  %v1926_v0 = vmul.f32 %v6324_v63, %v1700_v28  ;;  %v6443_v8 = vmul.f32 %v6327_v42, %v1701_v31  ;;  %v5109_v41 = vld [vmem:[%s7303_s7 + $0x110] ss:$8 sps:$4 sm:$0xff]  }
 0x607   :  { %v1775_v14 = vadd.f32 %v1761_v48, %v6355_v11  ;;  %v1776_v1 = vadd.f32 %v1762_v9, %v6364_v15  ;;  %v1751_v5 = vmax.f32 %v1740_v33, %v1741_v6  ;;  %v1787_v60 = vmax.f32 %v1773_v7, 0.0  ;;  %v7396_v31 = vld [vmem:[#allocation9_spill] sm:$0xff]  ;;  %v7397_v7 = vld [vmem:[#allocation11_spill] sm:$0xff] }
 0x608   :  { %v1788_v51 = vmax.f32 %v1774_v30, 0.0  ;;  %v1599_v25 = vmul.f32 %v6318_v24, %v7391_v10  ;;  %v6453_v62 = vpack.c.bf16 %v6443_v8, %v1926_v0  ;;  %v2019_v63 = vpack.c.bf16 %v1926_v0, %v6393_v27 }
 0x609   :  { %v1789_v50 = vmax.f32 %v1775_v14, 0.0  ;;  %v1790_v13 = vmax.f32 %v1776_v1, 0.0  ;;  %v1600_v44 = vmul.f32 %v6330_v57, %v7392_v58  ;;  %v1601_v49 = vmul.f32 %v6318_v24, %v7393_v12  ;;  %v7398_v14 = vld [vmem:[#allocation13_spill] sm:$0xff] }
 0x60a   :  { %v1799_v4 = vmax.f32 %v1787_v60, %v1788_v51  ;;  %v1602_v32 = vmul.f32 %v6330_v57, %v7394_v55  ;;  %2660 = vmatprep.mubr.bf16.mxu1 %v6453_v62  ;;  %2466 = vmatmul.mubr.bf16.vlgmr.msra.gmra.mrb[40].mxu0 %v2019_v63  ;;  %v1621_v61 = vadd.f32 %v6355_v11, %v1599_v25  ;;  %v6472_v3 = vsel %vm6419_vm9, 1.0, %v7371_v29  ;;  %v5112_v51 = vld [vmem:[%s7303_s7 + $0x120] ss:$8 sps:$4 sm:$0xff]  }
 0x60b   :  { %v1800_v27 = vmax.f32 %v1789_v50, %v1790_v13  ;;  %v1656_v43 = vmul.f32 %v6318_v24, %v7395_v21  ;;  %2495 = vmatpush1.bf16.msra.mxu0 %v5106_v52  ;;  %2661 = vmatmul.mubr.bf16.vlgmr.msra.gmra.mrb[40].mxu1 %v2020_v46  ;;  %v1622_v35 = vadd.f32 %v6364_v15, %v1600_v44  ;;  %v1858_v47 = vand.u32 7, %v6336_v40  ;;  %v5114_v46 = vld [vmem:[%s7303_s7 + $0x124] ss:$8 sps:$4 sm:$0xff]  }
 0x60c   :  { %v1806_v45 = vmax.f32 %v1750_v16, %v1799_v4  ;;  %v1623_v39 = vadd.f32 %v6355_v11, %v1601_v49  ;;  %2690 = vmatpush1.bf16.msra.mxu1 %v5106_v52  ;;  %v1624_v28 = vadd.f32 %v6364_v15, %v1602_v32  ;;  %v1635_v20 = vmax.f32 %v1621_v61, 0.0  ;;  %2496 = vmatprep.subr.bf16.mxu0 %v5111_v59  ;;  %v7399_v32 = vld [vmem:[#allocation14_spill] sm:$0xff] }
 0x60d   :  { %v1807_v48 = vmax.f32 %v1751_v5, %v1800_v27  ;;  %v1657_v33 = vmul.f32 %v6330_v57, %v7396_v31  ;;  %v1636_v6 = vmax.f32 %v1622_v35, 0.0  ;;  %v1658_v40 = vmul.f32 %v6318_v24, %v7397_v7  ;;  %2691 = vmatprep.subr.bf16.mxu1 %v5111_v59  ;;  %v7403_v31 = vld [vmem:[#allocation15_spill] sm:$0xff] }
 0x60e   :  { %v6487_v9 = vmul.f32 %v6327_v42, %v1806_v45  ;;  %v1637_v16 = vmax.f32 %v1623_v39, 0.0  ;;  %v1638_v0 = vmax.f32 %v1624_v28, 0.0  ;;  %v1659_v1 = vmul.f32 %v6330_v57, %v7398_v14  ;;  %v7402_v45 = vld [vmem:[#allocation16_spill] sm:$0xff] }
 0x60f   :  { %v6492_v30 = vmul.f32 %v6333_v2, %v1807_v48  ;;  %v1670_v52 = vadd.f32 %v1656_v43, %v6355_v11  ;;  %v1646_v5 = vmax.f32 %v1635_v20, %v1636_v6  ;;  %v1671_v60 = vadd.f32 %v1657_v33, %v6364_v15  ;;  %2497 = vmatpush1.bf16.msra.mxu0 %v5109_v41 }
 0x610   :  { %v1672_v42 = vadd.f32 %v1658_v40, %v6355_v11  ;;  %v1714_v10 = vmul.f32 %v6318_v24, %v5909_v53  ;;  %v1647_v63 = vmax.f32 %v1637_v16, %v1638_v0  ;;  %v1673_v50 = vadd.f32 %v1659_v1, %v6364_v15  ;;  %2692 = vmatpush1.bf16.msra.mxu1 %v5109_v41  ;;  %v5117_v53 = vld [vmem:[%s7303_s7 + $0x134] ss:$8 sps:$4 sm:$0xff]  }
 0x611   :  { %v6506_v25 = vpack.c.bf16 %v6492_v30, %v6487_v9  ;;  %v1684_v13 = vmax.f32 %v1670_v52, 0.0  ;;  %2498 = vmatprep.subr.bf16.mxu0 %v5114_v46  ;;  %v1685_v59 = vmax.f32 %v1671_v60, 0.0  ;;  %2693 = vmatprep.subr.bf16.mxu1 %v5114_v46  ;;  %v1715_v58 = vmul.f32 %v6330_v57, %v5911_v56 }
 0x612   :  { %v1686_v4 = vmax.f32 %v1672_v42, 0.0  ;;  %v1728_v44 = vadd.f32 %v1714_v10, %v6355_v11  ;;  %v1687_v12 = vmax.f32 %v1673_v50, 0.0  ;;  %v1763_v49 = vmul.f32 %v6318_v24, %v6051_v17  ;;  %v5115_v17 = vld [vmem:[%s7303_s7 + $0x130] ss:$8 sps:$4 sm:$0xff]   ;;  %v5118_v42 = vld [vmem:[%s7303_s7 + $0x140] ss:$8 sps:$4 sm:$0xff]  }
 0x613   :  { %2475 = vmatprep.mubr.bf16.mxu0 %v6506_v25  ;;  %v1764_v55 = vmul.f32 %v6330_v57, %v6053_v18  ;;  %v1603_v27 = vmul.f32 %v6318_v24, %v7399_v32  ;;  %vm6523_vm10 = vcmp.lt.s32.totalorder %v1858_v47, %v6302_v26  ;;  %v1695_v61 = vmax.f32 %v1684_v13, %v1685_v59  ;;  %v5120_v47 = vld [vmem:[%s7303_s7 + $0x144] ss:$8 sps:$4 sm:$0xff]  }
 0x614   :  { %2499 = vmatpush1.bf16.msra.mxu0 %v5112_v51  ;;  %v1729_v21 = vadd.f32 %v1715_v58, %v6364_v15  ;;  %v1742_v43 = vmax.f32 %v1728_v44, 0.0  ;;  %v1604_v35 = vmul.f32 %v6330_v57, %v7402_v45  ;;  %v1696_v18 = vmax.f32 %v1686_v4, %v1687_v12  ;;  %2694 = vmatpush1.bf16.msra.mxu1 %v5112_v51  ;;  %v5124_v45 = vld [vmem:[%s7303_s7 + $0x160] ss:$8 sps:$4 sm:$0xff]  }
 0x615   :  { %v1777_v39 = vadd.f32 %v1763_v49, %v6355_v11  ;;  %v1778_v26 = vadd.f32 %v1764_v55, %v6364_v15  ;;  %v1625_v41 = vadd.f32 %v6355_v11, %v1603_v27  ;;  %v1702_v48 = vmax.f32 %v1646_v5, %v1695_v61  ;;  %2500 = vmatprep.subr.bf16.mxu0 %v5117_v53 }
 0x616   :  { %v1743_v28 = vmax.f32 %v1729_v21, 0.0  ;;  %v1626_v20 = vadd.f32 %v6364_v15, %v1604_v35  ;;  %v1660_v33 = vmul.f32 %v6318_v24, %v7403_v31  ;;  %2695 = vmatprep.subr.bf16.mxu1 %v5117_v53  ;;  %v1703_v46 = vmax.f32 %v1647_v63, %v1696_v18  ;;  %v5123_v63 = vld [vmem:[%s7303_s7 + $0x154] ss:$8 sps:$4 sm:$0xff]   ;;  %v5121_v53 = vld [vmem:[%s7303_s7 + $0x150] ss:$8 sps:$4 sm:$0xff]  }
 0x617   :  { %v1791_v6 = vmax.f32 %v1777_v39, 0.0  ;;  %v1792_v16 = vmax.f32 %v1778_v26, 0.0  ;;  %v1639_v7 = vmax.f32 %v1625_v41, 0.0  ;;  %v1928_v40 = vmul.f32 %v6333_v2, %v1702_v48  ;;  %v7404_v18 = vld [vmem:[#allocation17_spill] sm:$0xff]  ;;  %v7405_v48 = vld [vmem:[#allocation18_spill] sm:$0xff] }
 0x618   :  { %v1752_v0 = vmax.f32 %v1742_v43, %v1743_v28  ;;  %v1640_v14 = vmax.f32 %v1626_v20, 0.0  ;;  %v1661_v1 = vmul.f32 %v6330_v57, %v5736_v54  ;;  %2501 = vmatpush1.bf16.msra.mxu0 %v5115_v17  ;;  %v6546_v52 = vmul.f32 %v6472_v3, %v1703_v46  ;;  %2696 = vmatpush1.bf16.msra.mxu1 %v5115_v17  ;;  %v5129_v41 = vld [vmem:[%s7303_s7 + $0x174] ss:$8 sps:$4 sm:$0xff]   ;;  %v7406_v46 = vld [vmem:[#allocation19_spill] sm:$0xff] }
 0x619   :  { %v1801_v5 = vmax.f32 %v1791_v6, %v1792_v16  ;;  %v1674_v60 = vadd.f32 %v1660_v33, %v6355_v11  ;;  %2502 = vmatprep.subr.bf16.mxu0 %v5120_v47  ;;  %v6553_v2 = vpack.c.bf16 %v1928_v40, %v6443_v8  ;;  %2697 = vmatprep.subr.bf16.mxu1 %v5120_v47 }
 0x61a   :  { %v1648_v51 = vmax.f32 %v1639_v7, %v1640_v14  ;;  %v1675_v10 = vadd.f32 %v1661_v1, %v6364_v15  ;;  %v6558_v54 = vpack.c.bf16 %v6487_v9, %v6405_v22  ;;  %v6564_v50 = vpack.c.bf16 %v6546_v52, %v1928_v40  ;;  %v5127_v14 = vld [vmem:[%s7303_s7 + $0x170] ss:$8 sps:$4 sm:$0xff]  }
 0x61b   :  { %v1808_v13 = vmax.f32 %v1752_v0, %v1801_v5  ;;  %v1688_v59 = vmax.f32 %v1674_v60, 0.0  ;;  %v2028_v8 = vpack.c.bf16 %v6546_v52, %v6546_v52  ;;  %2476 = vmatmul.mubr.bf16.gmra.mrb[44].mxu0 %v6553_v2  ;;  %v1716_v58 = vmul.f32 %v6318_v24, %v5913_v38  ;;  %v7407_v60 = vld [vmem:[#allocation20_spill] sm:$0xff] }
 0x61c   :  { %v1689_v4 = vmax.f32 %v1675_v10, 0.0  ;;  %v1717_v22 = vmul.f32 %v6330_v57, %v5921_v37  ;;  %v1765_v9 = vmul.f32 %v6318_v24, %v6055_v19  ;;  %2670 = vmatprep.mubr.bf16.mxu1 %v6564_v50  ;;  %2503 = vmatpush1.bf16.msra.mxu0 %v5118_v42  ;;  %v1766_v12 = vmul.f32 %v6330_v57, %v6063_v23 }
 0x61d   :  { %v6577_v44 = vmul.f32 %v6472_v3, %v1808_v13  ;;  %v1605_v38 = vmul.f32 %v6318_v24, %v5749_v36  ;;  %2671 = vmatmul.mubr.bf16.gmra.mrb[44].mxu1 %v6506_v25  ;;  %v4278_v19 = vsel %vm6523_vm10, 1.0, %v7371_v29  ;;  %2504 = vmatprep.subr.bf16.mxu0 %v5123_v63  ;;  %v5126_v3 = vld [vmem:[%s7303_s7 + $0x164] ss:$8 sps:$4 sm:$0xff]   ;;  %v1730_v49 = vadd.f32 %v1716_v58, %v6355_v11  ;;  %v7408_v13 = vld [vmem:[#allocation21_spill] sm:$0xff] }
 0x61e   :  { %v1697_v37 = vmax.f32 %v1688_v59, %v1689_v4  ;;  %v1731_v55 = vadd.f32 %v1717_v22, %v6364_v15  ;;  %2698 = vmatpush1.bf16.msra.mxu1 %v5118_v42  ;;  %v1779_v32 = vadd.f32 %v1765_v9, %v6355_v11  ;;  %v1780_v27 = vadd.f32 %v1766_v12, %v6364_v15 }
 0x61f   :  { %v2029_v23 = vpack.c.bf16 %v6577_v44, %v6577_v44  ;;  %v6599_v36 = vpack.c.bf16 %v6577_v44, %v6492_v30  ;;  %2699 = vmatprep.subr.bf16.mxu1 %v5123_v63  ;;  %v1744_v61 = vmax.f32 %v1730_v49, 0.0  ;;  %v1606_v43 = vmul.f32 %v6330_v57, %v5753_v34 }
 0x620   :  { %v1704_v56 = vmax.f32 %v1648_v51, %v1697_v37  ;;  %v1745_v21 = vmax.f32 %v1731_v55, 0.0  ;;  %2505 = vmatpush1.bf16.msra.mxu0 %v5121_v53  ;;  %v1793_v35 = vmax.f32 %v1779_v32, 0.0  ;;  %v1794_v30 = vmax.f32 %v1780_v27, 0.0 }
 0x621   :  { %2485 = vmatprep.mubr.bf16.mxu0 %v2029_v23  ;;  %v1627_v17 = vadd.f32 %v6355_v11, %v1605_v38  ;;  %v1662_v39 = vmul.f32 %v6318_v24, %v7404_v18  ;;  %2506 = vmatprep.subr.bf16.mxu0 %v5126_v3  ;;  %v1628_v47 = vadd.f32 %v6364_v15, %v1606_v43  ;;  %v4279_v37 = vsel %vm6305_vm4, 1.0, %v7371_v29  ;;  %v5142_v18 = vld [vmem:[%s7303_s7 + $0x1c0] ss:$8 sps:$4 sm:$0xff]  }
 0x622   :  { %v1930_v26 = vmul.f32 %v4278_v19, %v1704_v56  ;;  %v1753_v34 = vmax.f32 %v1744_v61, %v1745_v21  ;;  %v1663_v28 = vmul.f32 %v6330_v57, %v7405_v48  ;;  %2700 = vmatpush1.bf16.msra.mxu1 %v5121_v53  ;;  %v1802_v20 = vmax.f32 %v1793_v35, %v1794_v30  ;;  %v5133_v56 = vld [vmem:[%s7303_s7 + $0x190] ss:$8 sps:$4 sm:$0xff]   ;;  %v5138_v61 = vld [vmem:[%s7303_s7 + $0x1a4] ss:$8 sps:$4 sm:$0xff]   ;;  %v5141_v35 = vld [vmem:[%s7303_s7 + $0x1b4] ss:$8 sps:$4 sm:$0xff]  }
 0x623   :  { %v1641_v31 = vmax.f32 %v1627_v17, 0.0  ;;  %v1676_v33 = vadd.f32 %v1662_v39, %v6355_v11  ;;  %v1718_v6 = vmul.f32 %v6318_v24, %v7406_v46  ;;  %2486 = vmatmul.mubr.bf16.gmra.mrb[48].mxu0 %v2028_v8  ;;  %2701 = vmatprep.subr.bf16.mxu1 %v5126_v3  ;;  %v1642_v40 = vmax.f32 %v1628_v47, 0.0  ;;  %v7409_v8 = vld [vmem:[#allocation22_spill] sm:$0xff]  ;;  %v5144_v17 = vld [vmem:[%s7303_s7 + $0x1c4] ss:$8 sps:$4 sm:$0xff]  }
 0x624   :  { %v6620_v16 = vpack.c.bf16 %v1930_v26, %v1930_v26  ;;  %v6623_v7 = vpack.c.bf16 %v1930_v26, %v6546_v52  ;;  %v1677_v0 = vadd.f32 %v1663_v28, %v6364_v15  ;;  %2526 = vmatprep.mubr.bf16.mxu0 %v6558_v54  ;;  %2507 = vmatpush1.bf16.msra.mxu0 %v5124_v45  ;;  %v5132_v52 = vld [vmem:[%s7303_s7 + $0x184] ss:$8 sps:$4 sm:$0xff]   ;;  %v5139_v30 = vld [vmem:[%s7303_s7 + $0x1b0] ss:$8 sps:$4 sm:$0xff]   ;;  %v5147_v39 = vld [vmem:[%s7303_s7 + $0x1d4] ss:$8 sps:$4 sm:$0xff]  }
 0x625   :  { %v1809_v1 = vmax.f32 %v1753_v34, %v1802_v20  ;;  %v1690_v5 = vmax.f32 %v1676_v33, 0.0  ;;  %v1719_v42 = vmul.f32 %v6330_v57, %v7407_v60  ;;  %v1732_v51 = vadd.f32 %v1718_v6, %v6355_v11  ;;  %2508 = vmatprep.subr.bf16.mxu0 %v5129_v41  ;;  %v5145_v26 = vld [vmem:[%s7303_s7 + $0x1d0] ss:$8 sps:$4 sm:$0xff]   ;;  %v5148_v34 = vld [vmem:[%s7303_s7 + $0x1e0] ss:$8 sps:$4 sm:$0xff]  }
 0x626   :  { %2680 = vmatprep.mubr.bf16.mxu1 %v6620_v16  ;;  %v1649_v10 = vmax.f32 %v1641_v31, %v1642_v40  ;;  %v1691_v63 = vmax.f32 %v1677_v0, 0.0  ;;  %v1767_v59 = vmul.f32 %v6318_v24, %v7408_v13  ;;  %v1768_v4 = vmul.f32 %v6330_v57, %v7409_v8  ;;  %2702 = vmatpush1.bf16.msra.mxu1 %v5124_v45  ;;  %v5130_v24 = vld [vmem:[%s7303_s7 + $0x180] ss:$8 sps:$4 sm:$0xff]   ;;  %v5153_v47 = vld [vmem:[%s7303_s7 + $0x1f4] ss:$8 sps:$4 sm:$0xff]  }
 0x627   :  { %2681 = vmatmul.mubr.bf16.gmra.mrb[48].mxu1 %v2029_v23  ;;  %v6641_v58 = vmul.f32 %v4278_v19, %v1809_v1  ;;  %v1733_v22 = vadd.f32 %v1719_v42, %v6364_v15  ;;  %v1746_v9 = vmax.f32 %v1732_v51, 0.0  ;;  %2703 = vmatprep.subr.bf16.mxu1 %v5129_v41  ;;  %v5136_v45 = vld [vmem:[%s7303_s7 + $0x1a0] ss:$8 sps:$4 sm:$0xff]   ;;  %v5150_v41 = vld [vmem:[%s7303_s7 + $0x1e4] ss:$8 sps:$4 sm:$0xff]  }
 0x628   :  { %2721 = vmatprep.mubr.bf16.mxu1 %v6553_v2  ;;  %v1698_v53 = vmax.f32 %v1690_v5, %v1691_v63  ;;  %v1781_v12 = vadd.f32 %v1767_v59, %v6355_v11  ;;  %v1782_v38 = vadd.f32 %v1768_v4, %v6364_v15  ;;  %2509 = vmatpush1.bf16.msra.mxu0 %v5127_v14  ;;  %v5135_v11 = vld [vmem:[%s7303_s7 + $0x194] ss:$8 sps:$4 sm:$0xff]   ;;  %v5151_v48 = vld [vmem:[%s7303_s7 + $0x1f0] ss:$8 sps:$4 sm:$0xff]   ;;  %v5156_v28 = vld [vmem:[%s7303_s7 + $0x204] ss:$8 sps:$4 sm:$0xff]  }
 0x629   :  { %v2626_v19 = vpack.c.bf16 %v6641_v58, %v6577_v44  ;;  %v1747_v3 = vmax.f32 %v1733_v22, 0.0  ;;  %2510 = vmatprep.subr.bf16.mxu0 %v5132_v52  ;;  %v5154_v20 = vld [vmem:[%s7303_s7 + $0x200] ss:$8 sps:$4 sm:$0xff]   ;;  %v5159_v31 = vld [vmem:[%s7303_s7 + $0x214] ss:$8 sps:$4 sm:$0xff]   ;;  %v2031_v6 = vpack.c.bf16 %v6641_v58, %v6641_v58 }
 0x62a   :  { %v1705_v15 = vmax.f32 %v1649_v10, %v1698_v53  ;;  %v1795_v49 = vmax.f32 %v1781_v12, 0.0  ;;  %v1796_v55 = vmax.f32 %v1782_v38, 0.0  ;;  %2704 = vmatpush1.bf16.msra.mxu1 %v5127_v14  ;;  %v5157_v33 = vld [vmem:[%s7303_s7 + $0x210] ss:$8 sps:$4 sm:$0xff]   ;;  %v5162_v46 = vld [vmem:[%s7303_s7 + $0x224] ss:$8 sps:$4 sm:$0xff]  }
 0x62b   :  { %v1754_v23 = vmax.f32 %v1746_v9, %v1747_v3  ;;  %2705 = vmatprep.subr.bf16.mxu1 %v5132_v52  ;;  %v5163_v0 = vld [vmem:[%s7303_s7 + $0x230] ss:$8 sps:$4 sm:$0xff]   ;;  %v5168_v14 = vld [vmem:[%s7303_s7 + $0x244] ss:$8 sps:$4 sm:$0xff]   ;;  %v5171_v1 = vld [vmem:[%s7303_s7 + $0x254] ss:$8 sps:$4 sm:$0xff]  }
 0x62c   :  { %v6658_v32 = vmul.f32 %v4279_v37, %v1705_v15  ;;  %v1803_v27 = vmax.f32 %v1795_v49, %v1796_v55  ;;  %2511 = vmatpush1.bf16.msra.mxu0 %v5130_v24  ;;  %v5169_v5 = vld [vmem:[%s7303_s7 + $0x250] ss:$8 sps:$4 sm:$0xff]   ;;  %v5174_v60 = vld [vmem:[%s7303_s7 + $0x264] ss:$8 sps:$4 sm:$0xff]   ;;  %v5177_v42 = vld [vmem:[%s7303_s7 + $0x274] ss:$8 sps:$4 sm:$0xff]  }
 0x62d   :  { %2512 = vmatprep.subr.bf16.mxu0 %v5135_v11  ;;  %v5175_v51 = vld [vmem:[%s7303_s7 + $0x270] ss:$8 sps:$4 sm:$0xff]  }
 0x62e   :  { %v1810_v21 = vmax.f32 %v1754_v23, %v1803_v27  ;;  %2706 = vmatpush1.bf16.msra.mxu1 %v5130_v24  ;;  %v2032_v40 = vpack.c.bf16 %v6658_v32, %v6658_v32 }
 0x62f   :  { %2707 = vmatprep.subr.bf16.mxu1 %v5135_v11 }
 0x630   :  { %v6666_v43 = vmul.f32 %v4279_v37, %v1810_v21  ;;  %2513 = vmatpush1.bf16.msra.mxu0 %v5133_v56 }
 0x631   :  { %2514 = vmatprep.subr.bf16.mxu0 %v5138_v61 }
 0x632   :  { %2708 = vmatpush1.bf16.msra.mxu1 %v5133_v56  ;;  %v2627_v52 = vpack.c.bf16 %v6666_v43, %v6666_v43 }
 0x633   :  { %2709 = vmatprep.subr.bf16.mxu1 %v5138_v61 }
 0x634   :  { %2515 = vmatpush1.bf16.msra.mxu0 %v5136_v45 }
 0x635   :  { %2516 = vmatprep.subr.bf16.mxu0 %v5141_v35 }
 0x636   :  { %2710 = vmatpush1.bf16.msra.mxu1 %v5136_v45 }
 0x637   :  { %2711 = vmatprep.subr.bf16.mxu1 %v5141_v35 }
 0x638   :  { %2517 = vmatpush1.bf16.msra.mxu0 %v5139_v30 }
 0x639   :  { %2518 = vmatprep.subr.bf16.mxu0 %v5144_v17 }
 0x63a   :  { %2712 = vmatpush1.bf16.msra.mxu1 %v5139_v30 }
 0x63b   :  { %2713 = vmatprep.subr.bf16.mxu1 %v5144_v17 }
 0x63c   :  { %2519 = vmatpush1.bf16.msra.mxu0 %v5142_v18 }
 0x63d   :  { %2520 = vmatprep.subr.bf16.mxu0 %v5147_v39 }
 0x63e   :  { %2714 = vmatpush1.bf16.msra.mxu1 %v5142_v18 }
 0x63f   :  { %2715 = vmatprep.subr.bf16.mxu1 %v5147_v39 }
 0x640   :  { %2521 = vmatpush1.bf16.msra.mxu0 %v5145_v26 }
 0x641   :  { %2522 = vmatprep.subr.bf16.mxu0 %v5150_v41 }
 0x642   :  { %2716 = vmatpush1.bf16.msra.mxu1 %v5145_v26 }
 0x643   :  { %2717 = vmatprep.subr.bf16.mxu1 %v5150_v41 }
 0x644   :  { %2523 = vmatpush1.bf16.msra.mxu0 %v5148_v34 }
 0x645   :  { %2524 = vmatprep.subr.bf16.mxu0 %v5153_v47 }
 0x646   :  { %2718 = vmatpush1.bf16.msra.mxu1 %v5148_v34 }
 0x647   :  { %2719 = vmatprep.subr.bf16.mxu1 %v5153_v47 }
 0x648   :  { %2525 = vmatpush1.bf16.msra.mxu0 %v5151_v48 }
 0x649   :  { %2555 = vmatprep.subr.bf16.mxu0 %v5156_v28 }
 0x64a   :  { %2720 = vmatpush1.bf16.msra.mxu1 %v5151_v48 }
 0x64b   :  { %2527 = vmatmul.mubr.bf16.vlgmr.msra.gmra.mrb[40].mxu0 %v6453_v62  ;;  %2750 = vmatprep.subr.bf16.mxu1 %v5156_v28  ;;  %v5160_v62 = vld [vmem:[%s7303_s7 + $0x220] ss:$8 sps:$4 sm:$0xff]  }
 0x64c   :  { %2536 = vmatprep.mubr.bf16.mxu0 %v6599_v36  ;;  %2556 = vmatpush1.bf16.msra.mxu0 %v5154_v20 }
 0x64d   :  { %2722 = vmatmul.mubr.bf16.vlgmr.msra.gmra.mrb[40].mxu1 %v6558_v54  ;;  %2557 = vmatprep.subr.bf16.mxu0 %v5159_v31  ;;  %v5165_v54 = vld [vmem:[%s7303_s7 + $0x234] ss:$8 sps:$4 sm:$0xff]  }
 0x64e   :  { %2731 = vmatprep.mubr.bf16.mxu1 %v6623_v7  ;;  %2751 = vmatpush1.bf16.msra.mxu1 %v5154_v20 }
 0x64f   :  { %2752 = vmatprep.subr.bf16.mxu1 %v5159_v31 }
 0x650   :  { %2558 = vmatpush1.bf16.msra.mxu0 %v5157_v33 }
 0x651   :  { %2559 = vmatprep.subr.bf16.mxu0 %v5162_v46 }
 0x652   :  { %2753 = vmatpush1.bf16.msra.mxu1 %v5157_v33 }
 0x653   :  { %2537 = vmatmul.mubr.bf16.gmra.mrb[44].mxu0 %v6564_v50  ;;  %2754 = vmatprep.subr.bf16.mxu1 %v5162_v46  ;;  %v5166_v50 = vld [vmem:[%s7303_s7 + $0x240] ss:$8 sps:$4 sm:$0xff]  }
 0x654   :  { %2546 = vmatprep.mubr.bf16.mxu0 %v2031_v6  ;;  %2560 = vmatpush1.bf16.msra.mxu0 %v5160_v62 }
 0x655   :  { %2732 = vmatmul.mubr.bf16.gmra.mrb[44].mxu1 %v6599_v36  ;;  %2561 = vmatprep.subr.bf16.mxu0 %v5165_v54  ;;  %v5244_v36 = vmov 0  }
 0x656   :  { %2741 = vmatprep.mubr.bf16.mxu1 %v2032_v40  ;;  %2755 = vmatpush1.bf16.msra.mxu1 %v5160_v62 }
 0x657   :  { %2756 = vmatprep.subr.bf16.mxu1 %v5165_v54 }
 0x658   :  { %2562 = vmatpush1.bf16.msra.mxu0 %v5163_v0 }
 0x659   :  { %2563 = vmatprep.subr.bf16.mxu0 %v5168_v14 }
 0x65a   :  { %2757 = vmatpush1.bf16.msra.mxu1 %v5163_v0 }
 0x65b   :  { %2547 = vmatmul.mubr.bf16.gmra.mrb[48].mxu0 %v6620_v16  ;;  %2758 = vmatprep.subr.bf16.mxu1 %v5168_v14  ;;  %v5172_v16 = vld [vmem:[%s7303_s7 + $0x260] ss:$8 sps:$4 sm:$0xff]  }
 0x65c   :  { %2587 = vmatprep.mubr.bf16.mxu0 %v5244_v36  ;;  %2564 = vmatpush1.bf16.msra.mxu0 %v5166_v50 }
 0x65d   :  { %2742 = vmatmul.mubr.bf16.gmra.mrb[48].mxu1 %v2031_v6  ;;  %2565 = vmatprep.subr.bf16.mxu0 %v5171_v1 }
 0x65e   :  { %2759 = vmatpush1.bf16.msra.mxu1 %v5166_v50  ;;  %2782 = vmatprep.mubr.bf16.mxu1 %v5244_v36 }
 0x65f   :  { %2760 = vmatprep.subr.bf16.mxu1 %v5171_v1 }
 0x660   :  { %2566 = vmatpush1.bf16.msra.mxu0 %v5169_v5 }
 0x661   :  { %2567 = vmatprep.subr.bf16.mxu0 %v5174_v60 }
 0x662   :  { %2761 = vmatpush1.bf16.msra.mxu1 %v5169_v5 }
 0x663   :  { %2762 = vmatprep.subr.bf16.mxu1 %v5174_v60  ;;  %v7411_v60 = vmov 1.0  }
 0x664   :  { %2568 = vmatpush1.bf16.msra.mxu0 %v5172_v16 }
 0x665   :  { %2569 = vmatprep.subr.bf16.mxu0 %v5177_v42 }
 0x666   :  { %2763 = vmatpush1.bf16.msra.mxu1 %v5172_v16  ;;  %v3126_v16 = vld [vmem:[%s7307_s8 + $0x80] sm:$0xff] }
 0x667   :  { %2764 = vmatprep.subr.bf16.mxu1 %v5177_v42  ;;  %v3127_v42 = vld [vmem:[%s7307_s8 + $0x88] sm:$0xff] }
 0x668   :  { %2570 = vmatpush1.bf16.msra.mxu0 %v5175_v51 }
 0x66a   :  { %2765 = vmatpush1.bf16.msra.mxu1 %v5175_v51  ;;  %v3110_v51 = vld [vmem:[%s7307_s8] sm:$0xff] }
 0x66b   :  { %2588 = vmatmul.mubr.bf16.vlgmr.msra.gmra.mrb[40].mxu0 %v6553_v2 }
 0x66c   :  { %2597 = vmatprep.mubr.bf16.mxu0 %v5244_v36 }
 0x66d   :  { %2783 = vmatmul.mubr.bf16.vlgmr.msra.gmra.mrb[40].mxu1 %v6506_v25 }
 0x66e   :  { %2792 = vmatprep.mubr.bf16.mxu1 %v5244_v36 }
 0x673   :  { %2598 = vmatmul.mubr.bf16.gmra.mrb[44].mxu0 %v6623_v7 }
 0x674   :  { %2607 = vmatprep.mubr.bf16.mxu0 %v5244_v36 }
 0x675   :  { %2793 = vmatmul.mubr.bf16.gmra.mrb[44].mxu1 %v2626_v19 }
 0x676   :  { %2802 = vmatprep.mubr.bf16.mxu1 %v5244_v36 }
 0x67b   :  { %2608 = vmatmul.mubr.bf16.gmra.mrb[48].mxu0 %v2032_v40 }
 0x67c   :  { %2878 = vmatprep.mubr.f32.mxu0 %v7371_v29 }
 0x67d   :  { %2803 = vmatmul.mubr.bf16.gmra.mrb[48].mxu1 %v2627_v52  ;;  %v3111_v52 = vld [vmem:[%s7307_s8 + $0x8] sm:$0xff] }
 0x67e   :  { %3030 = vmatprep.mubr.f32.mxu1 %v7371_v29 }
 0x73e   :  { %v6770_v2 = vpop.f32.mrb[40].mxu0 }
 0x73f   :  { %v6772_v25 = vpop.f32.mrb[41].mxu0  ;;  %v6780_v44 = vmul.f32 %v6770_v2, %v6770_v2 }
 0x740   :  { %v6774_v7 = vpop.f32.mrb[40].mxu1  ;;  %v6776_v10 = vpop.f32.mrb[42].mxu0  ;;  %v6794_v4 = vmul.f32 %v6772_v25, %v6772_v25 }
 0x741   :  { %v6782_v63 = vpop.f32.mrb[41].mxu1  ;;  %v6786_v13 = vmul.f32 %v6776_v10, %v6776_v10  ;;  %v4866_v59 = vpack.c.bf16 %v6776_v10, %v6770_v2  ;;  %v6790_v8 = vpop.f32.mrb[43].mxu0  ;;  %v2956_v53 = vmul.f32 %v6774_v7, %v6774_v7 }
 0x742   :  { %v6796_v58 = vpop.f32.mrb[42].mxu1  ;;  %v6800_v22 = vmul.f32 %v6790_v8, %v6790_v8  ;;  %v4864_v9 = vpack.c.bf16 %v6790_v8, %v6772_v25  ;;  %v2957_v37 = vmul.f32 %v6782_v63, %v6782_v63 }
 0x743   :  { %v4882_v12 = vpack.c.bf16 %v6786_v13, %v6780_v44  ;;  %v4858_v38 = vpack.c.bf16 %v6796_v58, %v6774_v7  ;;  %v2958_v24 = vmul.f32 %v6796_v58, %v6796_v58  ;;  %v6812_v57 = vpop.f32.mrb[43].mxu1  ;;  %v4888_v13 = vpack.c.bf16 %v3127_v42, %v3126_v16  ;;  %v3140_v16 = vld [vmem:[%s7307_s8 + $0xf0] sm:$0xff]  ;;  %v3141_v42 = vld [vmem:[%s7307_s8 + $0xf8] sm:$0xff] }
 0x744   :  { %v4856_v19 = vpack.c.bf16 %v6812_v57, %v6782_v63  ;;  %v2959_v3 = vmul.f32 %v6812_v57, %v6812_v57  ;;  %v4880_v11 = vpack.c.bf16 %v6800_v22, %v6794_v4  ;;  %v3129_v4 = vld [vmem:[%s7307_s8 + $0x98] sm:$0xff]  ;;  %v4890_v22 = vpack.c.bf16 %v3111_v52, %v3110_v51 }
 0x745   :  { %v4874_v15 = vpack.c.bf16 %v2958_v24, %v2956_v53  ;;  %v3113_v53 = vld [vmem:[%s7307_s8 + $0x18] sm:$0xff]  ;;  %v3130_v24 = vld [vmem:[%s7307_s8 + $0xa0] sm:$0xff]  ;;  %v4916_v52 = vpack.c.bf16 %v3141_v42, %v3140_v16  ;;  %v5184_v16 = vld [vmem:[%s7309_s12 + $0xc8] sm:$0xff]  }
 0x746   :  { %4857 = vmatprep.subr.bf16.mxu0 %v4856_v19  ;;  %v6822_v49 = vpop.f32.mrb[44].mxu0  ;;  %v4872_v55 = vpack.c.bf16 %v2959_v3, %v2957_v37  ;;  %v3131_v37 = vld [vmem:[%s7307_s8 + $0xa8] sm:$0xff]  ;;  %v5186_v42 = vld [vmem:[%s7309_s12 + $0x50] sm:$0xff]  }
 0x747   :  { %4859 = vmatpush1.bf16.msra.mxu0 %v4858_v38  ;;  %v6824_v23 = vpop.f32.mrb[45].mxu0  ;;  %v2620_v56 = vmul.f32 %v6822_v49, %v6822_v49  ;;  %v4896_v3 = vpack.c.bf16 %v3131_v37, %v3130_v24  ;;  %v3296_v24 = vld [vmem:[%s7308_s9] sm:$0xff] }
 0x748   :  { %v6826_v32 = vpop.f32.mrb[44].mxu1  ;;  %4873 = vmatprep.subr.bf16.mxu1 %v4872_v55  ;;  %v6828_v27 = vpop.f32.mrb[46].mxu0  ;;  %v2621_v35 = vmul.f32 %v6824_v23, %v6824_v23  ;;  %v3132_v55 = vld [vmem:[%s7307_s8 + $0xb0] sm:$0xff] }
 0x749   :  { %v6832_v61 = vpop.f32.mrb[45].mxu1  ;;  %4875 = vmatpush1.bf16.msra.mxu1 %v4874_v15  ;;  %v2622_v21 = vmul.f32 %v6828_v27, %v6828_v27  ;;  %v4870_v43 = vpack.c.bf16 %v6828_v27, %v6822_v49  ;;  %v6838_v45 = vpop.f32.mrb[47].mxu0  ;;  %v2960_v39 = vmul.f32 %v6826_v32, %v6826_v32  ;;  %v3115_v15 = vld [vmem:[%s7307_s8 + $0x28] sm:$0xff] }
 0x74a   :  { %v6842_v30 = vpop.f32.mrb[46].mxu1  ;;  %v2623_v17 = vmul.f32 %v6838_v45, %v6838_v45  ;;  %v4868_v18 = vpack.c.bf16 %v6838_v45, %v6824_v23  ;;  %v2961_v48 = vmul.f32 %v6832_v61, %v6832_v61 }
 0x74b   :  { %v4886_v26 = vpack.c.bf16 %v2622_v21, %v2620_v56  ;;  %v4862_v41 = vpack.c.bf16 %v6842_v30, %v6826_v32  ;;  %v2962_v34 = vmul.f32 %v6842_v30, %v6842_v30  ;;  %v6854_v47 = vpop.f32.mrb[47].mxu1  ;;  %v3133_v56 = vld [vmem:[%s7307_s8 + $0xb8] sm:$0xff] }
 0x74c   :  { %v4860_v28 = vpack.c.bf16 %v6854_v47, %v6832_v61  ;;  %v2963_v20 = vmul.f32 %v6854_v47, %v6854_v47  ;;  %v4884_v31 = vpack.c.bf16 %v2623_v17, %v2621_v35  ;;  %v3116_v35 = vld [vmem:[%s7307_s8 + $0x30] sm:$0xff]  ;;  %v3117_v17 = vld [vmem:[%s7307_s8 + $0x38] sm:$0xff] }
 0x74d   :  { %v4878_v33 = vpack.c.bf16 %v2962_v34, %v2960_v39  ;;  %v3135_v39 = vld [vmem:[%s7307_s8 + $0xc8] sm:$0xff]  ;;  %v3118_v34 = vld [vmem:[%s7307_s8 + $0x40] sm:$0xff] }
 0x74e   :  { %4861 = vmatprep.subr.bf16.mxu0 %v4860_v28  ;;  %v6862_v46 = vpop.f32.mrb[48].mxu0  ;;  %v4876_v62 = vpack.c.bf16 %v2963_v20, %v2961_v48  ;;  %v3119_v48 = vld [vmem:[%s7307_s8 + $0x48] sm:$0xff]  ;;  %v3136_v28 = vld [vmem:[%s7307_s8 + $0xd0] sm:$0xff]  ;;  %v3137_v20 = vld [vmem:[%s7307_s8 + $0xd8] sm:$0xff] }
 0x74f   :  { %4863 = vmatpush1.bf16.msra.mxu0 %v4862_v41  ;;  %v6864_v6 = vpop.f32.mrb[49].mxu0 }
 0x750   :  { %v6866_v54 = vpop.f32.mrb[48].mxu1  ;;  %4877 = vmatprep.subr.bf16.mxu1 %v4876_v62  ;;  %v2613_v40 = vpop.f32.mrb[50].mxu0  ;;  %v2625_v44 = vmul.f32 %v6864_v6, %v6864_v6  ;;  %v3120_v62 = vld [vmem:[%s7307_s8 + $0x50] sm:$0xff] }
 0x751   :  { %v6868_v0 = vpop.f32.mrb[49].mxu1  ;;  %4879 = vmatpush1.bf16.msra.mxu1 %v4878_v33  ;;  %v2614_v14 = vpop.f32.mrb[51].mxu0  ;;  %v2964_v36 = vmul.f32 %v6866_v54, %v6866_v54  ;;  %v4908_v33 = vpack.c.bf16 %v3137_v20, %v3136_v28  ;;  %v3121_v40 = vld [vmem:[%s7307_s8 + $0x58] sm:$0xff] }
 0x752   :  { %v2965_v50 = vmul.f32 %v6868_v0, %v6868_v0  ;;  %v2808_v1 = vpop.f32.mrb[50].mxu1  ;;  %2822 = vmatprep.subr.mxu0 %v6868_v0  ;;  %v3138_v14 = vld [vmem:[%s7307_s8 + $0xe0] sm:$0xff] }
 0x753   :  { %v2809_v5 = vpop.f32.mrb[51].mxu1  ;;  %2823 = vmatpush1.msra.mxu0 %v6866_v54  ;;  %v4910_v1 = vpack.c.bf16 %v3121_v40, %v3120_v62  ;;  %v5179_v62 = vld [vmem:[%s7309_s12] sm:$0xff]  }
 0x754   :  { %4865 = vmatprep.subr.bf16.mxu0 %v4864_v9  ;;  %2974 = vmatprep.subr.mxu1 %v2965_v50  ;;  %v3112_v9 = vld [vmem:[%s7307_s8 + $0x10] sm:$0xff]  ;;  %v3139_v50 = vld [vmem:[%s7307_s8 + $0xe8] sm:$0xff]  ;;  %v3122_v5 = vld [vmem:[%s7307_s8 + $0x60] sm:$0xff] }
 0x755   :  { %4360 = vmatmul.mubr.msk.f32.vlgmr.msra.gmra.mrb[38].mxu0 %vm2811_vm11, %v7411_v60  ;;  %2975 = vmatpush1.msra.mxu1 %v2964_v36  ;;  %v4894_v19 = vpack.c.bf16 %v3113_v53, %v3112_v9  ;;  %v4912_v36 = vpack.c.bf16 %v3139_v50, %v3138_v14  ;;  %v5182_v14 = vld [vmem:[%s7309_s12 + $0x48] sm:$0xff]   ;;  %v3293_v50 = vld [vmem:[%s7311_s11] sm:$0x1] }
 0x756   :  { %4867 = vmatpush1.bf16.msra.mxu0 %v4866_v59  ;;  %4881 = vmatprep.subr.bf16.mxu1 %v4880_v11  ;;  %v3128_v59 = vld [vmem:[%s7307_s8 + $0x90] sm:$0xff]  ;;  %v3114_v11 = vld [vmem:[%s7307_s8 + $0x20] sm:$0xff] }
 0x757   :  { %4869 = vmatprep.subr.bf16.mxu0 %v4868_v18  ;;  %4362 = vmatmul.mubr.msk.f32.vlgmr.msra.gmra.mrb[52].mxu1 %vm2811_vm11, %v7411_v60  ;;  %v4892_v38 = vpack.c.bf16 %v3129_v4, %v3128_v59  ;;  %v4898_v21 = vpack.c.bf16 %v3115_v15, %v3114_v11  ;;  %v3134_v18 = vld [vmem:[%s7307_s8 + $0xc0] sm:$0xff] }
 0x758   :  { %4883 = vmatpush1.bf16.msra.mxu1 %v4882_v12  ;;  %2949 = vmatprep.mubr.f32.mxu0 %v7371_v29  ;;  %v2624_v12 = vmul.f32 %v6862_v46, %v6862_v46  ;;  %v4904_v41 = vpack.c.bf16 %v3135_v39, %v3134_v18  ;;  %v5178_v11 = vld [vmem:[%s7309_s12 + $0x40] sm:$0xff]  }
 0x759   :  { %4885 = vmatprep.subr.bf16.mxu1 %v4884_v31  ;;  %3101 = vmatprep.mubr.f32.mxu1 %v7371_v29  ;;  %v4906_v31 = vpack.c.bf16 %v3119_v48, %v3118_v34  ;;  %v5180_v15 = vld [vmem:[%s7309_s12 + $0xc0] sm:$0xff]  }
 0x75a   :  { %4871 = vmatpush1.bf16.msra.mxu0 %v4870_v43  ;;  %v4900_v43 = vpack.c.bf16 %v3133_v56, %v3132_v55 }
 0x75b   :  { %2893 = vmatprep.subr.mxu0 %v6864_v6 }
 0x75c   :  { %4887 = vmatpush1.bf16.msra.mxu1 %v4886_v26  ;;  %v4902_v26 = vpack.c.bf16 %v3117_v17, %v3116_v35 }
 0x75d   :  { %3045 = vmatprep.subr.mxu1 %v2625_v44  ;;  %v3124_v44 = vld [vmem:[%s7307_s8 + $0x70] sm:$0xff] }
 0x75e   :  { %2894 = vmatpush1.msra.mxu0 %v6862_v46 }
 0x75f   :  { %4361 = vmatmul.mubr.msk.f32.vlgmr.msra.gmra.mrb[38].mxu0 %vm2811_vm11, %v7411_v60  ;;  %4889 = vmatprep.subr.bf16.mxu0 %v4888_v13 }
 0x760   :  { %3046 = vmatpush1.msra.mxu1 %v2624_v12  ;;  %4891 = vmatpush3.bf16.msra.mxu0 %v4890_v22  ;;  %v3297_v12 = vld [vmem:[%s7308_s9 + $0x8] sm:$0xff] }
 0x761   :  { %4363 = vmatmul.mubr.msk.f32.vlgmr.msra.gmra.mrb[52].mxu1 %vm2811_vm11, %v7411_v60  ;;  %4921 = vmatprep.subr.bf16.mxu1 %v4888_v13  ;;  %v3123_v60 = vld [vmem:[%s7307_s8 + $0x68] sm:$0xff]  ;;  %v3125_v13 = vld [vmem:[%s7307_s8 + $0x78] sm:$0xff] }
 0x762   :  { %4923 = vmatpush3.bf16.msra.mxu1 %v4890_v22  ;;  %4893 = vmatprep.subr.bf16.mxu0 %v4892_v38  ;;  %v4914_v51 = vpack.c.bf16 %v3123_v60, %v3122_v5  ;;  %v4918_v59 = vpack.c.bf16 %v3125_v13, %v3124_v44  ;;  %v5183_v5 = vld [vmem:[%s7309_s12 + $0x8] sm:$0xff]   ;;  %v5188_v44 = vld [vmem:[%s7309_s12 + $0xd0] sm:$0xff]   ;;  %v5190_v13 = vld [vmem:[%s7309_s12 + $0x58] sm:$0xff]  }
 0x763   :  { %4925 = vmatprep.subr.bf16.mxu1 %v4892_v38  ;;  %v3299_v38 = vld [vmem:[%s7308_s9 + $0x18] sm:$0xff] }
 0x764   :  { %4895 = vmatpush3.bf16.msra.mxu0 %v4894_v19  ;;  %v4952_v37 = vpack.c.bf16 %v3299_v38, %v3297_v12  ;;  %v5195_v12 = vld [vmem:[%s7309_s12 + $0x20] sm:$0xff]  }
 0x765   :  { %4897 = vmatprep.subr.bf16.mxu0 %v4896_v3  ;;  %v5196_v38 = vld [vmem:[%s7309_s12 + $0xe0] sm:$0xff]  }
 0x766   :  { %4927 = vmatpush3.bf16.msra.mxu1 %v4894_v19  ;;  %v3298_v19 = vld [vmem:[%s7308_s9 + $0x10] sm:$0xff]  ;;  %s3109_s9 = scvt.s32.f32 %s3108_s19 }
 0x767   :  { %4929 = vmatprep.subr.bf16.mxu1 %v4896_v3  ;;  %v4954_v3 = vpack.c.bf16 %v3298_v19, %v3296_v24  ;;  %v5197_v24 = vld [vmem:[%s7309_s12 + $0xa0] sm:$0xff]   ;;  %v5199_v19 = vld [vmem:[%s7309_s12 + $0x28] sm:$0xff]  }
 0x768   :  { %4899 = vmatpush3.bf16.msra.mxu0 %v4898_v21  ;;  %v3282_v55 = vstv %s3109_s9 }
 0x769   :  { %4901 = vmatprep.subr.bf16.mxu0 %v4900_v43  ;;  %5238 = vrcp.f32 %v3282_v55  ;;  %v5204_v55 = vld [vmem:[%s7309_s12 + $0xf0] sm:$0xff]  }
 0x76a   :  { %4931 = vmatpush3.bf16.msra.mxu1 %v4898_v21 }
 0x76b   :  { %4933 = vmatprep.subr.bf16.mxu1 %v4900_v43 }
 0x76c   :  { %4903 = vmatpush3.bf16.msra.mxu0 %v4902_v26 }
 0x76d   :  { %4905 = vmatprep.subr.bf16.mxu0 %v4904_v41 }
 0x76e   :  { %4935 = vmatpush3.bf16.msra.mxu1 %v4902_v26 }
 0x76f   :  { %4937 = vmatprep.subr.bf16.mxu1 %v4904_v41 }
 0x770   :  { %4907 = vmatpush3.bf16.msra.mxu0 %v4906_v31 }
 0x771   :  { %4909 = vmatprep.subr.bf16.mxu0 %v4908_v33 }
 0x772   :  { %4939 = vmatpush3.bf16.msra.mxu1 %v4906_v31  ;;  %v3291_v31 = vld [vmem:[%s7310_s10] sm:$0x1] }
 0x773   :  { %4941 = vmatprep.subr.bf16.mxu1 %v4908_v33  ;;  %v5239_v21 = vpop.eup %5238 }
 0x774   :  { %4911 = vmatpush3.bf16.msra.mxu0 %v4910_v1 }
 0x775   :  { %4913 = vmatprep.subr.bf16.mxu0 %v4912_v36 }
 0x776   :  { %4943 = vmatpush3.bf16.msra.mxu1 %v4910_v1 }
 0x777   :  { %4945 = vmatprep.subr.bf16.mxu1 %v4912_v36  ;;  %v5181_v36 = vld [vmem:[%s7309_s12 + $0x80] sm:$0xff]  }
 0x778   :  { %4915 = vmatpush3.bf16.msra.mxu0 %v4914_v51 }
 0x779   :  { %4917 = vmatprep.subr.bf16.mxu0 %v4916_v52 }
 0x77a   :  { %4947 = vmatpush3.bf16.msra.mxu1 %v4914_v51  ;;  %v5185_v51 = vld [vmem:[%s7309_s12 + $0x88] sm:$0xff]  }
 0x77b   :  { %4949 = vmatprep.subr.bf16.mxu1 %v4916_v52  ;;  %v5187_v52 = vld [vmem:[%s7309_s12 + $0x10] sm:$0xff]  }
 0x77c   :  { %4919 = vmatpush3.bf16.msra.mxu0 %v4918_v59 }
 0x77d   :  { %4953 = vmatprep.subr.bf16.mxu0 %v4952_v37 }
 0x77e   :  { %4951 = vmatpush3.bf16.msra.mxu1 %v4918_v59  ;;  %v5189_v59 = vld [vmem:[%s7309_s12 + $0x90] sm:$0xff]  }
 0x77f   :  { %4957 = vmatprep.subr.bf16.mxu1 %v4952_v37  ;;  %v5198_v37 = vld [vmem:[%s7309_s12 + $0x68] sm:$0xff]  }
 0x832   :  { %v2951_v4 = vpop.f32.mrb[38].mxu0 }
 0x833   :  { %v2953_v22 = vpop.f32.mrb[39].mxu0 }
 0x834   :  { %v3103_v9 = vpop.f32.mrb[52].mxu1  ;;  %3206 = vmatprep.mubr.f32.mxu0 %v2953_v22  ;;  %v5192_v22 = vld [vmem:[%s7309_s12 + $0xd8] sm:$0xff]  }
 0x835   :  { %v3105_v53 = vpop.f32.mrb[53].mxu1  ;;  %3207 = vmatmul.mubr.f32.vlgmr.msra.gmra.mrb[52].mxu0 %v2951_v4  ;;  %v5191_v4 = vld [vmem:[%s7309_s12 + $0x18] sm:$0xff]  }
 0x836   :  { %3276 = vmatprep.mubr.f32.mxu1 %v3105_v53  ;;  %3368 = vmatprep.mubr.f32.mxu0 %v7371_v29  ;;  %v5194_v53 = vld [vmem:[%s7309_s12 + $0x60] sm:$0xff]  }
 0x837   :  { %3277 = vmatmul.mubr.f32.vlgmr.msra.gmra.mrb[54].mxu1 %v3103_v9  ;;  %4955 = vmatpush1.bf16.msra.mxu0 %v4954_v3  ;;  %v5193_v9 = vld [vmem:[%s7309_s12 + $0x98] sm:$0xff]  }
 0x838   :  { %3442 = vmatprep.mubr.f32.mxu1 %v7371_v29  ;;  %4959 = vmatpush1.bf16.msra.mxu1 %v4954_v3  ;;  %v5200_v3 = vld [vmem:[%s7309_s12 + $0xe8] sm:$0xff]  }
 0x839   :  { %4565 = vmatprep.subr.bf16.mxu0 %v5178_v11  ;;  %4587 = vmatprep.subr.bf16.mxu1 %v5180_v15  ;;  %v5201_v11 = vld [vmem:[%s7309_s12 + $0xa8] sm:$0xff]   ;;  %v5202_v15 = vld [vmem:[%s7309_s12 + $0x70] sm:$0xff]  }
 0x908   :  { %v4527_v56 = vpop.f32.mrb[52].mxu0 }
 0x909   :  { %v4528_v43 = vpop.f32.mrb[53].mxu0 }
 0x90a   :  { %v4529_v35 = vadd.f32 %v4528_v43, %v4527_v56  ;;  %v4562_v17 = vpop.f32.mrb[54].mxu1  ;;  %v5203_v56 = vld [vmem:[%s7309_s12 + $0x30] sm:$0xff]  }
 0x90b   :  { %v4563_v18 = vpop.f32.mrb[55].mxu1  ;;  %v5205_v43 = vld [vmem:[%s7309_s12 + $0xb0] sm:$0xff]  }
 0x90c   :  { %v3284_v39 = vmul.f32 %v5239_v21, %v4529_v35  ;;  %v4564_v26 = vadd.f32 %v4563_v18, %v4562_v17  ;;  %v5208_v35 = vld [vmem:[%s7309_s12 + $0xf8] sm:$0xff]  }
 0x90d   :  { %v5207_v17 = vld [vmem:[%s7309_s12 + $0x38] sm:$0xff]  }
 0x90e   :  { %v3286_v41 = vmul.f32 %v3284_v39, %v3284_v39  ;;  %v3285_v34 = vmul.f32 %v5239_v21, %v4564_v26  ;;  %v5206_v21 = vld [vmem:[%s7309_s12 + $0x78] sm:$0xff]   ;;  %v7412_v26 = vld [vmem:[#allocation24_spill] sm:$0xff] }
 0x90f   :  { %v5209_v18 = vld [vmem:[%s7309_s12 + $0xb8] sm:$0xff]  }
 0x910   :  { %v3287_v48 = vsub.f32 %v3285_v34, %v3286_v41 }
 0x912   :  { %v3288_v28 = vmax.f32 %v3287_v48, 0.0 }
 0x914   :  { %v3289_v20 = vadd.f32 1e-05, %v3288_v28 }
 0x916   :  { %5240 = vrsqrt.f32 %v3289_v20 }
 0x920   :  { %v5241_v33 = vpop.eup %5240 }
 0x921   :  { %v3292_v40 = vmul.f32 %v5241_v33, %v3291_v31 }
 0x923   :  { %4364 = vmatmul.mubr.msk.f32.vlgmr.msra.gmra.mrb[54].mxu0 %vm3300_vm12, %v3292_v40  ;;  %v3294_v1 = vmul.f32 %v3292_v40, %v3284_v39 }
 0x924   :  { %4566 = vmatpush3.bf16.msra.mxu0 %v5179_v62 }
 0x925   :  { %v3295_v60 = vsub.f32 %v3293_v50, %v3294_v1  ;;  %4567 = vmatprep.subr.bf16.mxu0 %v5182_v14 }
 0x927   :  { %4365 = vmatmul.mubr.msk.f32.vlgmr.msra.gmra.mrb[56].mxu1 %vm3300_vm12, %v3295_v60 }
 0x928   :  { %4588 = vmatpush3.bf16.msra.mxu1 %v5181_v36  ;;  %4568 = vmatpush3.bf16.msra.mxu0 %v5183_v5 }
 0x929   :  { %4589 = vmatprep.subr.bf16.mxu1 %v5184_v16  ;;  %4569 = vmatprep.subr.bf16.mxu0 %v5186_v42 }
 0x92c   :  { %4590 = vmatpush3.bf16.msra.mxu1 %v5185_v51  ;;  %4570 = vmatpush3.bf16.msra.mxu0 %v5187_v52 }
 0x92d   :  { %4591 = vmatprep.subr.bf16.mxu1 %v5188_v44  ;;  %4571 = vmatprep.subr.bf16.mxu0 %v5190_v13 }
 0x930   :  { %4592 = vmatpush3.bf16.msra.mxu1 %v5189_v59  ;;  %4572 = vmatpush3.bf16.msra.mxu0 %v5191_v4 }
 0x931   :  { %4593 = vmatprep.subr.bf16.mxu1 %v5192_v22  ;;  %4573 = vmatprep.subr.bf16.mxu0 %v5194_v53 }
 0x934   :  { %4594 = vmatpush3.bf16.msra.mxu1 %v5193_v9  ;;  %4574 = vmatpush3.bf16.msra.mxu0 %v5195_v12 }
 0x935   :  { %4595 = vmatprep.subr.bf16.mxu1 %v5196_v38  ;;  %4575 = vmatprep.subr.bf16.mxu0 %v5198_v37 }
 0x938   :  { %4596 = vmatpush3.bf16.msra.mxu1 %v5197_v24  ;;  %4576 = vmatpush3.bf16.msra.mxu0 %v5199_v19 }
 0x939   :  { %4597 = vmatprep.subr.bf16.mxu1 %v5200_v3  ;;  %4577 = vmatprep.subr.bf16.mxu0 %v5202_v15 }
 0x93c   :  { %4598 = vmatpush3.bf16.msra.mxu1 %v5201_v11  ;;  %4578 = vmatpush3.bf16.msra.mxu0 %v5203_v56 }
 0x93d   :  { %4599 = vmatprep.subr.bf16.mxu1 %v5204_v55  ;;  %4579 = vmatprep.subr.bf16.mxu0 %v5206_v21 }
 0x940   :  { %4600 = vmatpush3.bf16.msra.mxu1 %v5205_v43  ;;  %4580 = vmatpush3.bf16.msra.mxu0 %v5207_v17 }
 0x941   :  { %4601 = vmatprep.subr.bf16.mxu1 %v5208_v35  ;;  %4636 = vmatprep.subr.bf16.mxu0 %v7371_v29 }
 0x944   :  { %4602 = vmatpush3.bf16.msra.mxu1 %v5209_v18 }
 0x945   :  { %4656 = vmatprep.subr.bf16.mxu1 %v7371_v29 }
 0x9f6   :  { %v3370_v39 = vpop.f32.mrb[54].mxu0 }
 0x9f7   :  { %v7116_v41 = vrot.slane %v3370_v39, %v7412_v26  ;;  %v3372_v34 = vpop.f32.mrb[55].mxu0 }
 0x9f8   :  { %v7119_v48 = vrot.slane %v3372_v34, %v7412_v26 }
 0x9f9   :  { %v3459_v28 = vmul.f32 %v7116_v41, %v6776_v10  ;;  %v3502_v20 = vmul.f32 %v7116_v41, %v6796_v58  ;;  %v3463_v31 = vmul.f32 %v7116_v41, %v6828_v27  ;;  %v3506_v33 = vmul.f32 %v7116_v41, %v6842_v30 }
 0x9fa   :  { %v3444_v62 = vpop.f32.mrb[56].mxu1  ;;  %v3460_v40 = vmul.f32 %v7119_v48, %v6790_v8  ;;  %v3503_v14 = vmul.f32 %v7119_v48, %v6812_v57  ;;  %v3464_v50 = vmul.f32 %v7119_v48, %v6838_v45  ;;  %v3507_v10 = vmul.f32 %v7119_v48, %v6854_v47 }
 0x9fb   :  { %v7138_v58 = vrot.slane %v3444_v62, %v7412_v26  ;;  %v3446_v27 = vpop.f32.mrb[57].mxu1  ;;  %v3457_v30 = vmul.f32 %v7116_v41, %v6770_v2  ;;  %v3458_v1 = vmul.f32 %v7119_v48, %v6772_v25  ;;  %v3500_v8 = vmul.f32 %v7116_v41, %v6774_v7 }
 0x9fc   :  { %v7147_v57 = vrot.slane %v3446_v27, %v7412_v26  ;;  %v3501_v45 = vmul.f32 %v7119_v48, %v6782_v63  ;;  %v3461_v47 = vmul.f32 %v7116_v41, %v6822_v49  ;;  %v3462_v36 = vmul.f32 %v7119_v48, %v6824_v23 }
 0x9fd   :  { %v3477_v2 = vadd.f32 %v7138_v58, %v3459_v28  ;;  %v3512_v5 = vadd.f32 %v3502_v20, %v7138_v58  ;;  %v3481_v25 = vadd.f32 %v7138_v58, %v3463_v31  ;;  %v3516_v7 = vadd.f32 %v3506_v33, %v7138_v58 }
 0x9fe   :  { %v3478_v60 = vadd.f32 %v7147_v57, %v3460_v40  ;;  %v3513_v16 = vadd.f32 %v3503_v14, %v7147_v57  ;;  %v3482_v63 = vadd.f32 %v7147_v57, %v3464_v50  ;;  %v3517_v42 = vadd.f32 %v3507_v10, %v7147_v57 }
 0x9ff   :  { %v3487_v49 = vmax.f32 %v3477_v2, 0.0  ;;  %v3522_v51 = vmax.f32 %v3512_v5, 0.0  ;;  %v3491_v52 = vmax.f32 %v3481_v25, 0.0  ;;  %v3526_v23 = vmax.f32 %v3516_v7, 0.0  ;;  %v5212_v7 = vld [vmem:[%s7309_s12 + $0x110] sm:$0xff]  }
 0xa00   :  { %v3488_v44 = vmax.f32 %v3478_v60, 0.0  ;;  %v3523_v13 = vmax.f32 %v3513_v16, 0.0  ;;  %v3492_v59 = vmax.f32 %v3482_v63, 0.0  ;;  %v3527_v4 = vmax.f32 %v3517_v42, 0.0  ;;  %v5214_v63 = vld [vmem:[%s7309_s12 + $0x120] sm:$0xff]   ;;  %v5215_v42 = vld [vmem:[%s7309_s12 + $0x128] sm:$0xff]  }
 0xa01   :  { %v3475_v22 = vadd.f32 %v7138_v58, %v3457_v30  ;;  %v3476_v9 = vadd.f32 %v7147_v57, %v3458_v1  ;;  %v3510_v53 = vadd.f32 %v3500_v8, %v7138_v58  ;;  %v3511_v12 = vadd.f32 %v3501_v45, %v7147_v57 }
 0xa02   :  { %v3496_v38 = vmax.f32 %v3487_v49, %v3488_v44  ;;  %v3531_v24 = vmax.f32 %v3522_v51, %v3523_v13  ;;  %v3498_v37 = vmax.f32 %v3491_v52, %v3492_v59  ;;  %v3533_v19 = vmax.f32 %v3526_v23, %v3527_v4  ;;  %v5216_v49 = vld [vmem:[%s7309_s12 + $0x130] sm:$0xff]   ;;  %v5217_v51 = vld [vmem:[%s7309_s12 + $0x138] sm:$0xff]   ;;  %v5218_v23 = vld [vmem:[%s7312_s14] sm:$0xff]  }
 0xa03   :  { %v3485_v3 = vmax.f32 %v3475_v22, 0.0  ;;  %v3486_v11 = vmax.f32 %v3476_v9, 0.0  ;;  %v3520_v15 = vmax.f32 %v3510_v53, 0.0  ;;  %v3521_v55 = vmax.f32 %v3511_v12, 0.0  ;;  %v5219_v44 = vld [vmem:[%s7312_s14 + $0x8] sm:$0xff]   ;;  %v5220_v13 = vld [vmem:[%s7312_s14 + $0x10] sm:$0xff]  }
 0xa04   :  { %v3536_v56 = vmax.f32 %v3496_v38, %v3531_v24  ;;  %v3538_v21 = vmax.f32 %v3498_v37, %v3533_v19  ;;  %v3479_v43 = vadd.f32 %v7138_v58, %v3461_v47  ;;  %v3480_v35 = vadd.f32 %v7147_v57, %v3462_v36  ;;  %v5221_v59 = vld [vmem:[%s7312_s14 + $0x18] sm:$0xff]   ;;  %v5222_v4 = vld [vmem:[%s7312_s14 + $0x20] sm:$0xff]   ;;  %v5223_v22 = vld [vmem:[%s7312_s14 + $0x28] sm:$0xff]  }
 0xa05   :  { %v3495_v17 = vmax.f32 %v3485_v3, %v3486_v11  ;;  %v3530_v18 = vmax.f32 %v3520_v15, %v3521_v55  ;;  %v3504_v39 = vmul.f32 %v7116_v41, %v6826_v32  ;;  %v3505_v26 = vmul.f32 %v7119_v48, %v6832_v61  ;;  %v5210_v32 = vld [vmem:[%s7309_s12 + $0x100] sm:$0xff]   ;;  %v5224_v9 = vld [vmem:[%s7312_s14 + $0x30] sm:$0xff]   ;;  %v5225_v53 = vld [vmem:[%s7312_s14 + $0x38] sm:$0xff]  }
 0xa06   :  { %v3541_v34 = vpack.c.bf16 %v3536_v56, %v3536_v56  ;;  %v3543_v28 = vpack.c.bf16 %v3538_v21, %v3538_v21  ;;  %v3489_v20 = vmax.f32 %v3479_v43, 0.0  ;;  %v3490_v31 = vmax.f32 %v3480_v35, 0.0  ;;  %v5226_v12 = vld [vmem:[%s7313_s16] sm:$0xff]   ;;  %v5227_v38 = vld [vmem:[%s7313_s16 + $0x8] sm:$0xff]   ;;  %v5228_v24 = vld [vmem:[%s7313_s16 + $0x10] sm:$0xff]  }
 0xa07   :  { %v3535_v33 = vmax.f32 %v3495_v17, %v3530_v18  ;;  %v3514_v62 = vadd.f32 %v3504_v39, %v7138_v58  ;;  %v3515_v40 = vadd.f32 %v3505_v26, %v7147_v57  ;;  %v3465_v14 = vmul.f32 %v7116_v41, %v6862_v46  ;;  %v5229_v37 = vld [vmem:[%s7313_s16 + $0x18] sm:$0xff]   ;;  %v5230_v19 = vld [vmem:[%s7313_s16 + $0x20] sm:$0xff]   ;;  %v5231_v3 = vld [vmem:[%s7313_s16 + $0x28] sm:$0xff]  }
 0xa08   :  { %3904 = vmatprep.mubr.bf16.mxu0 %v3541_v34  ;;  %3944 = vmatprep.mubr.bf16.mxu1 %v3543_v28  ;;  %v3497_v50 = vmax.f32 %v3489_v20, %v3490_v31  ;;  %v3466_v61 = vmul.f32 %v7119_v48, %v6864_v6  ;;  %v3508_v10 = vmul.f32 %v7116_v41, %v6866_v54  ;;  %v5211_v6 = vld [vmem:[%s7309_s12 + $0x108] sm:$0xff]   ;;  %v4366_v21 = vld [vmem:[%s7314_s13] ss:$0 sm:$0xff] }
 0xa09   :  { %v3540_v27 = vpack.c.bf16 %v3535_v33, %v3535_v33  ;;  %v3524_v30 = vmax.f32 %v3514_v62, 0.0  ;;  %v3525_v1 = vmax.f32 %v3515_v40, 0.0  ;;  %v3483_v8 = vadd.f32 %v7138_v58, %v3465_v14 }
 0xa0a   :  { %v3484_v46 = vadd.f32 %v7147_v57, %v3466_v61  ;;  %v3509_v45 = vmul.f32 %v7119_v48, %v6868_v0  ;;  %v3518_v47 = vadd.f32 %v3508_v10, %v7138_v58  ;;  %v5233_v61 = vld [vmem:[%s7313_s16 + $0x38] sm:$0xff]   ;;  %v4407_v10 = vld [vmem:[%s7315_s15] ss:$0 sm:$0xff] }
 0xa0b   :  { %3905 = vmatmul.mubr.bf16.vlgmr.msra.gmra.mrb[56].mxu0 %v3540_v27  ;;  %v3532_v36 = vmax.f32 %v3524_v30, %v3525_v1  ;;  %v3493_v2 = vmax.f32 %v3483_v8, 0.0 }
 0xa0c   :  { %4637 = vmatpush3.bf16.msra.mxu0 %v5210_v32  ;;  %4652 = vmatprep.mubr.msk.bf16.mxu0 %vm5245_vm13, %v7371_v29  ;;  %v3494_v54 = vmax.f32 %v3484_v46, 0.0  ;;  %v3519_v41 = vadd.f32 %v3509_v45, %v7147_v57  ;;  %v3528_v5 = vmax.f32 %v3518_v47, 0.0  ;;  %v5213_v57 = vld [vmem:[%s7309_s12 + $0x118] sm:$0xff]   ;;  %v5232_v32 = vld [vmem:[%s7313_s16 + $0x30] sm:$0xff]  }
 0xa0d   :  { %v3537_v25 = vmax.f32 %v3497_v50, %v3532_v36  ;;  %4638 = vmatprep.subr.bf16.mxu0 %v7371_v29  ;;  %v4416_v36 = vld [vmem:[%s7316_s17] ss:$0 sm:$0xff] }
 0xa0e   :  { %v3499_v0 = vmax.f32 %v3493_v2, %v3494_v54  ;;  %v3529_v48 = vmax.f32 %v3519_v41, 0.0 }
 0xa0f   :  { %v3542_v58 = vpack.c.bf16 %v3537_v25, %v3537_v25 }
 0xa10   :  { %4639 = vmatpush3.bf16.msra.mxu0 %v5211_v6  ;;  %v3534_v60 = vmax.f32 %v3528_v5, %v3529_v48 }
 0xa11   :  { %3945 = vmatmul.mubr.bf16.vlgmr.msra.gmra.mrb[60].mxu1 %v3542_v58  ;;  %4640 = vmatprep.subr.bf16.mxu0 %v7371_v29 }
 0xa12   :  { %v3539_v16 = vmax.f32 %v3499_v0, %v3534_v60  ;;  %4672 = vmatprep.mubr.msk.bf16.mxu1 %vm5245_vm13, %v7371_v29  ;;  %4657 = vmatpush3.bf16.msra.mxu1 %v5218_v23 }
 0xa13   :  { %4658 = vmatprep.subr.bf16.mxu1 %v7371_v29 }
 0xa14   :  { %4641 = vmatpush3.bf16.msra.mxu0 %v5212_v7  ;;  %v3544_v52 = vpack.c.bf16 %v3539_v16, %v3539_v16 }
 0xa15   :  { %4642 = vmatprep.subr.bf16.mxu0 %v7371_v29 }
 0xa16   :  { %4659 = vmatpush3.bf16.msra.mxu1 %v5219_v44 }
 0xa17   :  { %4660 = vmatprep.subr.bf16.mxu1 %v7371_v29 }
 0xa18   :  { %4643 = vmatpush3.bf16.msra.mxu0 %v5213_v57 }
 0xa19   :  { %4644 = vmatprep.subr.bf16.mxu0 %v7371_v29 }
 0xa1a   :  { %4661 = vmatpush3.bf16.msra.mxu1 %v5220_v13 }
 0xa1b   :  { %4662 = vmatprep.subr.bf16.mxu1 %v7371_v29 }
 0xa1c   :  { %4645 = vmatpush3.bf16.msra.mxu0 %v5214_v63 }
 0xa1d   :  { %4646 = vmatprep.subr.bf16.mxu0 %v7371_v29 }
 0xa1e   :  { %4663 = vmatpush3.bf16.msra.mxu1 %v5221_v59 }
 0xa1f   :  { %4664 = vmatprep.subr.bf16.mxu1 %v7371_v29 }
 0xa20   :  { %4647 = vmatpush3.bf16.msra.mxu0 %v5215_v42 }
 0xa21   :  { %4648 = vmatprep.subr.bf16.mxu0 %v7371_v29 }
 0xa22   :  { %4665 = vmatpush3.bf16.msra.mxu1 %v5222_v4 }
 0xa23   :  { %4666 = vmatprep.subr.bf16.mxu1 %v7371_v29 }
 0xa24   :  { %4649 = vmatpush3.bf16.msra.mxu0 %v5216_v49 }
 0xa25   :  { %4650 = vmatprep.subr.bf16.mxu0 %v7371_v29 }
 0xa26   :  { %4667 = vmatpush3.bf16.msra.mxu1 %v5223_v22 }
 0xa27   :  { %4668 = vmatprep.subr.bf16.mxu1 %v7371_v29 }
 0xa28   :  { %4651 = vmatpush3.bf16.msra.mxu0 %v5217_v51 }
 0xa29   :  { %4676 = vmatprep.subr.bf16.mxu0 %v7371_v29 }
 0xa2a   :  { %4669 = vmatpush3.bf16.msra.mxu1 %v5224_v9 }
 0xa2b   :  { %4653 = vmatmul.mubr.bf16.vlgmr.msra.gmra.mrb[60].mxu0 %v3544_v52  ;;  %4670 = vmatprep.subr.bf16.mxu1 %v7371_v29 }
 0xa2c   :  { %4692 = vmatprep.mubr.msk.bf16.mxu0 %vm5245_vm13, %v7371_v29  ;;  %4677 = vmatpush3.bf16.msra.mxu0 %v5226_v12 }
 0xa2d   :  { %4678 = vmatprep.subr.bf16.mxu0 %v7371_v29 }
 0xa2e   :  { %4671 = vmatpush3.bf16.msra.mxu1 %v5225_v53 }
 0xa30   :  { %4679 = vmatpush3.bf16.msra.mxu0 %v5227_v38 }
 0xa31   :  { %4680 = vmatprep.subr.bf16.mxu0 %v7371_v29 }
 0xa34   :  { %4681 = vmatpush3.bf16.msra.mxu0 %v5228_v24 }
 0xa35   :  { %4682 = vmatprep.subr.bf16.mxu0 %v7371_v29 }
 0xa38   :  { %4683 = vmatpush3.bf16.msra.mxu0 %v5229_v37 }
 0xa39   :  { %4684 = vmatprep.subr.bf16.mxu0 %v7371_v29 }
 0xa3c   :  { %4685 = vmatpush3.bf16.msra.mxu0 %v5230_v19 }
 0xa3d   :  { %4686 = vmatprep.subr.bf16.mxu0 %v7371_v29 }
 0xa40   :  { %4687 = vmatpush3.bf16.msra.mxu0 %v5231_v3 }
 0xa41   :  { %4688 = vmatprep.subr.bf16.mxu0 %v7371_v29 }
 0xa44   :  { %4689 = vmatpush3.bf16.msra.mxu0 %v5232_v32 }
 0xa45   :  { %4690 = vmatprep.subr.bf16.mxu0 %v7371_v29 }
 0xa48   :  { %4691 = vmatpush3.bf16.msra.mxu0 %v5233_v61 }
 0xade   :  { %v4581_v11 = vpop.f32.mrb[56].mxu0 }
 0xadf   :  { %v4582_v15 = vpop.f32.mrb[57].mxu0 }
 0xae0   :  { %v4583_v55 = vadd.f32 %v4582_v15, %v4581_v11  ;;  %v4584_v56 = vpop.f32.mrb[58].mxu0 }
 0xae1   :  { %v4585_v43 = vpop.f32.mrb[59].mxu0 }
 0xae2   :  { %v3907_v17 = vadd.f32 %v4583_v55, %v4366_v21 }
 0xae4   :  { %v4603_v35 = vpop.f32.mrb[60].mxu1 }
 0xae5   :  { %v4604_v18 = vpop.f32.mrb[61].mxu1 }
 0xae6   :  { %v4605_v39 = vadd.f32 %v4604_v18, %v4603_v35  ;;  %v4606_v26 = vpop.f32.mrb[62].mxu1 }
 0xae7   :  { %v4607_v34 = vpop.f32.mrb[63].mxu1 }
 0xae8   :  { %v3947_v28 = vadd.f32 %v4605_v39, %v3907_v17 }
 0xafe   :  { %v3986_v20 = vpop.f32.mrb[60].mxu0 }
 0xaff   :  { %v3987_v31 = vadd.f32 %v3986_v20, %v3947_v28  ;;  %v4654_v33 = vpop.f32.mrb[61].mxu0 }
 0xb00   :  { %v3989_v62 = vpop.f32.mrb[62].mxu0 }
 0xb01   :  { %v3992_v40 = vmax.f32 %v3987_v31, 0.0  ;;  %v4655_v14 = vpop.f32.mrb[63].mxu0 }
 0xb03   :  { %v3993_v50 = vpack.c.bf16 %v3992_v40, %v3992_v40 }
 0xb05   :  { %4673 = vmatmul.mubr.bf16.vlgmr.msra.gmra.mrb[64].mxu1 %v3993_v50 }
 0xbd8   :  { %v4099_v27 = vpop.f32.mrb[64].mxu1 }
 0xbd9   :  { %v4100_v30 = vadd.f32 %v4407_v10, %v4099_v27  ;;  %v4674_v1 = vpop.f32.mrb[65].mxu1 }
 0xbda   :  { %v4102_v8 = vpop.f32.mrb[66].mxu1 }
 0xbdb   :  { %v4105_v46 = vmax.f32 %v4100_v30, 0.0  ;;  %v4675_v45 = vpop.f32.mrb[67].mxu1 }
 0xbdd   :  { %v4106_v47 = vpack.c.bf16 %v4105_v46, %v4105_v46 }
 0xbdf   :  { %4693 = vmatmul.mubr.bf16.vlgmr.msra.gmra.mrb[64].mxu0 %v4106_v47 }
 0xcb2   :  { %v4212_v2 = vpop.f32.mrb[64].mxu0 }
 0xcb3   :  { %v4213_v6 = vadd.f32 %v4416_v36, %v4212_v2  ;;  %v4694_v29 = vpop.f32.mrb[65].mxu0 }
 0xcb4   :  { %v4215_v54 = vpop.f32.mrb[66].mxu0 }
 0xcb5   :  { %4218 = vst [vmem:[%s7317_s18] sm:$0xff] %v4213_v6  ;;  %v4695_v41 = vpop.f32.mrb[67].mxu0 }

</bundles_post_ra>
